<compile_context>
chip_gen: v7x
topology: tpu7x:2x2x1
jax: 0.10.0
libtpu: 0.0.40
codegen_flags: <defaults>
</compile_context>

<pallas_src>
import functools

import jax
import jax.numpy as jnp
from jax.experimental import pallas as pl
from jax.experimental.pallas import tpu as pltpu


# ----------------------------------------------------------------------- helpers

def _round_up(x, mult):
    return ((x + mult - 1) // mult) * mult


def _pick_chunk(n_img, hw, max_rows=2048):
    """Images per grid step: a multiple of 8 (sublane-aligned scratch writes) that
    divides n_img and keeps the per-step conv working set to ~max_rows im2col rows."""
    divisors = [c for c in range(8, n_img + 1, 8) if n_img % c == 0]
    if not divisors:
        return n_img                       # tiny / odd batch: single chunk
    fitting = [c for c in divisors if c * hw <= max_rows]
    return max(fitting) if fitting else min(divisors)


# ----------------------------------------------------------------------- fused kernel

def protoclr_kernel(x_ref, wt_ref, bc_ref, gap_ref, wf_ref, bf_ref, *rest,
                    n_chunk, ways, n_support, n_query):
    if n_support > 1:
        psel_ref, stats_ref, z_ref = rest
    else:
        psel_ref = None
        stats_ref, z_ref = rest

    i = pl.program_id(0)

    # ---- encoder on this image chunk --------------------------------------------
    # 3x3 conv as ONE K=9*Cin MXU matmul over the wrapper-side im2col block.
    conv = jnp.dot(x_ref[...], wt_ref[...],
                   preferred_element_type=jnp.float32)            # (n_chunk*hw, c_pad)
    conv = jnp.maximum(conv + bc_ref[...], 0.0)                   # bias + ReLU

    # Global average pool as a block-diagonal MXU matmul (selector precomputed).
    pooled = jnp.dot(gap_ref[...], conv,
                     preferred_element_type=jnp.float32)          # (n_chunk, c_pad)

    # FC head.
    z = jnp.dot(pooled, wf_ref[...],
                preferred_element_type=jnp.float32) + bf_ref[...]  # (n_chunk, z_pad)

    # Stash embeddings of this chunk (scratch persists across grid steps).
    start = i * n_chunk
    if n_chunk % 8 == 0:
        start = pl.multiple_of(start, 8)
    z_ref[pl.ds(start, n_chunk), :] = z

    # ---- final grid step: prototypes, distances, loss, accuracy ------------------
    @pl.when(i == pl.num_programs(0) - 1)
    def _():
        n_sup = ways * n_support
        n_qry = ways * n_query

        z_all = z_ref[...]                                        # (n_img, z_pad)
        z_support = z_all[:n_sup]
        z_query = z_all[n_sup:n_sup + n_qry]

        if n_support == 1:
            z_proto = z_support                                   # mirrors the module
        else:
            # per-class mean of support embeddings (class-major layout)
            z_proto = jnp.dot(psel_ref[...], z_support,
                              preferred_element_type=jnp.float32)  # (ways, z_pad)

        # squared euclidean distances, direct (q - p)^2 form (matches reference exactly;
        # padded embedding dims are exactly zero so they contribute nothing)
        diff = z_query[:, None, :] - z_proto[None, :, :]          # (Q, ways, z_pad)
        dist = jnp.sum(diff * diff, axis=-1)                      # (Q, ways)

        # one-hot targets from iotas: query q belongs to class q // n_query
        q_idx = jax.lax.broadcasted_iota(jnp.int32, (n_qry, ways), 0)
        c_idx = jax.lax.broadcasted_iota(jnp.int32, (n_qry, ways), 1)
        is_target = (q_idx >= c_idx * n_query) & (q_idx < (c_idx + 1) * n_query)
        yoh = is_target.astype(jnp.float32)

        # softmax cross-entropy over logits = -dist
        logits = -dist
        mmax = jnp.max(logits, axis=-1, keepdims=True)
        lse = mmax + jnp.log(jnp.sum(jnp.exp(logits - mmax), axis=-1, keepdims=True))
        logit_y = jnp.sum(logits * yoh, axis=-1, keepdims=True)
        loss = jnp.mean(lse - logit_y, axis=0, keepdims=True)     # (1, 1)

        # accuracy: first-occurrence argmin over distances (torch.min tie-break),
        # integer class-index comparison
        min_d = jnp.min(dist, axis=-1, keepdims=True)
        pred = jnp.min(jnp.where(dist <= min_d, c_idx, ways),
                       axis=-1, keepdims=True)                    # (Q, 1) int32
        target = jnp.sum(jnp.where(is_target, c_idx, 0),
                         axis=-1, keepdims=True)                  # (Q, 1) int32
        acc = jnp.mean((pred == target).astype(jnp.float32),
                       axis=0, keepdims=True)                     # (1, 1)

        # single lane-dense stats row: lane 0 = loss, lane 1 = accuracy
        lane = jax.lax.broadcasted_iota(jnp.int32, (1, 128), 1)
        stats_ref[...] = jnp.where(lane == 0, loss,
                                   jnp.where(lane == 1, acc, 0.0))


# ----------------------------------------------------------------------- wrapper / glue

def protoclr_fused_call(x_nchw, params, ways, n_support, n_query):
    """x_nchw: (N, Cin, H, W) with rows ordered [support (class-major), query (class-major)]."""
    w_conv, b_conv, w_fc, b_fc = params
    n_img, c_in, img_h, img_w = x_nchw.shape
    c_out = w_conv.shape[0]
    z_dim = w_fc.shape[1]
    hw = img_h * img_w
    k9 = 9 * c_in
    c_pad = _round_up(c_out, 128)          # lane-dense conv channels
    z_pad = _round_up(z_dim, 128)          # lane-dense embedding dim
    n_sup = ways * n_support

    # ---- cheap XLA glue: layout, exact-zero padding, wrapper-side im2col -----------
    x_nhwc = jnp.transpose(x_nchw, (0, 2, 3, 1))
    xp = jnp.pad(x_nhwc, ((0, 0), (1, 1), (1, 1), (0, 0)))
    taps = [xp[:, ky:ky + img_h, kx:kx + img_w, :] for ky in range(3) for kx in range(3)]
    x_col = jnp.concatenate(taps, axis=-1).reshape(n_img * hw, k9)   # (m, 9*Cin)

    # weights packed to match (ky*3+kx)*Cin + ci ordering of x_col; zero-padded channels
    w_packed = jnp.transpose(w_conv, (2, 3, 1, 0)).reshape(k9, c_out)
    w_packed = jnp.pad(w_packed, ((0, 0), (0, c_pad - c_out)))
    b_conv_p = jnp.pad(b_conv, (0, c_pad - c_out)).reshape(1, c_pad)
    w_fc_p = jnp.pad(w_fc, ((0, c_pad - c_out), (0, z_pad - z_dim)))
    b_fc_p = jnp.pad(b_fc, (0, z_pad - z_dim)).reshape(1, z_pad)

    n_chunk = _pick_chunk(n_img, hw)
    num_chunks = n_img // n_chunk

    # global-average-pool selector (constant, block-diagonal 1/hw)
    r = jnp.arange(n_chunk, dtype=jnp.int32)[:, None]
    c = jnp.arange(n_chunk * hw, dtype=jnp.int32)[None, :]
    gap_sel = jnp.where((c >= r * hw) & (c < (r + 1) * hw),
                        jnp.float32(1.0 / hw), jnp.float32(0.0)).astype(jnp.float32)

    inputs = [x_col, w_packed, b_conv_p, gap_sel, w_fc_p, b_fc_p]
    in_specs = [
        pl.BlockSpec((n_chunk * hw, k9), lambda i: (i, 0)),
        pl.BlockSpec((k9, c_pad), lambda i: (0, 0)),
        pl.BlockSpec((1, c_pad), lambda i: (0, 0)),
        pl.BlockSpec((n_chunk, n_chunk * hw), lambda i: (0, 0)),
        pl.BlockSpec((c_pad, z_pad), lambda i: (0, 0)),
        pl.BlockSpec((1, z_pad), lambda i: (0, 0)),
    ]
    if n_support > 1:
        # prototype-mean selector (class-major support layout)
        pr = jnp.arange(ways, dtype=jnp.int32)[:, None]
        pc = jnp.arange(n_sup, dtype=jnp.int32)[None, :]
        psel = jnp.where((pc >= pr * n_support) & (pc < (pr + 1) * n_support),
                         jnp.float32(1.0 / n_support), jnp.float32(0.0)).astype(jnp.float32)
        inputs.append(psel)
        in_specs.append(pl.BlockSpec((ways, n_sup), lambda i: (0, 0)))

    kernel = functools.partial(protoclr_kernel, n_chunk=n_chunk, ways=ways,
                               n_support=n_support, n_query=n_query)

    stats = pl.pallas_call(
        kernel,
        out_shape=jax.ShapeDtypeStruct((1, 128), jnp.float32),
        grid=(num_chunks,),
        in_specs=in_specs,
        out_specs=pl.BlockSpec((1, 128), lambda i: (0, 0)),
        scratch_shapes=[pltpu.VMEM((n_img, z_pad), jnp.float32)],
        compiler_params=pltpu.CompilerParams(
            # the grid axis carries the z scratch + final reduction -> must be arbitrary
            dimension_semantics=("arbitrary",),
            vmem_limit_bytes=32 * 1024 * 1024),
    )(*inputs)
    return stats[0, 0], stats[0, 1]


# --------------------------------------------------------------------------- ProtoCLR

@functools.partial(jax.jit, static_argnames=("n_support", "n_query"))
def protoclr_forward(data, params, n_support=1, n_query=1):
    """data: (ways, n_support + n_query, C, H, W).  Returns (loss, accuracy)."""
    ways = data.shape[0]
    img_shape = data.shape[-3:]
    # batch_size = 1 in the reference (data.unsqueeze(0)); flattened away here.
    x_support = data[:, :n_support].reshape(ways * n_support, *img_shape)
    x_query = data[:, n_support:].reshape(ways * n_query, *img_shape)
    x = jnp.concatenate([x_support, x_query], axis=0)   # support rows, then query rows
    return protoclr_fused_call(x, params, ways, n_support, n_query)


# ------------------------------------------------------------------- pure-JAX reference

def protoclr_reference(data, params, n_support, n_query):
    w_conv, b_conv, w_fc, b_fc = params
    ways = data.shape[0]
    img_shape = data.shape[-3:]
    x_support = data[:, :n_support].reshape(ways * n_support, *img_shape)
    x_query = data[:, n_support:].reshape(ways * n_query, *img_shape)
    x = jnp.concatenate([x_support, x_query], axis=0)
    y = jax.lax.conv_general_dilated(x, w_conv, (1, 1), 'SAME',
                                     dimension_numbers=('NCHW', 'OIHW', 'NCHW'),
                                     precision=jax.lax.Precision.HIGHEST)
    y = jax.nn.relu(y + b_conv[None, :, None, None])
    pooled = jnp.mean(y, axis=(2, 3))
    z = jnp.dot(pooled, w_fc, precision=jax.lax.Precision.HIGHEST) + b_fc
    z_support, z_query = z[:ways * n_support], z[ways * n_support:]
    if n_support == 1:
        z_proto = z_support
    else:
        z_proto = z_support.reshape(ways, n_support, -1).mean(axis=1)
    dist = jnp.sum((z_query[:, None, :] - z_proto[None, :, :]) ** 2, axis=-1)
    y_query = jnp.repeat(jnp.arange(ways), n_query)
    logp = jax.nn.log_softmax(-dist, axis=-1)
    loss = -jnp.mean(logp[jnp.arange(dist.shape[0]), y_query])
    pred = jnp.argmin(dist, axis=-1)
    acc = jnp.mean((pred == y_query).astype(jnp.float32))
    return loss, acc


# ------------------------------------------------------------------------------- main

if __name__ == "__main__":
    key = jax.random.PRNGKey(0)
    k_data, k_wc, k_bc, k_wf, k_bf = jax.random.split(key, 5)

    c_in, img_h, img_w = 4, 16, 16
    c_mid, z_dim = 16, 64

    # deterministic encoder parameters (synthetic; no checkpoint load)
    w_conv = 0.1 * jax.random.normal(k_wc, (c_mid, c_in, 3, 3), dtype=jnp.float32)
    b_conv = 0.01 * jax.random.normal(k_bc, (c_mid,), dtype=jnp.float32)
    w_fc = 0.1 * jax.random.normal(k_wf, (c_mid, z_dim), dtype=jnp.float32)
    b_fc = 0.01 * jax.random.normal(k_bf, (z_dim,), dtype=jnp.float32)
    params = (w_conv, b_conv, w_fc, b_fc)

    # config (a): exercises prototype means + a 2-step chunked grid (16 images)
    # config (b): module defaults (n_support = n_query = 1), single chunk (8 images)
    for (ways, n_support, n_query) in ((4, 2, 2), (4, 1, 1)):
        data = jax.random.normal(
            jax.random.fold_in(k_data, 10 * n_support + n_query),
            (ways, n_support + n_query, c_in, img_h, img_w), dtype=jnp.float32)

        loss, acc = protoclr_forward(data, params, n_support=n_support, n_query=n_query)
        loss = jax.block_until_ready(loss)
        acc = jax.block_until_ready(acc)

        ref_loss, ref_acc = protoclr_reference(data, params, n_support, n_query)

        assert jnp.isfinite(loss) and jnp.isfinite(acc)
        assert 0.0 <= float(acc) <= 1.0
        assert abs(float(loss) - float(ref_loss)) < 1e-2, (float(loss), float(ref_loss))
        # allow at most a single numerically-tied argmin flip vs the reference
        n_qry_tot = ways * n_query
        assert abs(float(acc) - float(ref_acc)) <= 1.0 / n_qry_tot + 1e-6, \
            (float(acc), float(ref_acc))

    print("KERNEL_OK")
</pallas_src>

<mosaic_0001>
module attributes {stable_mosaic.version = 11 : i64} {
  func.func @protoclr_kernel(%arg0: i32, %arg1: memref<2048x36xf32, #tpu.memory_space<vmem>>, %arg2: memref<36x128xf32, #tpu.memory_space<vmem>>, %arg3: memref<1x128xf32, #tpu.memory_space<vmem>>, %arg4: memref<8x2048xf32, #tpu.memory_space<vmem>>, %arg5: memref<128x128xf32, #tpu.memory_space<vmem>>, %arg6: memref<1x128xf32, #tpu.memory_space<vmem>>, %arg7: memref<4x8xf32, #tpu.memory_space<vmem>>, %arg8: memref<1x128xf32, #tpu.memory_space<vmem>>, %arg9: memref<16x128xf32, #tpu.memory_space<vmem>>) attributes {dimension_semantics = [#tpu.dimension_semantics<arbitrary>], iteration_bounds = array<i64: 2>, scalar_prefetch = 0 : i64, scratch_operands = 1 : i64, tpu.core_type = #tpu.core_type<tc>, window_params = [{transform_indices = @transform_0, window_bounds = array<i64: 2048, 36>}, {pipeline_mode = #tpu.pipeline_mode<synchronous>, transform_indices = @transform_1, window_bounds = array<i64: 36, 128>}, {pipeline_mode = #tpu.pipeline_mode<synchronous>, transform_indices = @transform_2, window_bounds = array<i64: 1, 128>}, {pipeline_mode = #tpu.pipeline_mode<synchronous>, transform_indices = @transform_3, window_bounds = array<i64: 8, 2048>}, {pipeline_mode = #tpu.pipeline_mode<synchronous>, transform_indices = @transform_4, window_bounds = array<i64: 128, 128>}, {pipeline_mode = #tpu.pipeline_mode<synchronous>, transform_indices = @transform_5, window_bounds = array<i64: 1, 128>}, {pipeline_mode = #tpu.pipeline_mode<synchronous>, transform_indices = @transform_6, window_bounds = array<i64: 4, 8>}, {pipeline_mode = #tpu.pipeline_mode<synchronous>, transform_indices = @transform_7, window_bounds = array<i64: 1, 128>}]} {
    %c0 = arith.constant 0 : index
    %c0_0 = arith.constant 0 : index
    %0 = vector.load %arg1[%c0, %c0_0] : memref<2048x36xf32, #tpu.memory_space<vmem>>, vector<2048x36xf32>
    %c0_1 = arith.constant 0 : index
    %c0_2 = arith.constant 0 : index
    %1 = vector.load %arg2[%c0_1, %c0_2] : memref<36x128xf32, #tpu.memory_space<vmem>>, vector<36x128xf32>
    %cst = arith.constant dense<0.000000e+00> : vector<2048x128xf32>
    %2 = tpu.matmul %0, %1, %cst {dimension_numbers = #tpu.dot_dimension_numbers<[1], [0], [0], [1], [0, 0, 1, 1], [], []>} : vector<2048x36xf32>, vector<36x128xf32>, vector<2048x128xf32> -> vector<2048x128xf32>
    %c0_3 = arith.constant 0 : index
    %c0_4 = arith.constant 0 : index
    %3 = vector.load %arg3[%c0_3, %c0_4] : memref<1x128xf32, #tpu.memory_space<vmem>>, vector<1x128xf32>
    %4 = vector.broadcast %3 : vector<1x128xf32> to vector<2048x128xf32>
    %5 = arith.addf %2, %4 : vector<2048x128xf32>
    %cst_5 = arith.constant 0.000000e+00 : f32
    %6 = vector.broadcast %cst_5 : f32 to vector<2048x128xf32>
    %7 = arith.maximumf %5, %6 : vector<2048x128xf32>
    %c0_6 = arith.constant 0 : index
    %c0_7 = arith.constant 0 : index
    %8 = vector.load %arg4[%c0_6, %c0_7] : memref<8x2048xf32, #tpu.memory_space<vmem>>, vector<8x2048xf32>
    %cst_8 = arith.constant dense<0.000000e+00> : vector<8x128xf32>
    %9 = tpu.matmul %8, %7, %cst_8 {dimension_numbers = #tpu.dot_dimension_numbers<[1], [0], [0], [1], [0, 0, 1, 1], [], []>} : vector<8x2048xf32>, vector<2048x128xf32>, vector<8x128xf32> -> vector<8x128xf32>
    %c0_9 = arith.constant 0 : index
    %c0_10 = arith.constant 0 : index
    %10 = vector.load %arg5[%c0_9, %c0_10] : memref<128x128xf32, #tpu.memory_space<vmem>>, vector<128x128xf32>
    %cst_11 = arith.constant dense<0.000000e+00> : vector<8x128xf32>
    %11 = tpu.matmul %9, %10, %cst_11 {dimension_numbers = #tpu.dot_dimension_numbers<[1], [0], [0], [1], [0, 0, 1, 1], [], []>} : vector<8x128xf32>, vector<128x128xf32>, vector<8x128xf32> -> vector<8x128xf32>
    %c0_12 = arith.constant 0 : index
    %c0_13 = arith.constant 0 : index
    %12 = vector.load %arg6[%c0_12, %c0_13] : memref<1x128xf32, #tpu.memory_space<vmem>>, vector<1x128xf32>
    %13 = vector.broadcast %12 : vector<1x128xf32> to vector<8x128xf32>
    %14 = arith.addf %11, %13 : vector<8x128xf32>
    %c8_i32 = arith.constant 8 : i32
    %15 = arith.muli %arg0, %c8_i32 : i32
    %16 = tpu.assume_multiple %15, 8 : i32
    %17 = arith.index_cast %16 : i32 to index
    %c0_14 = arith.constant 0 : index
    %18 = vector.load %arg9[%17, %c0_14] : memref<16x128xf32, #tpu.memory_space<vmem>>, vector<8x128xf32>
    tpu.vector_store %arg9[%17, %c0_14], %14 {strides = array<i32>} : memref<16x128xf32, #tpu.memory_space<vmem>>, vector<8x128xf32>,
    %c1_i32 = arith.constant 1 : i32
    %19 = arith.cmpi eq, %arg0, %c1_i32 : i32
    %20 = arith.extui %19 : i1 to i32
    %c0_i32 = arith.constant 0 : i32
    %21 = arith.cmpi ne, %20, %c0_i32 : i32
    scf.if %21 {
      %c0_15 = arith.constant 0 : index
      %c0_16 = arith.constant 0 : index
      %22 = vector.load %arg9[%c0_15, %c0_16] : memref<16x128xf32, #tpu.memory_space<vmem>>, vector<16x128xf32>
      %23 = vector.extract_strided_slice %22 {offsets = [0, 0], sizes = [8, 128], strides = [1, 1]} : vector<16x128xf32> to vector<8x128xf32>
      %24 = vector.extract_strided_slice %22 {offsets = [8, 0], sizes = [8, 128], strides = [1, 1]} : vector<16x128xf32> to vector<8x128xf32>
      %c0_17 = arith.constant 0 : index
      %c0_18 = arith.constant 0 : index
      %25 = vector.load %arg7[%c0_17, %c0_18] : memref<4x8xf32, #tpu.memory_space<vmem>>, vector<4x8xf32>
      %cst_19 = arith.constant dense<0.000000e+00> : vector<4x128xf32>
      %26 = tpu.matmul %25, %23, %cst_19 {dimension_numbers = #tpu.dot_dimension_numbers<[1], [0], [0], [1], [0, 0, 1, 1], [], []>} : vector<4x8xf32>, vector<8x128xf32>, vector<4x128xf32> -> vector<4x128xf32>
      %27 = vector.shape_cast %24 : vector<8x128xf32> to vector<8x1x128xf32>
      %28 = vector.shape_cast %26 : vector<4x128xf32> to vector<1x4x128xf32>
      %29 = vector.broadcast %27 : vector<8x1x128xf32> to vector<8x4x128xf32>
      %30 = vector.broadcast %28 : vector<1x4x128xf32> to vector<8x4x128xf32>
      %31 = arith.subf %29, %30 : vector<8x4x128xf32>
      %32 = arith.mulf %31, %31 : vector<8x4x128xf32>
      %cst_20 = arith.constant dense<0.000000e+00> : vector<8x4xf32>
      %33 = vector.multi_reduction <add>, %32, %cst_20 [2] : vector<8x4x128xf32> to vector<8x4xf32>
      %34 = tpu.iota {dimensions = array<i32: 0>} : vector<8x4xi32>
      %35 = tpu.iota {dimensions = array<i32: 1>} : vector<8x4xi32>
      %c2_i32 = arith.constant 2 : i32
      %36 = vector.broadcast %c2_i32 : i32 to vector<8x4xi32>
      %37 = arith.muli %35, %36 : vector<8x4xi32>
      %38 = arith.cmpi sge, %34, %37 : vector<8x4xi32>
      %c1_i32_21 = arith.constant 1 : i32
      %39 = vector.broadcast %c1_i32_21 : i32 to vector<8x4xi32>
      %40 = arith.addi %35, %39 : vector<8x4xi32>
      %c2_i32_22 = arith.constant 2 : i32
      %41 = vector.broadcast %c2_i32_22 : i32 to vector<8x4xi32>
      %42 = arith.muli %40, %41 : vector<8x4xi32>
      %43 = arith.cmpi slt, %34, %42 : vector<8x4xi32>
      %44 = arith.andi %38, %43 : vector<8x4xi1>
      %45 = arith.extui %44 : vector<8x4xi1> to vector<8x4xi32>
      %46 = arith.sitofp %45 : vector<8x4xi32> to vector<8x4xf32>
      %cst_23 = arith.constant 0.000000e+00 : f32
      %47 = vector.broadcast %cst_23 : f32 to vector<8x4xf32>
      %48 = arith.subf %47, %33 : vector<8x4xf32>
      %cst_24 = arith.constant dense<0xFF800000> : vector<8xf32>
      %49 = vector.multi_reduction <maximumf>, %48, %cst_24 [1] : vector<8x4xf32> to vector<8xf32>
      %50 = vector.shape_cast %49 : vector<8xf32> to vector<8x1xf32>
      %51 = vector.broadcast %50 : vector<8x1xf32> to vector<8x4xf32>
      %52 = arith.subf %48, %51 : vector<8x4xf32>
      %53 = math.exp %52 : vector<8x4xf32>
      %cst_25 = arith.constant dense<0.000000e+00> : vector<8xf32>
      %54 = vector.multi_reduction <add>, %53, %cst_25 [1] : vector<8x4xf32> to vector<8xf32>
      %55 = vector.shape_cast %54 : vector<8xf32> to vector<8x1xf32>
      %56 = math.log %55 : vector<8x1xf32>
      %57 = arith.addf %50, %56 : vector<8x1xf32>
      %58 = arith.mulf %48, %46 : vector<8x4xf32>
      %cst_26 = arith.constant dense<0.000000e+00> : vector<8xf32>
      %59 = vector.multi_reduction <add>, %58, %cst_26 [1] : vector<8x4xf32> to vector<8xf32>
      %60 = vector.shape_cast %59 : vector<8xf32> to vector<8x1xf32>
      %61 = arith.subf %57, %60 : vector<8x1xf32>
      %cst_27 = arith.constant dense<0.000000e+00> : vector<1xf32>
      %62 = vector.multi_reduction <add>, %61, %cst_27 [0] : vector<8x1xf32> to vector<1xf32>
      %63 = vector.shape_cast %62 : vector<1xf32> to vector<1x1xf32>
      %cst_28 = arith.constant 8.000000e+00 : f32
      %64 = vector.broadcast %cst_28 : f32 to vector<1x1xf32>
      %65 = arith.divf %63, %64 : vector<1x1xf32>
      %cst_29 = arith.constant dense<0x7F800000> : vector<8xf32>
      %66 = vector.multi_reduction <minimumf>, %33, %cst_29 [1] : vector<8x4xf32> to vector<8xf32>
      %67 = vector.shape_cast %66 : vector<8xf32> to vector<8x1xf32>
      %68 = vector.broadcast %67 : vector<8x1xf32> to vector<8x4xf32>
      %69 = arith.cmpf ole, %33, %68 : vector<8x4xf32>
      %c4_i32 = arith.constant 4 : i32
      %70 = vector.broadcast %c4_i32 : i32 to vector<8x4xi32>
      %71 = arith.select %69, %35, %70 : vector<8x4xi1>, vector<8x4xi32>
      %cst_30 = arith.constant dense<2147483647> : vector<8xi32>
      %72 = vector.multi_reduction <minsi>, %71, %cst_30 [1] : vector<8x4xi32> to vector<8xi32>
      %73 = vector.shape_cast %72 : vector<8xi32> to vector<8x1xi32>
      %c0_i32_31 = arith.constant 0 : i32
      %74 = vector.broadcast %c0_i32_31 : i32 to vector<8x4xi32>
      %75 = arith.select %44, %35, %74 : vector<8x4xi1>, vector<8x4xi32>
      %cst_32 = arith.constant dense<0> : vector<8xi32>
      %76 = vector.multi_reduction <add>, %75, %cst_32 [1] : vector<8x4xi32> to vector<8xi32>
      %77 = vector.shape_cast %76 : vector<8xi32> to vector<8x1xi32>
      %78 = arith.cmpi eq, %73, %77 : vector<8x1xi32>
      %79 = arith.extui %78 : vector<8x1xi1> to vector<8x1xi32>
      %80 = arith.sitofp %79 : vector<8x1xi32> to vector<8x1xf32>
      %cst_33 = arith.constant dense<0.000000e+00> : vector<1xf32>
      %81 = vector.multi_reduction <add>, %80, %cst_33 [0] : vector<8x1xf32> to vector<1xf32>
      %82 = vector.shape_cast %81 : vector<1xf32> to vector<1x1xf32>
      %cst_34 = arith.constant 8.000000e+00 : f32
      %83 = vector.broadcast %cst_34 : f32 to vector<1x1xf32>
      %84 = arith.divf %82, %83 : vector<1x1xf32>
      %85 = tpu.iota {dimensions = array<i32: 1>} : vector<1x128xi32>
      %c0_i32_35 = arith.constant 0 : i32
      %86 = vector.broadcast %c0_i32_35 : i32 to vector<1x128xi32>
      %87 = arith.cmpi eq, %85, %86 : vector<1x128xi32>
      %c1_i32_36 = arith.constant 1 : i32
      %88 = vector.broadcast %c1_i32_36 : i32 to vector<1x128xi32>
      %89 = arith.cmpi eq, %85, %88 : vector<1x128xi32>
      %cst_37 = arith.constant 0.000000e+00 : f32
      %90 = vector.shape_cast %84 : vector<1x1xf32> to vector<1x1xf32>
      %91 = vector.broadcast %90 : vector<1x1xf32> to vector<1x128xf32>
      %92 = vector.broadcast %cst_37 : f32 to vector<1x128xf32>
      %93 = arith.select %89, %91, %92 : vector<1x128xi1>, vector<1x128xf32>
      %94 = vector.shape_cast %65 : vector<1x1xf32> to vector<1x1xf32>
      %95 = vector.broadcast %94 : vector<1x1xf32> to vector<1x128xf32>
      %96 = arith.select %87, %95, %93 : vector<1x128xi1>, vector<1x128xf32>
      %c0_38 = arith.constant 0 : index
      %c0_39 = arith.constant 0 : index
      %97 = vector.load %arg8[%c0_38, %c0_39] : memref<1x128xf32, #tpu.memory_space<vmem>>, vector<1x128xf32>
      tpu.vector_store %arg8[%c0_38, %c0_39], %96 {strides = array<i32>} : memref<1x128xf32, #tpu.memory_space<vmem>>, vector<1x128xf32>,
    } else {
    }
    return
  }
  func.func @transform_0(%arg0: i32) -> (i32, i32) {
    %c0_i32 = arith.constant 0 : i32
    %c0_i32_0 = arith.constant 0 : i32
    return %arg0, %c0_i32 : i32, i32
  }
  func.func @transform_1(%arg0: i32) -> (i32, i32) {
    %c0_i32 = arith.constant 0 : i32
    %c0_i32_0 = arith.constant 0 : i32
    %c0_i32_1 = arith.constant 0 : i32
    return %c0_i32, %c0_i32_0 : i32, i32
  }
  func.func @transform_2(%arg0: i32) -> (i32, i32) {
    %c0_i32 = arith.constant 0 : i32
    %c0_i32_0 = arith.constant 0 : i32
    %c0_i32_1 = arith.constant 0 : i32
    return %c0_i32, %c0_i32_0 : i32, i32
  }
  func.func @transform_3(%arg0: i32) -> (i32, i32) {
    %c0_i32 = arith.constant 0 : i32
    %c0_i32_0 = arith.constant 0 : i32
    %c0_i32_1 = arith.constant 0 : i32
    return %c0_i32, %c0_i32_0 : i32, i32
  }
  func.func @transform_4(%arg0: i32) -> (i32, i32) {
    %c0_i32 = arith.constant 0 : i32
    %c0_i32_0 = arith.constant 0 : i32
    %c0_i32_1 = arith.constant 0 : i32
    return %c0_i32, %c0_i32_0 : i32, i32
  }
  func.func @transform_5(%arg0: i32) -> (i32, i32) {
    %c0_i32 = arith.constant 0 : i32
    %c0_i32_0 = arith.constant 0 : i32
    %c0_i32_1 = arith.constant 0 : i32
    return %c0_i32, %c0_i32_0 : i32, i32
  }
  func.func @transform_6(%arg0: i32) -> (i32, i32) {
    %c0_i32 = arith.constant 0 : i32
    %c0_i32_0 = arith.constant 0 : i32
    %c0_i32_1 = arith.constant 0 : i32
    return %c0_i32, %c0_i32_0 : i32, i32
  }
  func.func @transform_7(%arg0: i32) -> (i32, i32) {
    %c0_i32 = arith.constant 0 : i32
    %c0_i32_0 = arith.constant 0 : i32
    %c0_i32_1 = arith.constant 0 : i32
    return %c0_i32, %c0_i32_0 : i32, i32
  }
}

</mosaic_0001>

<bundles_post_ra>
// kernel: protoclr_forward.1
= control target key start
LH: loop header
LB: loop body
LE: loop exit
PB: predicated region body
PF: predicated region fallthrough
CT: control target
= control target key end

     0   :  { %s6071_s24 = smov 0   ;;  %s7515_s0 = inlined_call_operand.vmem [shape: f32[4096,36], index: 0, kind: input, shape index: {}]   ;;  %s7516_s1 = inlined_call_operand.vmem [shape: f32[36,128], index: 1, kind: input, shape index: {}]   ;;  %s7517_s2 = inlined_call_operand.vmem [shape: f32[1,128], index: 2, kind: input, shape index: {}]   ;;  %s7518_s3 = inlined_call_operand.vmem [shape: f32[8,2048], index: 3, kind: input, shape index: {}]   ;;  %s7519_s4 = inlined_call_operand.vmem [shape: f32[128,128], index: 4, kind: input, shape index: {}]   ;;  %s7520_s5 = inlined_call_operand.vmem [shape: f32[1,128], index: 5, kind: input, shape index: {}]   ;;  %s7521_s6 = inlined_call_operand.vmem [shape: f32[4,8], index: 6, kind: input, shape index: {}]   ;;  %s7522_s7 = inlined_call_operand.vmem [shape: f32[1,128], index: 7, kind: output, shape index: {}]  }
   0x1 LB: > { %s6077_s25 = sadd.s32 4294967295, %s6022_s24   ;;  %p4421_p0 = scmp.ge.s32.totalorder %s6022_s24, 1  ;;  %s6022_s24 = sphi %s6071_s24, %s17_s24  }
   0x2   : > { %p233_p1 = scmp.lt.s32.totalorder %s6022_s24, 3 }
   0x4   : > { %p234_p2 = pnand %p4421_p0, %p233_p1 }
   0x5   : > { %v522_v0 = vld [vmem:[%s7516_s1] sm:$0xff] (!%p234_p2)  ;;  %v523_v1 = vld [vmem:[%s7516_s1 + $0x8] sm:$0xff] (!%p234_p2)  ;;  %v524_v2 = vld [vmem:[%s7516_s1 + $0x10] sm:$0xff] (!%p234_p2)  ;;  %s4422_s9 = sshll.u32 (!%p234_p2), %s6077_s25, 8  ;;  %vm534_vm0 = vcmask (!%p234_p2), 293888   ;;  %vm1303_vm1 = vcmask (!%p234_p2), 1043456  }
   0x6   : > { %237 = sbr.rel (%p234_p2) target bundleno = 2125 (0x84d), region = 48  ;;  %v5684_v3 = vpack.c.bf16 (!%p234_p2), %v523_v1, %v522_v0  ;;  %v525_v4 = vld [vmem:[%s7516_s1 + $0x18] sm:$0xff] (!%p234_p2)  ;;  %p261_p3 = scmp.lt.s32.totalorder (!%p234_p2), %s4422_s9, 511  ;;  %v526_v6 = vld [vmem:[%s7516_s1 + $0x20] sm:$0xf] (!%p234_p2)  ;;  %vm6025_vm2 = vmmov (!%p234_p2), 0  }
   0x7   : > { %v5688_v5 = vpack.c.bf16 (!%p234_p2), %v525_v4, %v524_v2  ;;  %s4683_s27 = sshll.u32 (!%p234_p2), %s6077_s25, 3  ;;  %p4684_p4 = scmp.ne.s32.totalorder (!%p234_p2), %s6077_s25, 1 }
   0x8   : > { %5685 = vmatprep.subr.bf16.mxu0 (!%p234_p2), %v5684_v3  ;;  %5972 = vmatprep.subr.bf16.mxu1 (!%p234_p2), %v5684_v3  ;;  %s3578_s30 = scalar_lea.vmem (!%p234_p2), [#allocation2], %s4683_s27 }
   0x9   : > { %5687 = vmatpush3.bf16.msra.mxu0 (!%p234_p2), %v5684_v3  ;;  %5975 = vmatpush3.bf16.msra.mxu1 (!%p234_p2), %v5684_v3 }
   0xa   : > { %5689 = vmatprep.subr.bf16.mxu0 (!%p234_p2), %v5688_v5  ;;  %5973 = vmatprep.subr.bf16.mxu1 (!%p234_p2), %v5688_v5 }
   0xd   : > { %s7528_s9 = smov (!%p261_p3, %s4422_s9), 511  ;;  %5691 = vmatpush3.bf16.msra.mxu0 %v5688_v5  ;;  %5976 = vmatpush3.bf16.msra.mxu1 %v5688_v5  ;;  %vm3587_vm3 = vcmask (!%p4684_p4), 64512   ;;  %vm6028_vm4 = vmmov (!%p4684_p4), 0   ;;  %vm3851_vm5 = vcmask (!%p4684_p4), 1041409   ;;  %vm3853_vm6 = vcmask (!%p4684_p4), 1042434  }
   0xe   : > { %s4423_s12 = sshll.u32 %s7528_s9, 3  ;;  %5258 = vmatprep.subr.msk.mxu0 %vm1303_vm1, %v526_v6  ;;  %5974 = vmatprep.subr.msk.mxu1 %vm1303_vm1, %v526_v6  ;;  %vm3855_vm7 = vcmask (!%p4684_p4), 1043459   ;;  %vm3857_vm8 = vcmask (!%p4684_p4), 1044484   ;;  %vm3859_vm9 = vcmask (!%p4684_p4), 1045509   ;;  %vm3861_vm10 = vcmask (!%p4684_p4), 1046534  }
   0xf   : > { %s6100_s17 = scalar_lea.vmem %s7515_s0, %s4423_s12  ;;  %vm3863_vm11 = vcmask (!%p4684_p4), 1047559   ;;  %vm3866_vm12 = vcmask (!%p4684_p4), 31744  }
  0x10   : > { %v266_v7 = vld [vmem:[%s6100_s17] sm:$0xff]  ;;  %v267_v8 = vld [vmem:[%s6100_s17 + $0x8] sm:$0xff]  ;;  %v268_v9 = vld [vmem:[%s6100_s17 + $0x10] sm:$0xff] }
  0x11   : > { %5260 = vmatprep.mubr.msk.f32.mxu0 %vm534_vm0, %v266_v7  ;;  %5259 = vmatpush3.msk.msra.mxu0 %vm1303_vm1, %v526_v6  ;;  %v269_v10 = vld [vmem:[%s6100_s17 + $0x18] sm:$0xff]  ;;  %v270_v11 = vld [vmem:[%s6100_s17 + $0x20] sm:$0xff]  ;;  %v271_v12 = vld [vmem:[%s6100_s17 + $0x28] sm:$0xff] }
  0x12   : > { %5261 = vmatmul.mubr.msk.f32.vlgmr.msra.gmra.mrb[0].mxu0 %vm534_vm0, %v267_v8  ;;  %5977 = vmatpush3.msk.msra.mxu1 %vm1303_vm1, %v526_v6  ;;  %v272_v13 = vld [vmem:[%s6100_s17 + $0x30] sm:$0xff]  ;;  %v273_v14 = vld [vmem:[%s6100_s17 + $0x38] sm:$0xff]  ;;  %v274_v15 = vld [vmem:[%s6100_s17 + $0x40] sm:$0xff] }
  0x13   : > { %5263 = vmatprep.mubr.msk.f32.mxu0 %vm534_vm0, %v268_v9  ;;  %v275_v16 = vld [vmem:[%s6100_s17 + $0x48] sm:$0xff]  ;;  %v276_v17 = vld [vmem:[%s6100_s17 + $0x50] sm:$0xff]  ;;  %v277_v18 = vld [vmem:[%s6100_s17 + $0x58] sm:$0xff] }
  0x14   : > { %v278_v19 = vld [vmem:[%s6100_s17 + $0x60] sm:$0xff]  ;;  %v279_v20 = vld [vmem:[%s6100_s17 + $0x68] sm:$0xff]  ;;  %v280_v21 = vld [vmem:[%s6100_s17 + $0x70] sm:$0xff] }
  0x15   : > { %v281_v22 = vld [vmem:[%s6100_s17 + $0x78] sm:$0xff]  ;;  %v282_v23 = vld [vmem:[%s6100_s17 + $0x80] sm:$0xff]  ;;  %v283_v24 = vld [vmem:[%s6100_s17 + $0x88] sm:$0xff] }
  0x16   : > { %5264 = vmatmul.mubr.msk.f32.gmra.mrb[2].mxu0 %vm534_vm0, %v269_v10  ;;  %v284_v25 = vld [vmem:[%s6100_s17 + $0x90] sm:$0xff]  ;;  %v285_v26 = vld [vmem:[%s6100_s17 + $0x98] sm:$0xff]  ;;  %v286_v27 = vld [vmem:[%s6100_s17 + $0xa0] sm:$0xff] }
  0x17   : > { %5266 = vmatprep.mubr.msk.f32.mxu0 %vm534_vm0, %v270_v11  ;;  %v287_v28 = vld [vmem:[%s6100_s17 + $0xa8] sm:$0xff]  ;;  %v288_v29 = vld [vmem:[%s6100_s17 + $0xb0] sm:$0xff]  ;;  %v289_v30 = vld [vmem:[%s6100_s17 + $0xb8] sm:$0xff] }
  0x18   : > { %v290_v31 = vld [vmem:[%s6100_s17 + $0xc0] sm:$0xff]  ;;  %v291_v32 = vld [vmem:[%s6100_s17 + $0xc8] sm:$0xff]  ;;  %v292_v33 = vld [vmem:[%s6100_s17 + $0xd0] sm:$0xff] }
  0x19   : > { %v293_v34 = vld [vmem:[%s6100_s17 + $0xd8] sm:$0xff]  ;;  %v294_v35 = vld [vmem:[%s6100_s17 + $0xe0] sm:$0xff]  ;;  %v295_v36 = vld [vmem:[%s6100_s17 + $0xe8] sm:$0xff] }
  0x1a   : > { %5267 = vmatmul.mubr.msk.f32.gmra.mrb[4].mxu0 %vm534_vm0, %v271_v12  ;;  %v296_v37 = vld [vmem:[%s6100_s17 + $0xf0] sm:$0xff]  ;;  %v297_v38 = vld [vmem:[%s6100_s17 + $0xf8] sm:$0xff]  ;;  %v298_v39 = vld [vmem:[%s6100_s17 + $0x100] sm:$0xff] }
  0x1b   : > { %5269 = vmatprep.mubr.msk.f32.mxu0 %vm534_vm0, %v272_v13  ;;  %v299_v40 = vld [vmem:[%s6100_s17 + $0x108] sm:$0xff]  ;;  %v460_v41 = vld [vmem:[%s6100_s17 + $0x610] sm:$0xff]  ;;  %v461_v43 = vld [vmem:[%s6100_s17 + $0x618] sm:$0xff] }
  0x1c   : > { %v300_v42 = vld [vmem:[%s6100_s17 + $0x110] sm:$0xff]  ;;  %5551 = vmatprep.mubr.msk.f32.mxu1 %vm534_vm0, %v460_v41  ;;  %v301_v44 = vld [vmem:[%s6100_s17 + $0x118] sm:$0xff]  ;;  %v462_v45 = vld [vmem:[%s6100_s17 + $0x620] sm:$0xff] }
  0x1d   : > { %5552 = vmatmul.mubr.msk.f32.vlgmr.msra.gmra.mrb[0].mxu1 %vm534_vm0, %v461_v43  ;;  %v302_v46 = vld [vmem:[%s6100_s17 + $0x120] sm:$0xff]  ;;  %v463_v47 = vld [vmem:[%s6100_s17 + $0x628] sm:$0xff]  ;;  %v464_v49 = vld [vmem:[%s6100_s17 + $0x630] sm:$0xff] }
  0x1e   : > { %5270 = vmatmul.mubr.msk.f32.gmra.mrb[6].mxu0 %vm534_vm0, %v273_v14  ;;  %5554 = vmatprep.mubr.msk.f32.mxu1 %vm534_vm0, %v462_v45  ;;  %v303_v48 = vld [vmem:[%s6100_s17 + $0x128] sm:$0xff]  ;;  %v304_v50 = vld [vmem:[%s6100_s17 + $0x130] sm:$0xff]  ;;  %v465_v51 = vld [vmem:[%s6100_s17 + $0x638] sm:$0xff] }
  0x1f   : > { %5272 = vmatprep.mubr.msk.f32.mxu0 %vm534_vm0, %v274_v15  ;;  %v305_v52 = vld [vmem:[%s6100_s17 + $0x138] sm:$0xff]  ;;  %v466_v53 = vld [vmem:[%s6100_s17 + $0x640] sm:$0xff]  ;;  %v467_v55 = vld [vmem:[%s6100_s17 + $0x648] sm:$0xff] }
  0x20   : > { %v306_v54 = vld [vmem:[%s6100_s17 + $0x140] sm:$0xff]  ;;  %v307_v56 = vld [vmem:[%s6100_s17 + $0x148] sm:$0xff]  ;;  %v468_v57 = vld [vmem:[%s6100_s17 + $0x650] sm:$0xff] }
  0x21   : > { %5555 = vmatmul.mubr.msk.f32.gmra.mrb[2].mxu1 %vm534_vm0, %v463_v47  ;;  %v308_v58 = vld [vmem:[%s6100_s17 + $0x150] sm:$0xff]  ;;  %v469_v59 = vld [vmem:[%s6100_s17 + $0x658] sm:$0xff]  ;;  %v310_v61 = vld [vmem:[%s6100_s17 + $0x160] sm:$0xff] }
  0x22   : > { %5273 = vmatmul.mubr.msk.f32.gmra.mrb[8].mxu0 %vm534_vm0, %v275_v16  ;;  %5557 = vmatprep.mubr.msk.f32.mxu1 %vm534_vm0, %v464_v49  ;;  %v309_v60 = vld [vmem:[%s6100_s17 + $0x158] sm:$0xff]  ;;  %v470_v62 = vld [vmem:[%s6100_s17 + $0x660] sm:$0xff]  ;;  %v471_v63 = vld [vmem:[%s6100_s17 + $0x668] sm:$0xff] }
  0x23   : > { %5275 = vmatprep.mubr.msk.f32.mxu0 %vm534_vm0, %v276_v17  ;;  %v311_v0 = vld [vmem:[%s6100_s17 + $0x168] sm:$0xff]  ;;  %v312_v1 = vld [vmem:[%s6100_s17 + $0x170] sm:$0xff]  ;;  %v473_v3 = vld [vmem:[%s6100_s17 + $0x678] sm:$0xff] }
  0x24   : > { %v472_v2 = vld [vmem:[%s6100_s17 + $0x670] sm:$0xff]  ;;  %v313_v4 = vld [vmem:[%s6100_s17 + $0x178] sm:$0xff]  ;;  %v314_v5 = vld [vmem:[%s6100_s17 + $0x180] sm:$0xff] }
  0x25   : > { %5558 = vmatmul.mubr.msk.f32.gmra.mrb[4].mxu1 %vm534_vm0, %v465_v51  ;;  %v474_v6 = vld [vmem:[%s6100_s17 + $0x680] sm:$0xff]  ;;  %v475_v7 = vld [vmem:[%s6100_s17 + $0x688] sm:$0xff]  ;;  %v316_v9 = vld [vmem:[%s6100_s17 + $0x190] sm:$0xff] }
  0x26   : > { %5276 = vmatmul.mubr.msk.f32.gmra.mrb[10].mxu0 %vm534_vm0, %v277_v18  ;;  %5560 = vmatprep.mubr.msk.f32.mxu1 %vm534_vm0, %v466_v53  ;;  %v315_v8 = vld [vmem:[%s6100_s17 + $0x188] sm:$0xff]  ;;  %v476_v10 = vld [vmem:[%s6100_s17 + $0x690] sm:$0xff]  ;;  %v477_v11 = vld [vmem:[%s6100_s17 + $0x698] sm:$0xff] }
  0x27   : > { %5278 = vmatprep.mubr.msk.f32.mxu0 %vm534_vm0, %v278_v19  ;;  %v317_v12 = vld [vmem:[%s6100_s17 + $0x198] sm:$0xff]  ;;  %v318_v13 = vld [vmem:[%s6100_s17 + $0x1a0] sm:$0xff]  ;;  %v479_v15 = vld [vmem:[%s6100_s17 + $0x6a8] sm:$0xff] }
  0x28   : > { %v478_v14 = vld [vmem:[%s6100_s17 + $0x6a0] sm:$0xff]  ;;  %v319_v16 = vld [vmem:[%s6100_s17 + $0x1a8] sm:$0xff]  ;;  %v320_v17 = vld [vmem:[%s6100_s17 + $0x1b0] sm:$0xff] }
  0x29   : > { %5561 = vmatmul.mubr.msk.f32.gmra.mrb[6].mxu1 %vm534_vm0, %v467_v55  ;;  %v480_v18 = vld [vmem:[%s6100_s17 + $0x6b0] sm:$0xff]  ;;  %v481_v19 = vld [vmem:[%s6100_s17 + $0x6b8] sm:$0xff]  ;;  %v334_v45 = vld [vmem:[%s6100_s17 + $0x220] sm:$0xff] }
  0x2a   : > { %5279 = vmatmul.mubr.msk.f32.gmra.mrb[12].mxu0 %vm534_vm0, %v279_v20  ;;  %5563 = vmatprep.mubr.msk.f32.mxu1 %vm534_vm0, %v468_v57  ;;  %v321_v20 = vld [vmem:[%s6100_s17 + $0x1b8] sm:$0xff]  ;;  %v332_v41 = vld [vmem:[%s6100_s17 + $0x210] sm:$0xff]  ;;  %v495_v47 = vld [vmem:[%s6100_s17 + $0x728] sm:$0xff] }
  0x2b   : > { %5281 = vmatprep.mubr.msk.f32.mxu0 %vm534_vm0, %v280_v21  ;;  %v322_v21 = vld [vmem:[%s6100_s17 + $0x1c0] sm:$0xff]  ;;  %v493_v43 = vld [vmem:[%s6100_s17 + $0x718] sm:$0xff]  ;;  %v336_v49 = vld [vmem:[%s6100_s17 + $0x230] sm:$0xff] }
  0x2c   : > { %v497_v51 = vld [vmem:[%s6100_s17 + $0x738] sm:$0xff]  ;;  %v338_v53 = vld [vmem:[%s6100_s17 + $0x240] sm:$0xff]  ;;  %v499_v55 = vld [vmem:[%s6100_s17 + $0x748] sm:$0xff] }
  0x2d   : > { %5564 = vmatmul.mubr.msk.f32.gmra.mrb[8].mxu1 %vm534_vm0, %v469_v59  ;;  %v340_v57 = vld [vmem:[%s6100_s17 + $0x250] sm:$0xff]  ;;  %v501_v59 = vld [vmem:[%s6100_s17 + $0x758] sm:$0xff] }
  0x2e   : > { %5282 = vmatmul.mubr.msk.f32.gmra.mrb[14].mxu0 %vm534_vm0, %v281_v22  ;;  %5566 = vmatprep.mubr.msk.f32.mxu1 %vm534_vm0, %v470_v62  ;;  %v482_v22 = vld [vmem:[%s6100_s17 + $0x6c0] sm:$0xff] }
  0x2f   : > { %5284 = vmatprep.mubr.msk.f32.mxu0 %vm534_vm0, %v282_v23  ;;  %v483_v23 = vld [vmem:[%s6100_s17 + $0x6c8] sm:$0xff]  ;;  %v502_v62 = vld [vmem:[%s6100_s17 + $0x760] sm:$0xff] }
  0x31   : > { %5567 = vmatmul.mubr.msk.f32.gmra.mrb[10].mxu1 %vm534_vm0, %v471_v63  ;;  %v503_v63 = vld [vmem:[%s6100_s17 + $0x768] sm:$0xff] }
  0x32   : > { %5285 = vmatmul.mubr.msk.f32.gmra.mrb[16].mxu0 %vm534_vm0, %v283_v24  ;;  %5569 = vmatprep.mubr.msk.f32.mxu1 %vm534_vm0, %v472_v2  ;;  %v323_v24 = vld [vmem:[%s6100_s17 + $0x1c8] sm:$0xff]  ;;  %v504_v2 = vld [vmem:[%s6100_s17 + $0x770] sm:$0xff] }
  0x33   : > { %5287 = vmatprep.mubr.msk.f32.mxu0 %vm534_vm0, %v284_v25  ;;  %v324_v25 = vld [vmem:[%s6100_s17 + $0x1d0] sm:$0xff] }
  0x35   : > { %5570 = vmatmul.mubr.msk.f32.gmra.mrb[12].mxu1 %vm534_vm0, %v473_v3  ;;  %v505_v3 = vld [vmem:[%s6100_s17 + $0x778] sm:$0xff] }
  0x36   : > { %5288 = vmatmul.mubr.msk.f32.gmra.mrb[18].mxu0 %vm534_vm0, %v285_v26  ;;  %5572 = vmatprep.mubr.msk.f32.mxu1 %vm534_vm0, %v474_v6  ;;  %v484_v26 = vld [vmem:[%s6100_s17 + $0x6d0] sm:$0xff]  ;;  %v506_v6 = vld [vmem:[%s6100_s17 + $0x780] sm:$0xff] }
  0x37   : > { %5290 = vmatprep.mubr.msk.f32.mxu0 %vm534_vm0, %v286_v27  ;;  %v485_v27 = vld [vmem:[%s6100_s17 + $0x6d8] sm:$0xff] }
  0x39   : > { %5573 = vmatmul.mubr.msk.f32.gmra.mrb[14].mxu1 %vm534_vm0, %v475_v7  ;;  %v507_v7 = vld [vmem:[%s6100_s17 + $0x788] sm:$0xff] }
  0x3a   : > { %5291 = vmatmul.mubr.msk.f32.gmra.mrb[20].mxu0 %vm534_vm0, %v287_v28  ;;  %5575 = vmatprep.mubr.msk.f32.mxu1 %vm534_vm0, %v476_v10  ;;  %v325_v28 = vld [vmem:[%s6100_s17 + $0x1d8] sm:$0xff]  ;;  %v508_v10 = vld [vmem:[%s6100_s17 + $0x790] sm:$0xff] }
  0x3b   : > { %5293 = vmatprep.mubr.msk.f32.mxu0 %vm534_vm0, %v288_v29  ;;  %v326_v29 = vld [vmem:[%s6100_s17 + $0x1e0] sm:$0xff] }
  0x3d   : > { %5576 = vmatmul.mubr.msk.f32.gmra.mrb[16].mxu1 %vm534_vm0, %v477_v11  ;;  %v509_v11 = vld [vmem:[%s6100_s17 + $0x798] sm:$0xff] }
  0x3e   : > { %5294 = vmatmul.mubr.msk.f32.gmra.mrb[22].mxu0 %vm534_vm0, %v289_v30  ;;  %5578 = vmatprep.mubr.msk.f32.mxu1 %vm534_vm0, %v478_v14  ;;  %v486_v30 = vld [vmem:[%s6100_s17 + $0x6e0] sm:$0xff] }
  0x3f   : > { %5296 = vmatprep.mubr.msk.f32.mxu0 %vm534_vm0, %v290_v31  ;;  %v487_v31 = vld [vmem:[%s6100_s17 + $0x6e8] sm:$0xff]  ;;  %v510_v14 = vld [vmem:[%s6100_s17 + $0x7a0] sm:$0xff] }
  0x41   : > { %5579 = vmatmul.mubr.msk.f32.gmra.mrb[18].mxu1 %vm534_vm0, %v479_v15  ;;  %v511_v15 = vld [vmem:[%s6100_s17 + $0x7a8] sm:$0xff] }
  0x42   : > { %5297 = vmatmul.mubr.msk.f32.gmra.mrb[24].mxu0 %vm534_vm0, %v291_v32  ;;  %5581 = vmatprep.mubr.msk.f32.mxu1 %vm534_vm0, %v480_v18  ;;  %v327_v32 = vld [vmem:[%s6100_s17 + $0x1e8] sm:$0xff]  ;;  %v512_v18 = vld [vmem:[%s6100_s17 + $0x7b0] sm:$0xff] }
  0x43   : > { %5299 = vmatprep.mubr.msk.f32.mxu0 %vm534_vm0, %v292_v33  ;;  %v328_v33 = vld [vmem:[%s6100_s17 + $0x1f0] sm:$0xff] }
  0x45   : > { %5582 = vmatmul.mubr.msk.f32.gmra.mrb[20].mxu1 %vm534_vm0, %v481_v19  ;;  %v513_v19 = vld [vmem:[%s6100_s17 + $0x7b8] sm:$0xff] }
  0x46   : > { %5300 = vmatmul.mubr.msk.f32.gmra.mrb[26].mxu0 %vm534_vm0, %v293_v34  ;;  %5584 = vmatprep.mubr.msk.f32.mxu1 %vm534_vm0, %v482_v22  ;;  %v488_v34 = vld [vmem:[%s6100_s17 + $0x6f0] sm:$0xff]  ;;  %v514_v22 = vld [vmem:[%s6100_s17 + $0x7c0] sm:$0xff] }
  0x47   : > { %5302 = vmatprep.mubr.msk.f32.mxu0 %vm534_vm0, %v294_v35  ;;  %v489_v35 = vld [vmem:[%s6100_s17 + $0x6f8] sm:$0xff] }
  0x49   : > { %5585 = vmatmul.mubr.msk.f32.gmra.mrb[22].mxu1 %vm534_vm0, %v483_v23  ;;  %v515_v23 = vld [vmem:[%s6100_s17 + $0x7c8] sm:$0xff] }
  0x4a   : > { %5303 = vmatmul.mubr.msk.f32.gmra.mrb[28].mxu0 %vm534_vm0, %v295_v36  ;;  %5587 = vmatprep.mubr.msk.f32.mxu1 %vm534_vm0, %v484_v26  ;;  %v329_v36 = vld [vmem:[%s6100_s17 + $0x1f8] sm:$0xff]  ;;  %v516_v26 = vld [vmem:[%s6100_s17 + $0x7d0] sm:$0xff] }
  0x4b   : > { %5305 = vmatprep.mubr.msk.f32.mxu0 %vm534_vm0, %v296_v37  ;;  %v330_v37 = vld [vmem:[%s6100_s17 + $0x200] sm:$0xff] }
  0x4d   : > { %5588 = vmatmul.mubr.msk.f32.gmra.mrb[24].mxu1 %vm534_vm0, %v485_v27  ;;  %v517_v27 = vld [vmem:[%s6100_s17 + $0x7d8] sm:$0xff] }
  0x4e   : > { %5306 = vmatmul.mubr.msk.f32.gmra.mrb[30].mxu0 %vm534_vm0, %v297_v38  ;;  %5590 = vmatprep.mubr.msk.f32.mxu1 %vm534_vm0, %v486_v30  ;;  %v490_v38 = vld [vmem:[%s6100_s17 + $0x700] sm:$0xff] }
  0x4f   : > { %5308 = vmatprep.mubr.msk.f32.mxu0 %vm534_vm0, %v298_v39  ;;  %v491_v39 = vld [vmem:[%s6100_s17 + $0x708] sm:$0xff]  ;;  %v518_v30 = vld [vmem:[%s6100_s17 + $0x7e0] sm:$0xff] }
  0x51   : > { %5591 = vmatmul.mubr.msk.f32.gmra.mrb[26].mxu1 %vm534_vm0, %v487_v31  ;;  %v519_v31 = vld [vmem:[%s6100_s17 + $0x7e8] sm:$0xff] }
  0x52   : > { %5309 = vmatmul.mubr.msk.f32.gmra.mrb[32].mxu0 %vm534_vm0, %v299_v40  ;;  %5593 = vmatprep.mubr.msk.f32.mxu1 %vm534_vm0, %v488_v34  ;;  %v331_v40 = vld [vmem:[%s6100_s17 + $0x208] sm:$0xff]  ;;  %v520_v34 = vld [vmem:[%s6100_s17 + $0x7f0] sm:$0xff] }
  0x53   : > { %5311 = vmatprep.mubr.msk.f32.mxu0 %vm534_vm0, %v300_v42  ;;  %v492_v42 = vld [vmem:[%s6100_s17 + $0x710] sm:$0xff] }
  0x55   : > { %5594 = vmatmul.mubr.msk.f32.gmra.mrb[28].mxu1 %vm534_vm0, %v489_v35  ;;  %v521_v35 = vld [vmem:[%s6100_s17 + $0x7f8] sm:$0xff] }
  0x56   : > { %5312 = vmatmul.mubr.msk.f32.gmra.mrb[34].mxu0 %vm534_vm0, %v301_v44  ;;  %5596 = vmatprep.mubr.msk.f32.mxu1 %vm534_vm0, %v490_v38  ;;  %v333_v44 = vld [vmem:[%s6100_s17 + $0x218] sm:$0xff]  ;;  %v2909_v38 = vld [vmem:[%s7518_s3 + $0x8] sm:$0xff] }
  0x57   : > { %5314 = vmatprep.mubr.msk.f32.mxu0 %vm534_vm0, %v302_v46  ;;  %v494_v46 = vld [vmem:[%s6100_s17 + $0x720] sm:$0xff] }
  0x59   : > { %5597 = vmatmul.mubr.msk.f32.gmra.mrb[30].mxu1 %vm534_vm0, %v491_v39  ;;  %v363_v39 = vld [vmem:[%s6100_s17 + $0x308] sm:$0xff] }
  0x5a   : > { %5315 = vmatmul.mubr.msk.f32.gmra.mrb[36].mxu0 %vm534_vm0, %v303_v48  ;;  %5599 = vmatprep.mubr.msk.f32.mxu1 %vm534_vm0, %v492_v42  ;;  %v335_v48 = vld [vmem:[%s6100_s17 + $0x228] sm:$0xff]  ;;  %v366_v42 = vld [vmem:[%s6100_s17 + $0x320] sm:$0xff] }
  0x5b   : > { %5317 = vmatprep.mubr.msk.f32.mxu0 %vm534_vm0, %v304_v50  ;;  %v496_v50 = vld [vmem:[%s6100_s17 + $0x730] sm:$0xff] }
  0x5d   : > { %5600 = vmatmul.mubr.msk.f32.gmra.mrb[32].mxu1 %vm534_vm0, %v493_v43  ;;  %v367_v43 = vld [vmem:[%s6100_s17 + $0x328] sm:$0xff] }
  0x5e   : > { %5318 = vmatmul.mubr.msk.f32.gmra.mrb[38].mxu0 %vm534_vm0, %v305_v52  ;;  %5602 = vmatprep.mubr.msk.f32.mxu1 %vm534_vm0, %v494_v46  ;;  %v337_v52 = vld [vmem:[%s6100_s17 + $0x238] sm:$0xff]  ;;  %v370_v46 = vld [vmem:[%s6100_s17 + $0x340] sm:$0xff] }
  0x5f   : > { %5320 = vmatprep.mubr.msk.f32.mxu0 %vm534_vm0, %v306_v54  ;;  %v498_v54 = vld [vmem:[%s6100_s17 + $0x740] sm:$0xff] }
  0x61   : > { %5603 = vmatmul.mubr.msk.f32.gmra.mrb[34].mxu1 %vm534_vm0, %v495_v47  ;;  %v371_v47 = vld [vmem:[%s6100_s17 + $0x348] sm:$0xff] }
  0x62   : > { %5321 = vmatmul.mubr.msk.f32.gmra.mrb[40].mxu0 %vm534_vm0, %v307_v56  ;;  %5605 = vmatprep.mubr.msk.f32.mxu1 %vm534_vm0, %v496_v50  ;;  %v339_v56 = vld [vmem:[%s6100_s17 + $0x248] sm:$0xff]  ;;  %v373_v50 = vld [vmem:[%s6100_s17 + $0x358] sm:$0xff] }
  0x63   : > { %5323 = vmatprep.mubr.msk.f32.mxu0 %vm534_vm0, %v308_v58  ;;  %v500_v58 = vld [vmem:[%s6100_s17 + $0x750] sm:$0xff] }
  0x65   : > { %5606 = vmatmul.mubr.msk.f32.gmra.mrb[36].mxu1 %vm534_vm0, %v497_v51  ;;  %v374_v51 = vld [vmem:[%s6100_s17 + $0x360] sm:$0xff] }
  0x66   : > { %5324 = vmatmul.mubr.msk.f32.gmra.mrb[42].mxu0 %vm534_vm0, %v309_v60  ;;  %5608 = vmatprep.mubr.msk.f32.mxu1 %vm534_vm0, %v498_v54  ;;  %v341_v60 = vld [vmem:[%s6100_s17 + $0x258] sm:$0xff] }
  0x67   : > { %5326 = vmatprep.mubr.msk.f32.mxu0 %vm534_vm0, %v310_v61  ;;  %v342_v61 = vld [vmem:[%s6100_s17 + $0x260] sm:$0xff] }
  0x69   : > { %5609 = vmatmul.mubr.msk.f32.gmra.mrb[38].mxu1 %vm534_vm0, %v499_v55 }
  0x6a   : > { %5327 = vmatmul.mubr.msk.f32.gmra.mrb[44].mxu0 %vm534_vm0, %v311_v0  ;;  %5611 = vmatprep.mubr.msk.f32.mxu1 %vm534_vm0, %v500_v58  ;;  %v343_v0 = vld [vmem:[%s6100_s17 + $0x268] sm:$0xff]  ;;  %v376_v58 = vld [vmem:[%s6100_s17 + $0x370] sm:$0xff] }
  0x6b   : > { %5329 = vmatprep.mubr.msk.f32.mxu0 %vm534_vm0, %v312_v1  ;;  %v344_v1 = vld [vmem:[%s6100_s17 + $0x270] sm:$0xff] }
  0x6d   : > { %5612 = vmatmul.mubr.msk.f32.gmra.mrb[40].mxu1 %vm534_vm0, %v501_v59 }
  0x6e   : > { %5330 = vmatmul.mubr.msk.f32.gmra.mrb[46].mxu0 %vm534_vm0, %v313_v4  ;;  %5614 = vmatprep.mubr.msk.f32.mxu1 %vm534_vm0, %v502_v62  ;;  %v345_v4 = vld [vmem:[%s6100_s17 + $0x278] sm:$0xff] }
  0x6f   : > { %5332 = vmatprep.mubr.msk.f32.mxu0 %vm534_vm0, %v314_v5  ;;  %v346_v5 = vld [vmem:[%s6100_s17 + $0x280] sm:$0xff] }
  0x71   : > { %5615 = vmatmul.mubr.msk.f32.gmra.mrb[42].mxu1 %vm534_vm0, %v503_v63 }
  0x72   : > { %5333 = vmatmul.mubr.msk.f32.gmra.mrb[48].mxu0 %vm534_vm0, %v315_v8  ;;  %5617 = vmatprep.mubr.msk.f32.mxu1 %vm534_vm0, %v504_v2  ;;  %v347_v8 = vld [vmem:[%s6100_s17 + $0x288] sm:$0xff] }
  0x73   : > { %5335 = vmatprep.mubr.msk.f32.mxu0 %vm534_vm0, %v316_v9  ;;  %v348_v9 = vld [vmem:[%s6100_s17 + $0x290] sm:$0xff] }
  0x75   : > { %5618 = vmatmul.mubr.msk.f32.gmra.mrb[44].mxu1 %vm534_vm0, %v505_v3  ;;  %v378_v3 = vld [vmem:[%s6100_s17 + $0x380] sm:$0xff] }
  0x76   : > { %5336 = vmatmul.mubr.msk.f32.gmra.mrb[50].mxu0 %vm534_vm0, %v317_v12  ;;  %5620 = vmatprep.mubr.msk.f32.mxu1 %vm534_vm0, %v506_v6  ;;  %v349_v12 = vld [vmem:[%s6100_s17 + $0x298] sm:$0xff] }
  0x77   : > { %5338 = vmatprep.mubr.msk.f32.mxu0 %vm534_vm0, %v318_v13  ;;  %v350_v13 = vld [vmem:[%s6100_s17 + $0x2a0] sm:$0xff] }
  0x79   : > { %5621 = vmatmul.mubr.msk.f32.gmra.mrb[46].mxu1 %vm534_vm0, %v507_v7 }
  0x7a   : > { %5339 = vmatmul.mubr.msk.f32.gmra.mrb[52].mxu0 %vm534_vm0, %v319_v16  ;;  %5623 = vmatprep.mubr.msk.f32.mxu1 %vm534_vm0, %v508_v10  ;;  %v351_v16 = vld [vmem:[%s6100_s17 + $0x2a8] sm:$0xff] }
  0x7b   : > { %5341 = vmatprep.mubr.msk.f32.mxu0 %vm534_vm0, %v320_v17  ;;  %v352_v17 = vld [vmem:[%s6100_s17 + $0x2b0] sm:$0xff]  ;;  %v379_v10 = vld [vmem:[%s6100_s17 + $0x388] sm:$0xff] }
  0x7d   : > { %5624 = vmatmul.mubr.msk.f32.gmra.mrb[48].mxu1 %vm534_vm0, %v509_v11 }
  0x7e   : > { %5342 = vmatmul.mubr.msk.f32.gmra.mrb[54].mxu0 %vm534_vm0, %v321_v20  ;;  %5626 = vmatprep.mubr.msk.f32.mxu1 %vm534_vm0, %v510_v14  ;;  %v353_v20 = vld [vmem:[%s6100_s17 + $0x2b8] sm:$0xff] }
  0x7f   : > { %5344 = vmatprep.mubr.msk.f32.mxu0 %vm534_vm0, %v322_v21  ;;  %v354_v21 = vld [vmem:[%s6100_s17 + $0x2c0] sm:$0xff] }
  0x81   : > { %5627 = vmatmul.mubr.msk.f32.gmra.mrb[50].mxu1 %vm534_vm0, %v511_v15 }
  0x82   : > { %5345 = vmatmul.mubr.msk.f32.gmra.mrb[56].mxu0 %vm534_vm0, %v323_v24  ;;  %5629 = vmatprep.mubr.msk.f32.mxu1 %vm534_vm0, %v512_v18  ;;  %v355_v24 = vld [vmem:[%s6100_s17 + $0x2c8] sm:$0xff] }
  0x83   : > { %5347 = vmatprep.mubr.msk.f32.mxu0 %vm534_vm0, %v324_v25  ;;  %v356_v25 = vld [vmem:[%s6100_s17 + $0x2d0] sm:$0xff] }
  0x85   : > { %5630 = vmatmul.mubr.msk.f32.gmra.mrb[52].mxu1 %vm534_vm0, %v513_v19  ;;  %v381_v19 = vld [vmem:[%s6100_s17 + $0x398] sm:$0xff] }
  0x86   : > { %5348 = vmatmul.mubr.msk.f32.gmra.mrb[58].mxu0 %vm534_vm0, %v325_v28  ;;  %5632 = vmatprep.mubr.msk.f32.mxu1 %vm534_vm0, %v514_v22  ;;  %v357_v28 = vld [vmem:[%s6100_s17 + $0x2d8] sm:$0xff] }
  0x87   : > { %5350 = vmatprep.mubr.msk.f32.mxu0 %vm534_vm0, %v326_v29  ;;  %v358_v29 = vld [vmem:[%s6100_s17 + $0x2e0] sm:$0xff] }
  0x89   : > { %5633 = vmatmul.mubr.msk.f32.gmra.mrb[54].mxu1 %vm534_vm0, %v515_v23 }
  0x8a   : > { %5351 = vmatmul.mubr.msk.f32.gmra.mrb[60].mxu0 %vm534_vm0, %v327_v32  ;;  %5635 = vmatprep.mubr.msk.f32.mxu1 %vm534_vm0, %v516_v26  ;;  %v359_v32 = vld [vmem:[%s6100_s17 + $0x2e8] sm:$0xff] }
  0x8b   : > { %5353 = vmatprep.mubr.msk.f32.mxu0 %vm534_vm0, %v328_v33  ;;  %v360_v33 = vld [vmem:[%s6100_s17 + $0x2f0] sm:$0xff] }
  0x8d   : > { %5636 = vmatmul.mubr.msk.f32.gmra.mrb[56].mxu1 %vm534_vm0, %v517_v27 }
  0x8e   : > { %5354 = vmatmul.mubr.msk.f32.gmra.mrb[62].mxu0 %vm534_vm0, %v329_v36  ;;  %5638 = vmatprep.mubr.msk.f32.mxu1 %vm534_vm0, %v518_v30  ;;  %v361_v36 = vld [vmem:[%s6100_s17 + $0x2f8] sm:$0xff]  ;;  %v384_v30 = vld [vmem:[%s6100_s17 + $0x3b0] sm:$0xff] }
  0x8f   : > { %5356 = vmatprep.mubr.msk.f32.mxu0 %vm534_vm0, %v330_v37  ;;  %v362_v37 = vld [vmem:[%s6100_s17 + $0x300] sm:$0xff] }
  0x91   : > { %5639 = vmatmul.mubr.msk.f32.gmra.mrb[58].mxu1 %vm534_vm0, %v519_v31 }
  0x92   : > { %5357 = vmatmul.mubr.msk.f32.gmra.mrb[64].mxu0 %vm534_vm0, %v331_v40  ;;  %5641 = vmatprep.mubr.msk.f32.mxu1 %vm534_vm0, %v520_v34  ;;  %v364_v40 = vld [vmem:[%s6100_s17 + $0x310] sm:$0xff] }
  0x93   : > { %5359 = vmatprep.mubr.msk.f32.mxu0 %vm534_vm0, %v332_v41  ;;  %v365_v41 = vld [vmem:[%s6100_s17 + $0x318] sm:$0xff] }
  0x95   : > { %5642 = vmatmul.mubr.msk.f32.gmra.mrb[60].mxu1 %vm534_vm0, %v521_v35 }
  0x96   : > { %5360 = vmatmul.mubr.msk.f32.gmra.mrb[66].mxu0 %vm534_vm0, %v333_v44  ;;  %2988 = vmatprep.mubr.f32.mxu1 %v2909_v38  ;;  %v368_v44 = vld [vmem:[%s6100_s17 + $0x330] sm:$0xff] }
  0x97   : > { %5362 = vmatprep.mubr.msk.f32.mxu0 %vm534_vm0, %v334_v45  ;;  %v369_v45 = vld [vmem:[%s6100_s17 + $0x338] sm:$0xff] }
  0x9a   : > { %5363 = vmatmul.mubr.msk.f32.gmra.mrb[68].mxu0 %vm534_vm0, %v335_v48  ;;  %v372_v48 = vld [vmem:[%s6100_s17 + $0x350] sm:$0xff] }
  0x9b   : > { %5365 = vmatprep.mubr.msk.f32.mxu0 %vm534_vm0, %v336_v49  ;;  %v6449_v49 = vld [vmem:[%s7517_s2] ss:$0 sm:$0xff] }
  0x9e   : > { %5366 = vmatmul.mubr.msk.f32.gmra.mrb[70].mxu0 %vm534_vm0, %v337_v52 }
  0x9f   : > { %5368 = vmatprep.mubr.msk.f32.mxu0 %vm534_vm0, %v338_v53 }
  0xa2   : > { %5369 = vmatmul.mubr.msk.f32.gmra.mrb[72].mxu0 %vm534_vm0, %v339_v56  ;;  %v375_v56 = vld [vmem:[%s6100_s17 + $0x368] sm:$0xff] }
  0xa3   : > { %5371 = vmatprep.mubr.msk.f32.mxu0 %vm534_vm0, %v340_v57 }
  0xa6   : > { %5372 = vmatmul.mubr.msk.f32.gmra.mrb[74].mxu0 %vm534_vm0, %v341_v60 }
  0xa7   : > { %5374 = vmatprep.mubr.msk.f32.mxu0 %vm534_vm0, %v342_v61 }
  0xaa   : > { %5375 = vmatmul.mubr.msk.f32.gmra.mrb[76].mxu0 %vm534_vm0, %v343_v0 }
  0xab   : > { %5377 = vmatprep.mubr.msk.f32.mxu0 %vm534_vm0, %v344_v1  ;;  %v377_v1 = vld [vmem:[%s6100_s17 + $0x378] sm:$0xff] }
  0xae   : > { %5378 = vmatmul.mubr.msk.f32.gmra.mrb[78].mxu0 %vm534_vm0, %v345_v4 }
  0xaf   : > { %5380 = vmatprep.mubr.msk.f32.mxu0 %vm534_vm0, %v346_v5 }
  0xb2   : > { %5381 = vmatmul.mubr.msk.f32.gmra.mrb[80].mxu0 %vm534_vm0, %v347_v8 }
  0xb3   : > { %5383 = vmatprep.mubr.msk.f32.mxu0 %vm534_vm0, %v348_v9 }
  0xb6   : > { %5384 = vmatmul.mubr.msk.f32.gmra.mrb[82].mxu0 %vm534_vm0, %v349_v12  ;;  %v380_v12 = vld [vmem:[%s6100_s17 + $0x390] sm:$0xff] }
  0xb7   : > { %5386 = vmatprep.mubr.msk.f32.mxu0 %vm534_vm0, %v350_v13 }
  0xba   : > { %5387 = vmatmul.mubr.msk.f32.gmra.mrb[84].mxu0 %vm534_vm0, %v351_v16 }
  0xbb   : > { %5389 = vmatprep.mubr.msk.f32.mxu0 %vm534_vm0, %v352_v17 }
  0xbe   : > { %5390 = vmatmul.mubr.msk.f32.gmra.mrb[86].mxu0 %vm534_vm0, %v353_v20 }
  0xbf   : > { %5392 = vmatprep.mubr.msk.f32.mxu0 %vm534_vm0, %v354_v21  ;;  %v382_v21 = vld [vmem:[%s6100_s17 + $0x3a0] sm:$0xff] }
  0xc2   : > { %5393 = vmatmul.mubr.msk.f32.gmra.mrb[88].mxu0 %vm534_vm0, %v355_v24 }
  0xc3   : > { %5395 = vmatprep.mubr.msk.f32.mxu0 %vm534_vm0, %v356_v25 }
  0xc6   : > { %5396 = vmatmul.mubr.msk.f32.gmra.mrb[90].mxu0 %vm534_vm0, %v357_v28  ;;  %v383_v28 = vld [vmem:[%s6100_s17 + $0x3a8] sm:$0xff] }
  0xc7   : > { %5398 = vmatprep.mubr.msk.f32.mxu0 %vm534_vm0, %v358_v29 }
  0xca   : > { %5399 = vmatmul.mubr.msk.f32.gmra.mrb[92].mxu0 %vm534_vm0, %v359_v32 }
  0xcb   : > { %5401 = vmatprep.mubr.msk.f32.mxu0 %vm534_vm0, %v360_v33 }
  0xce   : > { %5402 = vmatmul.mubr.msk.f32.gmra.mrb[94].mxu0 %vm534_vm0, %v361_v36 }
  0xcf   : > { %5404 = vmatprep.mubr.msk.f32.mxu0 %vm534_vm0, %v362_v37  ;;  %v385_v37 = vld [vmem:[%s6100_s17 + $0x3b8] sm:$0xff] }
  0xd2   : > { %5405 = vmatmul.mubr.msk.f32.gmra.mrb[96].mxu0 %vm534_vm0, %v363_v39  ;;  %v386_v39 = vld [vmem:[%s6100_s17 + $0x3c0] sm:$0xff] }
  0xd3   : > { %5407 = vmatprep.mubr.msk.f32.mxu0 %vm534_vm0, %v364_v40 }
  0xd6   : > { %5408 = vmatmul.mubr.msk.f32.gmra.mrb[98].mxu0 %vm534_vm0, %v365_v41 }
  0xd7   : > { %5410 = vmatprep.mubr.msk.f32.mxu0 %vm534_vm0, %v366_v42 }
  0xda   : > { %5411 = vmatmul.mubr.msk.f32.gmra.mrb[100].mxu0 %vm534_vm0, %v367_v43 }
  0xdb   : > { %5413 = vmatprep.mubr.msk.f32.mxu0 %vm534_vm0, %v368_v44 }
  0xde   : > { %5414 = vmatmul.mubr.msk.f32.gmra.mrb[102].mxu0 %vm534_vm0, %v369_v45 }
  0xdf   : > { %5416 = vmatprep.mubr.msk.f32.mxu0 %vm534_vm0, %v370_v46  ;;  %v387_v46 = vld [vmem:[%s6100_s17 + $0x3c8] sm:$0xff] }
  0xe2   : > { %5417 = vmatmul.mubr.msk.f32.gmra.mrb[104].mxu0 %vm534_vm0, %v371_v47 }
  0xe3   : > { %5419 = vmatprep.mubr.msk.f32.mxu0 %vm534_vm0, %v372_v48  ;;  %v388_v48 = vld [vmem:[%s6100_s17 + $0x3d0] sm:$0xff] }
  0xe5   : > { %v5262_v52 = vpop.f32.mrb[0].mxu0 }
  0xe6   : > { %v1379_v53 = vadd.f32 %v5262_v52, %v6449_v49  ;;  %v1373_v54 = vpop.f32.mrb[1].mxu0  ;;  %5420 = vmatmul.mubr.msk.f32.gmra.mrb[106].mxu0 %vm534_vm0, %v373_v50 }
  0xe7   : > { %v1374_v55 = vadd.f32 %v6449_v49, %v1373_v54  ;;  %5422 = vmatprep.mubr.msk.f32.mxu0 %vm534_vm0, %v374_v51 }
  0xe8   : > { %v2653_v57 = vmax.f32 %v1379_v53, 0.0 }
  0xe9   : > { %v2652_v59 = vmax.f32 %v1374_v55, 0.0  ;;  %v5265_v60 = vpop.f32.mrb[2].mxu0 }
  0xea   : > { %v1389_v61 = vadd.f32 %v5265_v60, %v6449_v49  ;;  %v1383_v62 = vpop.f32.mrb[3].mxu0  ;;  %5423 = vmatmul.mubr.msk.f32.gmra.mrb[108].mxu0 %vm534_vm0, %v375_v56  ;;  %v389_v56 = vld [vmem:[%s6100_s17 + $0x3d8] sm:$0xff] }
  0xeb   : > { %v6462_v63 = vpack.c.bf16 %v2653_v57, %v2652_v59  ;;  %v1384_v0 = vadd.f32 %v6449_v49, %v1383_v62  ;;  %5425 = vmatprep.mubr.msk.f32.mxu0 %vm534_vm0, %v376_v58  ;;  %v390_v58 = vld [vmem:[%s6100_s17 + $0x3e0] sm:$0xff] }
  0xec   : > { %v2655_v2 = vmax.f32 %v1389_v61, 0.0 }
  0xed   : > { %v2654_v4 = vmax.f32 %v1384_v0, 0.0  ;;  %v5268_v5 = vpop.f32.mrb[4].mxu0 }
  0xee   : > { %v1399_v6 = vadd.f32 %v5268_v5, %v6449_v49  ;;  %v1393_v7 = vpop.f32.mrb[5].mxu0  ;;  %5426 = vmatmul.mubr.msk.f32.gmra.mrb[110].mxu0 %vm534_vm0, %v377_v1 }
  0xef   : > { %v6470_v8 = vpack.c.bf16 %v2655_v2, %v2654_v4  ;;  %v1394_v9 = vadd.f32 %v6449_v49, %v1393_v7  ;;  %5428 = vmatprep.mubr.msk.f32.mxu0 %vm534_vm0, %v378_v3  ;;  %v391_v2 = vld [vmem:[%s6100_s17 + $0x3e8] sm:$0xff]  ;;  %v392_v4 = vld [vmem:[%s6100_s17 + $0x3f0] sm:$0xff] }
  0xf0   : > { %v2657_v11 = vmax.f32 %v1399_v6, 0.0 }
  0xf1   : > { %v2656_v13 = vmax.f32 %v1394_v9, 0.0  ;;  %v5271_v14 = vpop.f32.mrb[6].mxu0 }
  0xf2   : > { %v1409_v15 = vadd.f32 %v5271_v14, %v6449_v49  ;;  %v1403_v16 = vpop.f32.mrb[7].mxu0  ;;  %5429 = vmatmul.mubr.msk.f32.gmra.mrb[112].mxu0 %vm534_vm0, %v379_v10  ;;  %v394_v14 = vld [vmem:[%s6100_s17 + $0x400] sm:$0xff] }
  0xf3   : > { %v6478_v17 = vpack.c.bf16 %v2657_v11, %v2656_v13  ;;  %v1404_v18 = vadd.f32 %v6449_v49, %v1403_v16  ;;  %5431 = vmatprep.mubr.msk.f32.mxu0 %vm534_vm0, %v380_v12  ;;  %v393_v12 = vld [vmem:[%s6100_s17 + $0x3f8] sm:$0xff] }
  0xf4   : > { %v2659_v20 = vmax.f32 %v1409_v15, 0.0 }
  0xf5   : > { %v2658_v22 = vmax.f32 %v1404_v18, 0.0  ;;  %v5274_v23 = vpop.f32.mrb[8].mxu0 }
  0xf6   : > { %v1419_v24 = vadd.f32 %v5274_v23, %v6449_v49  ;;  %v1413_v25 = vpop.f32.mrb[9].mxu0  ;;  %5432 = vmatmul.mubr.msk.f32.gmra.mrb[114].mxu0 %vm534_vm0, %v381_v19 }
  0xf7   : > { %v6486_v26 = vpack.c.bf16 %v2659_v20, %v2658_v22  ;;  %v1414_v27 = vadd.f32 %v6449_v49, %v1413_v25  ;;  %5434 = vmatprep.mubr.msk.f32.mxu0 %vm534_vm0, %v382_v21  ;;  %v395_v22 = vld [vmem:[%s6100_s17 + $0x408] sm:$0xff] }
  0xf8   : > { %v2661_v29 = vmax.f32 %v1419_v24, 0.0  ;;  %v396_v24 = vld [vmem:[%s6100_s17 + $0x410] sm:$0xff] }
  0xf9   : > { %v2660_v31 = vmax.f32 %v1414_v27, 0.0  ;;  %v5277_v32 = vpop.f32.mrb[10].mxu0 }
  0xfa   : > { %v1429_v33 = vadd.f32 %v5277_v32, %v6449_v49  ;;  %v1423_v34 = vpop.f32.mrb[11].mxu0  ;;  %5435 = vmatmul.mubr.msk.f32.gmra.mrb[116].mxu0 %vm534_vm0, %v383_v28 }
  0xfb   : > { %v6494_v35 = vpack.c.bf16 %v2661_v29, %v2660_v31  ;;  %v1424_v36 = vadd.f32 %v6449_v49, %v1423_v34  ;;  %5437 = vmatprep.mubr.msk.f32.mxu0 %vm534_vm0, %v384_v30  ;;  %v397_v31 = vld [vmem:[%s6100_s17 + $0x418] sm:$0xff] }
  0xfc   : > { %v2663_v38 = vmax.f32 %v1429_v33, 0.0  ;;  %v398_v33 = vld [vmem:[%s6100_s17 + $0x420] sm:$0xff] }
  0xfd   : > { %v2662_v40 = vmax.f32 %v1424_v36, 0.0  ;;  %v5280_v41 = vpop.f32.mrb[12].mxu0 }
  0xfe   : > { %v1439_v42 = vadd.f32 %v5280_v41, %v6449_v49  ;;  %v1433_v43 = vpop.f32.mrb[13].mxu0  ;;  %5438 = vmatmul.mubr.msk.f32.gmra.mrb[118].mxu0 %vm534_vm0, %v385_v37 }
  0xff   : > { %v6502_v44 = vpack.c.bf16 %v2663_v38, %v2662_v40  ;;  %v1434_v45 = vadd.f32 %v6449_v49, %v1433_v43  ;;  %5440 = vmatprep.mubr.msk.f32.mxu0 %vm534_vm0, %v386_v39  ;;  %v399_v40 = vld [vmem:[%s6100_s17 + $0x428] sm:$0xff] }
 0x100   : > { %v2665_v47 = vmax.f32 %v1439_v42, 0.0  ;;  %v400_v42 = vld [vmem:[%s6100_s17 + $0x430] sm:$0xff] }
 0x101   : > { %v2664_v50 = vmax.f32 %v1434_v45, 0.0  ;;  %v5283_v51 = vpop.f32.mrb[14].mxu0 }
 0x102   : > { %v1449_v52 = vadd.f32 %v5283_v51, %v6449_v49  ;;  %v1443_v53 = vpop.f32.mrb[15].mxu0  ;;  %5441 = vmatmul.mubr.msk.f32.gmra.mrb[120].mxu0 %vm534_vm0, %v387_v46 }
 0x103   : > { %v6510_v54 = vpack.c.bf16 %v2665_v47, %v2664_v50  ;;  %v1444_v55 = vadd.f32 %v6449_v49, %v1443_v53  ;;  %5443 = vmatprep.mubr.msk.f32.mxu0 %vm534_vm0, %v388_v48  ;;  %v401_v50 = vld [vmem:[%s6100_s17 + $0x438] sm:$0xff] }
 0x104   : > { %v2667_v57 = vmax.f32 %v1449_v52, 0.0  ;;  %v402_v52 = vld [vmem:[%s6100_s17 + $0x440] sm:$0xff] }
 0x105   : > { %v2666_v59 = vmax.f32 %v1444_v55, 0.0  ;;  %v5286_v60 = vpop.f32.mrb[16].mxu0 }
 0x106   : > { %v1459_v61 = vadd.f32 %v5286_v60, %v6449_v49  ;;  %v1453_v62 = vpop.f32.mrb[17].mxu0  ;;  %5444 = vmatmul.mubr.msk.f32.gmra.mrb[122].mxu0 %vm534_vm0, %v389_v56 }
 0x107   : > { %v6518_v0 = vpack.c.bf16 %v2667_v57, %v2666_v59  ;;  %v1454_v1 = vadd.f32 %v6449_v49, %v1453_v62  ;;  %5446 = vmatprep.mubr.msk.f32.mxu0 %vm534_vm0, %v390_v58  ;;  %v403_v59 = vld [vmem:[%s6100_s17 + $0x448] sm:$0xff] }
 0x108   : > { %v2669_v3 = vmax.f32 %v1459_v61, 0.0  ;;  %v404_v61 = vld [vmem:[%s6100_s17 + $0x450] sm:$0xff] }
 0x109   : > { %v2668_v5 = vmax.f32 %v1454_v1, 0.0  ;;  %v5289_v6 = vpop.f32.mrb[18].mxu0 }
 0x10a   : > { %v1469_v7 = vadd.f32 %v5289_v6, %v6449_v49  ;;  %v1463_v9 = vpop.f32.mrb[19].mxu0  ;;  %5447 = vmatmul.mubr.msk.f32.gmra.mrb[124].mxu0 %vm534_vm0, %v391_v2 }
 0x10b   : > { %v5692_v10 = vpack.c.bf16 %v2669_v3, %v2668_v5  ;;  %v1464_v11 = vadd.f32 %v6449_v49, %v1463_v9  ;;  %5449 = vmatprep.mubr.msk.f32.mxu0 %vm534_vm0, %v392_v4  ;;  %v405_v5 = vld [vmem:[%s6100_s17 + $0x458] sm:$0xff] }
 0x10c   : > { %v2671_v13 = vmax.f32 %v1469_v7, 0.0  ;;  %v406_v7 = vld [vmem:[%s6100_s17 + $0x460] sm:$0xff] }
 0x10d   : > { %v2670_v15 = vmax.f32 %v1464_v11, 0.0  ;;  %v5292_v16 = vpop.f32.mrb[20].mxu0  ;;  %5693 = vmatprep.subr.bf16.mxu1 %v5692_v10 }
 0x10e   : > { %v1479_v18 = vadd.f32 %v5292_v16, %v6449_v49  ;;  %v1473_v19 = vpop.f32.mrb[21].mxu0  ;;  %5450 = vmatmul.mubr.msk.f32.gmra.mrb[126].mxu0 %vm534_vm0, %v393_v12  ;;  %5695 = vmatpush3.bf16.msra.mxu1 %v6462_v63  ;;  %v408_v16 = vld [vmem:[%s6100_s17 + $0x470] sm:$0xff] }
 0x10f   : > { %v5696_v20 = vpack.c.bf16 %v2671_v13, %v2670_v15  ;;  %v1474_v21 = vadd.f32 %v6449_v49, %v1473_v19  ;;  %5452 = vmatprep.mubr.msk.f32.mxu0 %vm534_vm0, %v394_v14  ;;  %v407_v14 = vld [vmem:[%s6100_s17 + $0x468] sm:$0xff] }
 0x110   : > { %v2673_v23 = vmax.f32 %v1479_v18, 0.0 }
 0x111   : > { %v2672_v25 = vmax.f32 %v1474_v21, 0.0  ;;  %v5295_v27 = vpop.f32.mrb[22].mxu0  ;;  %5697 = vmatprep.subr.bf16.mxu1 %v5696_v20 }
 0x112   : > { %v1489_v28 = vadd.f32 %v5295_v27, %v6449_v49  ;;  %v1483_v29 = vpop.f32.mrb[23].mxu0  ;;  %5453 = vmatmul.mubr.msk.f32.gmra.mrb[128].mxu0 %vm534_vm0, %v395_v22  ;;  %5699 = vmatpush3.bf16.msra.mxu1 %v6470_v8 }
 0x113   : > { %v5700_v63 = vpack.c.bf16 %v2673_v23, %v2672_v25  ;;  %v1484_v30 = vadd.f32 %v6449_v49, %v1483_v29  ;;  %5455 = vmatprep.mubr.msk.f32.mxu0 %vm534_vm0, %v396_v24  ;;  %v409_v24 = vld [vmem:[%s6100_s17 + $0x478] sm:$0xff] }
 0x114   : > { %v2675_v32 = vmax.f32 %v1489_v28, 0.0  ;;  %v2911_v25 = vld [vmem:[%s7518_s3 + $0x18] sm:$0xff]  ;;  %v410_v28 = vld [vmem:[%s6100_s17 + $0x480] sm:$0xff] }
 0x115   : > { %v2674_v34 = vmax.f32 %v1484_v30, 0.0  ;;  %v5298_v36 = vpop.f32.mrb[24].mxu0  ;;  %5701 = vmatprep.subr.bf16.mxu1 %v5700_v63 }
 0x116   : > { %v1499_v37 = vadd.f32 %v5298_v36, %v6449_v49  ;;  %v1493_v38 = vpop.f32.mrb[25].mxu0  ;;  %5456 = vmatmul.mubr.msk.f32.gmra.mrb[130].mxu0 %vm534_vm0, %v397_v31  ;;  %5703 = vmatpush3.bf16.msra.mxu1 %v6478_v17  ;;  %v412_v36 = vld [vmem:[%s6100_s17 + $0x490] sm:$0xff] }
 0x117   : > { %v5704_v8 = vpack.c.bf16 %v2675_v32, %v2674_v34  ;;  %v1494_v39 = vadd.f32 %v6449_v49, %v1493_v38  ;;  %5458 = vmatprep.mubr.msk.f32.mxu0 %vm534_vm0, %v398_v33  ;;  %v411_v33 = vld [vmem:[%s6100_s17 + $0x488] sm:$0xff] }
 0x118   : > { %v2677_v41 = vmax.f32 %v1499_v37, 0.0 }
 0x119   : > { %v2676_v43 = vmax.f32 %v1494_v39, 0.0  ;;  %v5301_v45 = vpop.f32.mrb[26].mxu0  ;;  %5705 = vmatprep.subr.bf16.mxu1 %v5704_v8 }
 0x11a   : > { %v1509_v46 = vadd.f32 %v5301_v45, %v6449_v49  ;;  %v1503_v47 = vpop.f32.mrb[27].mxu0  ;;  %5459 = vmatmul.mubr.msk.f32.gmra.mrb[132].mxu0 %vm534_vm0, %v399_v40  ;;  %5707 = vmatpush3.bf16.msra.mxu1 %v6486_v26  ;;  %v414_v45 = vld [vmem:[%s6100_s17 + $0x4a0] sm:$0xff] }
 0x11b   : > { %v5708_v17 = vpack.c.bf16 %v2677_v41, %v2676_v43  ;;  %v1504_v48 = vadd.f32 %v6449_v49, %v1503_v47  ;;  %5461 = vmatprep.mubr.msk.f32.mxu0 %vm534_vm0, %v400_v42  ;;  %v413_v42 = vld [vmem:[%s6100_s17 + $0x498] sm:$0xff] }
 0x11c   : > { %v2679_v51 = vmax.f32 %v1509_v46, 0.0 }
 0x11d   : > { %v2678_v53 = vmax.f32 %v1504_v48, 0.0  ;;  %v5304_v55 = vpop.f32.mrb[28].mxu0  ;;  %5709 = vmatprep.subr.bf16.mxu1 %v5708_v17 }
 0x11e   : > { %v1519_v56 = vadd.f32 %v5304_v55, %v6449_v49  ;;  %v1513_v57 = vpop.f32.mrb[29].mxu0  ;;  %5462 = vmatmul.mubr.msk.f32.gmra.mrb[134].mxu0 %vm534_vm0, %v401_v50  ;;  %5711 = vmatpush3.bf16.msra.mxu1 %v6494_v35  ;;  %v416_v55 = vld [vmem:[%s6100_s17 + $0x4b0] sm:$0xff] }
 0x11f   : > { %v5712_v26 = vpack.c.bf16 %v2679_v51, %v2678_v53  ;;  %v1514_v58 = vadd.f32 %v6449_v49, %v1513_v57  ;;  %5464 = vmatprep.mubr.msk.f32.mxu0 %vm534_vm0, %v402_v52  ;;  %v415_v52 = vld [vmem:[%s6100_s17 + $0x4a8] sm:$0xff] }
 0x120   : > { %v2681_v60 = vmax.f32 %v1519_v56, 0.0 }
 0x121   : > { %v2680_v62 = vmax.f32 %v1514_v58, 0.0  ;;  %v5307_v1 = vpop.f32.mrb[30].mxu0  ;;  %5713 = vmatprep.subr.bf16.mxu1 %v5712_v26 }
 0x122   : > { %v1529_v2 = vadd.f32 %v5307_v1, %v6449_v49  ;;  %v1523_v3 = vpop.f32.mrb[31].mxu0  ;;  %5465 = vmatmul.mubr.msk.f32.gmra.mrb[136].mxu0 %vm534_vm0, %v403_v59  ;;  %5715 = vmatpush3.bf16.msra.mxu1 %v6502_v44  ;;  %v418_v1 = vld [vmem:[%s6100_s17 + $0x4c0] sm:$0xff] }
 0x123   : > { %v5716_v35 = vpack.c.bf16 %v2681_v60, %v2680_v62  ;;  %v1524_v4 = vadd.f32 %v6449_v49, %v1523_v3  ;;  %5467 = vmatprep.mubr.msk.f32.mxu0 %vm534_vm0, %v404_v61  ;;  %v417_v61 = vld [vmem:[%s6100_s17 + $0x4b8] sm:$0xff] }
 0x124   : > { %v2683_v6 = vmax.f32 %v1529_v2, 0.0 }
 0x125   : > { %v2682_v9 = vmax.f32 %v1524_v4, 0.0  ;;  %v5310_v10 = vpop.f32.mrb[32].mxu0  ;;  %5717 = vmatprep.subr.bf16.mxu1 %v5716_v35 }
 0x126   : > { %v1539_v11 = vadd.f32 %v5310_v10, %v6449_v49  ;;  %v1533_v12 = vpop.f32.mrb[33].mxu0  ;;  %5468 = vmatmul.mubr.msk.f32.gmra.mrb[138].mxu0 %vm534_vm0, %v405_v5  ;;  %5719 = vmatpush3.bf16.msra.mxu1 %v6510_v54  ;;  %v2908_v54 = vld [vmem:[%s7518_s3] sm:$0xff]  ;;  %v420_v10 = vld [vmem:[%s6100_s17 + $0x4d0] sm:$0xff] }
 0x127   : > { %v5720_v44 = vpack.c.bf16 %v2683_v6, %v2682_v9  ;;  %v1534_v13 = vadd.f32 %v6449_v49, %v1533_v12  ;;  %5470 = vmatprep.mubr.msk.f32.mxu0 %vm534_vm0, %v406_v7  ;;  %v419_v7 = vld [vmem:[%s6100_s17 + $0x4c8] sm:$0xff] }
 0x128   : > { %v2685_v15 = vmax.f32 %v1539_v11, 0.0 }
 0x129   : > { %v2684_v18 = vmax.f32 %v1534_v13, 0.0  ;;  %v5313_v19 = vpop.f32.mrb[34].mxu0  ;;  %5721 = vmatprep.subr.bf16.mxu1 %v5720_v44 }
 0x12a   : > { %v1549_v20 = vadd.f32 %v5313_v19, %v6449_v49  ;;  %v1543_v21 = vpop.f32.mrb[35].mxu0  ;;  %5471 = vmatmul.mubr.msk.f32.gmra.mrb[140].mxu0 %vm534_vm0, %v407_v14  ;;  %5723 = vmatpush3.bf16.msra.mxu1 %v6518_v0  ;;  %v422_v19 = vld [vmem:[%s6100_s17 + $0x4e0] sm:$0xff] }
 0x12b   : > { %v6585_v22 = vpack.c.bf16 %v2685_v15, %v2684_v18  ;;  %v1544_v23 = vadd.f32 %v6449_v49, %v1543_v21  ;;  %5473 = vmatprep.mubr.msk.f32.mxu0 %vm534_vm0, %v408_v16  ;;  %v421_v16 = vld [vmem:[%s6100_s17 + $0x4d8] sm:$0xff] }
 0x12c   : > { %v2687_v27 = vmax.f32 %v1549_v20, 0.0 }
 0x12d   : > { %v2686_v0 = vmax.f32 %v1544_v23, 0.0  ;;  %v5316_v29 = vpop.f32.mrb[36].mxu0  ;;  %2989 = vmatmul.mubr.f32.vlgmr.msra.gmra.mrb[62].mxu1 %v2908_v54 }
 0x12e   : > { %v1559_v63 = vadd.f32 %v5316_v29, %v6449_v49  ;;  %v1553_v30 = vpop.f32.mrb[37].mxu0  ;;  %5474 = vmatmul.mubr.msk.f32.gmra.mrb[142].mxu0 %vm534_vm0, %v409_v24  ;;  %3058 = vmatprep.mubr.f32.mxu1 %v2911_v25 }
 0x12f   : > { %v6596_v31 = vpack.c.bf16 %v2687_v27, %v2686_v0  ;;  %v1554_v32 = vadd.f32 %v6449_v49, %v1553_v30  ;;  %5476 = vmatprep.mubr.msk.f32.mxu0 %vm534_vm0, %v410_v28  ;;  %v423_v27 = vld [vmem:[%s6100_s17 + $0x4e8] sm:$0xff]  ;;  %v424_v0 = vld [vmem:[%s6100_s17 + $0x4f0] sm:$0xff] }
 0x130   : > { %v2689_v34 = vmax.f32 %v1559_v63, 0.0 }
 0x131   : > { %v2688_v37 = vmax.f32 %v1554_v32, 0.0  ;;  %v5319_v38 = vpop.f32.mrb[38].mxu0 }
 0x132   : > { %v1569_v8 = vadd.f32 %v5319_v38, %v6449_v49  ;;  %v1563_v39 = vpop.f32.mrb[39].mxu0  ;;  %5477 = vmatmul.mubr.msk.f32.gmra.mrb[144].mxu0 %vm534_vm0, %v411_v33  ;;  %v426_v38 = vld [vmem:[%s6100_s17 + $0x500] sm:$0xff] }
 0x133   : > { %v6604_v40 = vpack.c.bf16 %v2689_v34, %v2688_v37  ;;  %v1564_v41 = vadd.f32 %v6449_v49, %v1563_v39  ;;  %5479 = vmatprep.mubr.msk.f32.mxu0 %vm534_vm0, %v412_v36  ;;  %v425_v36 = vld [vmem:[%s6100_s17 + $0x4f8] sm:$0xff] }
 0x134   : > { %v2691_v43 = vmax.f32 %v1569_v8, 0.0 }
 0x135   : > { %v2690_v46 = vmax.f32 %v1564_v41, 0.0  ;;  %v5322_v47 = vpop.f32.mrb[40].mxu0 }
 0x136   : > { %v1579_v17 = vadd.f32 %v5322_v47, %v6449_v49  ;;  %v1573_v48 = vpop.f32.mrb[41].mxu0  ;;  %5480 = vmatmul.mubr.msk.f32.gmra.mrb[146].mxu0 %vm534_vm0, %v413_v42 }
 0x137   : > { %v6612_v50 = vpack.c.bf16 %v2691_v43, %v2690_v46  ;;  %v1574_v51 = vadd.f32 %v6449_v49, %v1573_v48  ;;  %5482 = vmatprep.mubr.msk.f32.mxu0 %vm534_vm0, %v414_v45  ;;  %v427_v46 = vld [vmem:[%s6100_s17 + $0x508] sm:$0xff] }
 0x138   : > { %v2693_v53 = vmax.f32 %v1579_v17, 0.0  ;;  %v428_v17 = vld [vmem:[%s6100_s17 + $0x510] sm:$0xff] }
 0x139   : > { %v2692_v56 = vmax.f32 %v1574_v51, 0.0  ;;  %v5325_v57 = vpop.f32.mrb[42].mxu0 }
 0x13a   : > { %v1589_v26 = vadd.f32 %v5325_v57, %v6449_v49  ;;  %v1583_v58 = vpop.f32.mrb[43].mxu0  ;;  %5483 = vmatmul.mubr.msk.f32.gmra.mrb[148].mxu0 %vm534_vm0, %v415_v52 }
 0x13b   : > { %v6620_v59 = vpack.c.bf16 %v2693_v53, %v2692_v56  ;;  %v1584_v60 = vadd.f32 %v6449_v49, %v1583_v58  ;;  %5485 = vmatprep.mubr.msk.f32.mxu0 %vm534_vm0, %v416_v55  ;;  %v429_v56 = vld [vmem:[%s6100_s17 + $0x518] sm:$0xff] }
 0x13c   : > { %v2695_v62 = vmax.f32 %v1589_v26, 0.0  ;;  %v430_v26 = vld [vmem:[%s6100_s17 + $0x520] sm:$0xff] }
 0x13d   : > { %v2694_v2 = vmax.f32 %v1584_v60, 0.0  ;;  %v5328_v3 = vpop.f32.mrb[44].mxu0 }
 0x13e   : > { %v1599_v35 = vadd.f32 %v5328_v3, %v6449_v49  ;;  %v1593_v4 = vpop.f32.mrb[45].mxu0  ;;  %5486 = vmatmul.mubr.msk.f32.gmra.mrb[150].mxu0 %vm534_vm0, %v417_v61 }
 0x13f   : > { %v6628_v5 = vpack.c.bf16 %v2695_v62, %v2694_v2  ;;  %v1594_v6 = vadd.f32 %v6449_v49, %v1593_v4  ;;  %5488 = vmatprep.mubr.msk.f32.mxu0 %vm534_vm0, %v418_v1  ;;  %v431_v2 = vld [vmem:[%s6100_s17 + $0x528] sm:$0xff] }
 0x140   : > { %v2697_v9 = vmax.f32 %v1599_v35, 0.0  ;;  %v432_v35 = vld [vmem:[%s6100_s17 + $0x530] sm:$0xff] }
 0x141   : > { %v2696_v11 = vmax.f32 %v1594_v6, 0.0  ;;  %v5331_v12 = vpop.f32.mrb[46].mxu0 }
 0x142   : > { %v1609_v44 = vadd.f32 %v5331_v12, %v6449_v49  ;;  %v1603_v13 = vpop.f32.mrb[47].mxu0  ;;  %5489 = vmatmul.mubr.msk.f32.gmra.mrb[152].mxu0 %vm534_vm0, %v419_v7 }
 0x143   : > { %v6636_v14 = vpack.c.bf16 %v2697_v9, %v2696_v11  ;;  %v1604_v15 = vadd.f32 %v6449_v49, %v1603_v13  ;;  %5491 = vmatprep.mubr.msk.f32.mxu0 %vm534_vm0, %v420_v10  ;;  %v433_v11 = vld [vmem:[%s6100_s17 + $0x538] sm:$0xff] }
 0x144   : > { %v2699_v18 = vmax.f32 %v1609_v44, 0.0  ;;  %v434_v44 = vld [vmem:[%s6100_s17 + $0x540] sm:$0xff] }
 0x145   : > { %v2698_v20 = vmax.f32 %v1604_v15, 0.0  ;;  %v5334_v21 = vpop.f32.mrb[48].mxu0 }
 0x146   : > { %v1619_v54 = vadd.f32 %v5334_v21, %v6449_v49  ;;  %v1613_v23 = vpop.f32.mrb[49].mxu0  ;;  %5492 = vmatmul.mubr.msk.f32.gmra.mrb[154].mxu0 %vm534_vm0, %v421_v16 }
 0x147   : > { %v6644_v24 = vpack.c.bf16 %v2699_v18, %v2698_v20  ;;  %v1614_v25 = vadd.f32 %v6449_v49, %v1613_v23  ;;  %5494 = vmatprep.mubr.msk.f32.mxu0 %vm534_vm0, %v422_v19  ;;  %v435_v20 = vld [vmem:[%s6100_s17 + $0x548] sm:$0xff] }
 0x148   : > { %v2701_v28 = vmax.f32 %v1619_v54, 0.0  ;;  %v436_v54 = vld [vmem:[%s6100_s17 + $0x550] sm:$0xff] }
 0x149   : > { %v2700_v29 = vmax.f32 %v1614_v25, 0.0  ;;  %v5337_v63 = vpop.f32.mrb[50].mxu0 }
 0x14a   : > { %v1629_v30 = vadd.f32 %v5337_v63, %v6449_v49  ;;  %v1623_v32 = vpop.f32.mrb[51].mxu0  ;;  %5495 = vmatmul.mubr.msk.f32.gmra.mrb[156].mxu0 %vm534_vm0, %v423_v27 }
 0x14b   : > { %v5724_v33 = vpack.c.bf16 %v2701_v28, %v2700_v29  ;;  %v1624_v34 = vadd.f32 %v6449_v49, %v1623_v32  ;;  %5497 = vmatprep.mubr.msk.f32.mxu0 %vm534_vm0, %v424_v0  ;;  %v437_v29 = vld [vmem:[%s6100_s17 + $0x558] sm:$0xff] }
 0x14c   : > { %v2703_v37 = vmax.f32 %v1629_v30, 0.0  ;;  %v438_v30 = vld [vmem:[%s6100_s17 + $0x560] sm:$0xff] }
 0x14d   : > { %v2702_v8 = vmax.f32 %v1624_v34, 0.0  ;;  %v5340_v39 = vpop.f32.mrb[52].mxu0  ;;  %5725 = vmatprep.subr.bf16.mxu1 %v5724_v33 }
 0x14e   : > { %v1639_v41 = vadd.f32 %v5340_v39, %v6449_v49  ;;  %v1633_v42 = vpop.f32.mrb[53].mxu0  ;;  %5498 = vmatmul.mubr.msk.f32.gmra.mrb[158].mxu0 %vm534_vm0, %v425_v36  ;;  %5727 = vmatpush3.bf16.msra.mxu1 %v6585_v22  ;;  %v440_v39 = vld [vmem:[%s6100_s17 + $0x570] sm:$0xff] }
 0x14f   : > { %v5728_v43 = vpack.c.bf16 %v2703_v37, %v2702_v8  ;;  %v1634_v45 = vadd.f32 %v6449_v49, %v1633_v42  ;;  %5500 = vmatprep.mubr.msk.f32.mxu0 %vm534_vm0, %v426_v38  ;;  %v439_v38 = vld [vmem:[%s6100_s17 + $0x568] sm:$0xff] }
 0x150   : > { %v2705_v47 = vmax.f32 %v1639_v41, 0.0 }
 0x151   : > { %v2704_v48 = vmax.f32 %v1634_v45, 0.0  ;;  %v5343_v51 = vpop.f32.mrb[54].mxu0  ;;  %5729 = vmatprep.subr.bf16.mxu1 %v5728_v43 }
 0x152   : > { %v1649_v52 = vadd.f32 %v5343_v51, %v6449_v49  ;;  %v1643_v53 = vpop.f32.mrb[55].mxu0  ;;  %5501 = vmatmul.mubr.msk.f32.gmra.mrb[160].mxu0 %vm534_vm0, %v427_v46  ;;  %5731 = vmatpush3.bf16.msra.mxu1 %v6596_v31 }
 0x153   : > { %v5732_v22 = vpack.c.bf16 %v2705_v47, %v2704_v48  ;;  %v1644_v55 = vadd.f32 %v6449_v49, %v1643_v53  ;;  %5503 = vmatprep.mubr.msk.f32.mxu0 %vm534_vm0, %v428_v17  ;;  %v441_v17 = vld [vmem:[%s6100_s17 + $0x578] sm:$0xff]  ;;  %v2913_v48 = vld [vmem:[%s7518_s3 + $0x28] sm:$0xff] }
 0x154   : > { %v2707_v57 = vmax.f32 %v1649_v52, 0.0  ;;  %v442_v52 = vld [vmem:[%s6100_s17 + $0x580] sm:$0xff] }
 0x155   : > { %v2706_v58 = vmax.f32 %v1644_v55, 0.0  ;;  %v5346_v60 = vpop.f32.mrb[56].mxu0  ;;  %5733 = vmatprep.subr.bf16.mxu1 %v5732_v22 }
 0x156   : > { %v1659_v61 = vadd.f32 %v5346_v60, %v6449_v49  ;;  %v1653_v62 = vpop.f32.mrb[57].mxu0  ;;  %5504 = vmatmul.mubr.msk.f32.gmra.mrb[162].mxu0 %vm534_vm0, %v429_v56  ;;  %5735 = vmatpush3.bf16.msra.mxu1 %v6604_v40  ;;  %v444_v60 = vld [vmem:[%s6100_s17 + $0x590] sm:$0xff] }
 0x157   : > { %v5736_v31 = vpack.c.bf16 %v2707_v57, %v2706_v58  ;;  %v1654_v1 = vadd.f32 %v6449_v49, %v1653_v62  ;;  %5506 = vmatprep.mubr.msk.f32.mxu0 %vm534_vm0, %v430_v26  ;;  %v443_v26 = vld [vmem:[%s6100_s17 + $0x588] sm:$0xff] }
 0x158   : > { %v2709_v3 = vmax.f32 %v1659_v61, 0.0 }
 0x159   : > { %v2708_v4 = vmax.f32 %v1654_v1, 0.0  ;;  %v5349_v6 = vpop.f32.mrb[58].mxu0  ;;  %5737 = vmatprep.subr.bf16.mxu1 %v5736_v31 }
 0x15a   : > { %v1669_v7 = vadd.f32 %v5349_v6, %v6449_v49  ;;  %v1663_v9 = vpop.f32.mrb[59].mxu0  ;;  %5507 = vmatmul.mubr.msk.f32.gmra.mrb[164].mxu0 %vm534_vm0, %v431_v2  ;;  %5739 = vmatpush3.bf16.msra.mxu1 %v6612_v50  ;;  %v446_v6 = vld [vmem:[%s6100_s17 + $0x5a0] sm:$0xff] }
 0x15b   : > { %v5740_v40 = vpack.c.bf16 %v2709_v3, %v2708_v4  ;;  %v1664_v10 = vadd.f32 %v6449_v49, %v1663_v9  ;;  %5509 = vmatprep.mubr.msk.f32.mxu0 %vm534_vm0, %v432_v35  ;;  %v445_v35 = vld [vmem:[%s6100_s17 + $0x598] sm:$0xff] }
 0x15c   : > { %v2711_v12 = vmax.f32 %v1669_v7, 0.0 }
 0x15d   : > { %v2710_v13 = vmax.f32 %v1664_v10, 0.0  ;;  %v5352_v15 = vpop.f32.mrb[60].mxu0  ;;  %5741 = vmatprep.subr.bf16.mxu1 %v5740_v40 }
 0x15e   : > { %v1679_v16 = vadd.f32 %v5352_v15, %v6449_v49  ;;  %v1673_v18 = vpop.f32.mrb[61].mxu0  ;;  %5510 = vmatmul.mubr.msk.f32.gmra.mrb[166].mxu0 %vm534_vm0, %v433_v11  ;;  %5743 = vmatpush3.bf16.msra.mxu1 %v6620_v59  ;;  %v448_v15 = vld [vmem:[%s6100_s17 + $0x5b0] sm:$0xff] }
 0x15f   : > { %v5744_v50 = vpack.c.bf16 %v2711_v12, %v2710_v13  ;;  %v1674_v19 = vadd.f32 %v6449_v49, %v1673_v18  ;;  %5512 = vmatprep.mubr.msk.f32.mxu0 %vm534_vm0, %v434_v44  ;;  %v447_v44 = vld [vmem:[%s6100_s17 + $0x5a8] sm:$0xff] }
 0x160   : > { %v2713_v21 = vmax.f32 %v1679_v16, 0.0 }
 0x161   : > { %v2712_v23 = vmax.f32 %v1674_v19, 0.0  ;;  %v5355_v25 = vpop.f32.mrb[62].mxu0  ;;  %5745 = vmatprep.subr.bf16.mxu1 %v5744_v50 }
 0x162   : > { %v1689_v27 = vadd.f32 %v5355_v25, %v6449_v49  ;;  %v1683_v28 = vpop.f32.mrb[63].mxu0  ;;  %5513 = vmatmul.mubr.msk.f32.gmra.mrb[168].mxu0 %vm534_vm0, %v435_v20  ;;  %5747 = vmatpush3.bf16.msra.mxu1 %v6628_v5  ;;  %v450_v25 = vld [vmem:[%s6100_s17 + $0x5c0] sm:$0xff] }
 0x163   : > { %v5748_v59 = vpack.c.bf16 %v2713_v21, %v2712_v23  ;;  %v1684_v0 = vadd.f32 %v6449_v49, %v1683_v28  ;;  %5515 = vmatprep.mubr.msk.f32.mxu0 %vm534_vm0, %v436_v54  ;;  %v449_v54 = vld [vmem:[%s6100_s17 + $0x5b8] sm:$0xff] }
 0x164   : > { %v2715_v63 = vmax.f32 %v1689_v27, 0.0 }
 0x165   : > { %v2714_v32 = vmax.f32 %v1684_v0, 0.0  ;;  %v5358_v33 = vpop.f32.mrb[64].mxu0  ;;  %5749 = vmatprep.subr.bf16.mxu1 %v5748_v59 }
 0x166   : > { %v1699_v34 = vadd.f32 %v5358_v33, %v6449_v49  ;;  %v1693_v36 = vpop.f32.mrb[65].mxu0  ;;  %5516 = vmatmul.mubr.msk.f32.gmra.mrb[170].mxu0 %vm534_vm0, %v437_v29  ;;  %5751 = vmatpush3.bf16.msra.mxu1 %v6636_v14  ;;  %v2910_v14 = vld [vmem:[%s7518_s3 + $0x10] sm:$0xff] }
 0x167   : > { %v5752_v5 = vpack.c.bf16 %v2715_v63, %v2714_v32  ;;  %v1694_v37 = vadd.f32 %v6449_v49, %v1693_v36  ;;  %5518 = vmatprep.mubr.msk.f32.mxu0 %vm534_vm0, %v438_v30  ;;  %v451_v30 = vld [vmem:[%s6100_s17 + $0x5c8] sm:$0xff]  ;;  %v452_v33 = vld [vmem:[%s6100_s17 + $0x5d0] sm:$0xff] }
 0x168   : > { %v2717_v8 = vmax.f32 %v1699_v34, 0.0 }
 0x169   : > { %v2716_v41 = vmax.f32 %v1694_v37, 0.0  ;;  %v5361_v42 = vpop.f32.mrb[66].mxu0  ;;  %5753 = vmatprep.subr.bf16.mxu1 %v5752_v5 }
 0x16a   : > { %v1709_v43 = vadd.f32 %v5361_v42, %v6449_v49  ;;  %v1703_v45 = vpop.f32.mrb[67].mxu0  ;;  %5519 = vmatmul.mubr.msk.f32.gmra.mrb[172].mxu0 %vm534_vm0, %v439_v38  ;;  %5755 = vmatpush3.bf16.msra.mxu1 %v6644_v24  ;;  %v454_v42 = vld [vmem:[%s6100_s17 + $0x5e0] sm:$0xff] }
 0x16b   : > { %v6711_v46 = vpack.c.bf16 %v2717_v8, %v2716_v41  ;;  %v1704_v47 = vadd.f32 %v6449_v49, %v1703_v45  ;;  %5521 = vmatprep.mubr.msk.f32.mxu0 %vm534_vm0, %v440_v39  ;;  %v453_v39 = vld [vmem:[%s6100_s17 + $0x5d8] sm:$0xff] }
 0x16c   : > { %v2719_v51 = vmax.f32 %v1709_v43, 0.0 }
 0x16d   : > { %v2718_v24 = vmax.f32 %v1704_v47, 0.0  ;;  %v5364_v53 = vpop.f32.mrb[68].mxu0  ;;  %3059 = vmatmul.mubr.f32.vlgmr.msra.gmra.mrb[64].mxu1 %v2910_v14 }
 0x16e   : > { %v1719_v22 = vadd.f32 %v5364_v53, %v6449_v49  ;;  %v1713_v55 = vpop.f32.mrb[69].mxu0  ;;  %5522 = vmatmul.mubr.msk.f32.gmra.mrb[174].mxu0 %vm534_vm0, %v441_v17  ;;  %3128 = vmatprep.mubr.f32.mxu1 %v2913_v48 }
 0x16f   : > { %v6722_v56 = vpack.c.bf16 %v2719_v51, %v2718_v24  ;;  %v1714_v57 = vadd.f32 %v6449_v49, %v1713_v55  ;;  %5524 = vmatprep.mubr.msk.f32.mxu0 %vm534_vm0, %v442_v52  ;;  %v455_v51 = vld [vmem:[%s6100_s17 + $0x5e8] sm:$0xff]  ;;  %v456_v24 = vld [vmem:[%s6100_s17 + $0x5f0] sm:$0xff] }
 0x170   : > { %v2721_v58 = vmax.f32 %v1719_v22, 0.0 }
 0x171   : > { %v2720_v61 = vmax.f32 %v1714_v57, 0.0  ;;  %v5367_v62 = vpop.f32.mrb[70].mxu0 }
 0x172   : > { %v1729_v31 = vadd.f32 %v5367_v62, %v6449_v49  ;;  %v1723_v1 = vpop.f32.mrb[71].mxu0  ;;  %5525 = vmatmul.mubr.msk.f32.gmra.mrb[176].mxu0 %vm534_vm0, %v443_v26  ;;  %v458_v62 = vld [vmem:[%s6100_s17 + $0x600] sm:$0xff] }
 0x173   : > { %v6730_v2 = vpack.c.bf16 %v2721_v58, %v2720_v61  ;;  %v1724_v3 = vadd.f32 %v6449_v49, %v1723_v1  ;;  %5527 = vmatprep.mubr.msk.f32.mxu0 %vm534_vm0, %v444_v60  ;;  %v457_v60 = vld [vmem:[%s6100_s17 + $0x5f8] sm:$0xff] }
 0x174   : > { %v2723_v4 = vmax.f32 %v1729_v31, 0.0 }
 0x175   : > { %v2722_v7 = vmax.f32 %v1724_v3, 0.0  ;;  %v5370_v9 = vpop.f32.mrb[72].mxu0 }
 0x176   : > { %v1739_v40 = vadd.f32 %v5370_v9, %v6449_v49  ;;  %v1733_v10 = vpop.f32.mrb[73].mxu0  ;;  %5528 = vmatmul.mubr.msk.f32.gmra.mrb[178].mxu0 %vm534_vm0, %v445_v35  ;;  %v459_v9 = vld [vmem:[%s6100_s17 + $0x608] sm:$0xff] }
 0x177   : > { %v6738_v11 = vpack.c.bf16 %v2723_v4, %v2722_v7  ;;  %v1734_v12 = vadd.f32 %v6449_v49, %v1733_v10  ;;  %5530 = vmatprep.mubr.msk.f32.mxu0 %vm534_vm0, %v446_v6  ;;  %v6788_v6 = vld [vmem:[%s7517_s2] ss:$0 sm:$0xff] }
 0x178   : > { %v2725_v13 = vmax.f32 %v1739_v40, 0.0 }
 0x179   : > { %v2724_v16 = vmax.f32 %v1734_v12, 0.0  ;;  %v5373_v18 = vpop.f32.mrb[74].mxu0 }
 0x17a   : > { %v1749_v50 = vadd.f32 %v5373_v18, %v6449_v49  ;;  %v1743_v19 = vpop.f32.mrb[75].mxu0  ;;  %5531 = vmatmul.mubr.msk.f32.gmra.mrb[180].mxu0 %vm534_vm0, %v447_v44 }
 0x17b   : > { %v6746_v20 = vpack.c.bf16 %v2725_v13, %v2724_v16  ;;  %v1744_v21 = vadd.f32 %v6449_v49, %v1743_v19  ;;  %5533 = vmatprep.mubr.msk.f32.mxu0 %vm534_vm0, %v448_v15 }
 0x17c   : > { %v2727_v23 = vmax.f32 %v1749_v50, 0.0 }
 0x17d   : > { %v2726_v27 = vmax.f32 %v1744_v21, 0.0  ;;  %v5376_v28 = vpop.f32.mrb[76].mxu0 }
 0x17e   : > { %v1759_v59 = vadd.f32 %v5376_v28, %v6449_v49  ;;  %v1753_v0 = vpop.f32.mrb[77].mxu0  ;;  %5534 = vmatmul.mubr.msk.f32.gmra.mrb[182].mxu0 %vm534_vm0, %v449_v54 }
 0x17f   : > { %v6754_v29 = vpack.c.bf16 %v2727_v23, %v2726_v27  ;;  %v1754_v63 = vadd.f32 %v6449_v49, %v1753_v0  ;;  %5536 = vmatprep.mubr.msk.f32.mxu0 %vm534_vm0, %v450_v25 }
 0x180   : > { %v2729_v32 = vmax.f32 %v1759_v59, 0.0 }
 0x181   : > { %v2728_v34 = vmax.f32 %v1754_v63, 0.0  ;;  %v5379_v36 = vpop.f32.mrb[78].mxu0 }
 0x182   : > { %v1769_v5 = vadd.f32 %v5379_v36, %v6449_v49  ;;  %v1763_v37 = vpop.f32.mrb[79].mxu0  ;;  %5537 = vmatmul.mubr.msk.f32.gmra.mrb[184].mxu0 %vm534_vm0, %v451_v30 }
 0x183   : > { %v6762_v38 = vpack.c.bf16 %v2729_v32, %v2728_v34  ;;  %v1764_v8 = vadd.f32 %v6449_v49, %v1763_v37  ;;  %5539 = vmatprep.mubr.msk.f32.mxu0 %vm534_vm0, %v452_v33 }
 0x184   : > { %v2731_v41 = vmax.f32 %v1769_v5, 0.0 }
 0x185   : > { %v2730_v43 = vmax.f32 %v1764_v8, 0.0  ;;  %v5382_v45 = vpop.f32.mrb[80].mxu0 }
 0x186   : > { %v1779_v14 = vadd.f32 %v5382_v45, %v6449_v49  ;;  %v1773_v47 = vpop.f32.mrb[81].mxu0  ;;  %5540 = vmatmul.mubr.msk.f32.gmra.mrb[186].mxu0 %vm534_vm0, %v453_v39  ;;  %v5553_v45 = vpop.f32.mrb[0].mxu1 }
 0x187   : > { %v6770_v17 = vpack.c.bf16 %v2731_v41, %v2730_v43  ;;  %v1774_v48 = vadd.f32 %v6449_v49, %v1773_v47  ;;  %5542 = vmatprep.mubr.msk.f32.mxu0 %vm534_vm0, %v454_v42 }
 0x188   : > { %v2733_v52 = vmax.f32 %v1779_v14, 0.0 }
 0x189   : > { %v2732_v53 = vmax.f32 %v1774_v48, 0.0  ;;  %v5385_v22 = vpop.f32.mrb[82].mxu0 }
 0x18a   : > { %v1789_v55 = vadd.f32 %v5385_v22, %v6449_v49  ;;  %v1783_v57 = vpop.f32.mrb[83].mxu0  ;;  %5543 = vmatmul.mubr.msk.f32.gmra.mrb[188].mxu0 %vm534_vm0, %v455_v51 }
 0x18b   : > { %v5756_v26 = vpack.c.bf16 %v2733_v52, %v2732_v53  ;;  %v1784_v58 = vadd.f32 %v6449_v49, %v1783_v57  ;;  %5545 = vmatprep.mubr.msk.f32.mxu0 %vm534_vm0, %v456_v24  ;;  %v2349_v52 = vadd.f32 %v6788_v6, %v5553_v45 }
 0x18c   : > { %v2735_v61 = vmax.f32 %v1789_v55, 0.0 }
 0x18d   : > { %v2734_v31 = vmax.f32 %v1784_v58, 0.0  ;;  %v5388_v1 = vpop.f32.mrb[84].mxu0  ;;  %5757 = vmatprep.subr.bf16.mxu1 %v5756_v26  ;;  %v2847_v55 = vmax.f32 %v2349_v52, 0.0 }
 0x18e   : > { %v1799_v3 = vadd.f32 %v5388_v1, %v6449_v49  ;;  %v1793_v35 = vpop.f32.mrb[85].mxu0  ;;  %5546 = vmatmul.mubr.msk.f32.gmra.mrb[190].mxu0 %vm534_vm0, %v457_v60  ;;  %5759 = vmatpush3.bf16.msra.mxu1 %v6711_v46 }
 0x18f   : > { %v5760_v4 = vpack.c.bf16 %v2735_v61, %v2734_v31  ;;  %v1794_v7 = vadd.f32 %v6788_v6, %v1793_v35  ;;  %5548 = vmatprep.mubr.msk.f32.mxu0 %vm534_vm0, %v458_v62 }
 0x190   : > { %v2737_v40 = vmax.f32 %v1799_v3, 0.0 }
 0x191   : > { %v2736_v10 = vmax.f32 %v1794_v7, 0.0  ;;  %v5391_v12 = vpop.f32.mrb[86].mxu0  ;;  %5761 = vmatprep.subr.bf16.mxu1 %v5760_v4 }
 0x192   : > { %v1809_v49 = vadd.f32 %v6788_v6, %v5391_v12  ;;  %v1803_v44 = vpop.f32.mrb[87].mxu0  ;;  %5549 = vmatmul.mubr.msk.f32.gmra.mrb[192].mxu0 %vm534_vm0, %v459_v9  ;;  %5763 = vmatpush3.bf16.msra.mxu1 %v6722_v56  ;;  %v2915_v9 = vld [vmem:[%s7518_s3 + $0x38] sm:$0xff] }
 0x193   : > { %v5764_v46 = vpack.c.bf16 %v2737_v40, %v2736_v10  ;;  %v1804_v13 = vadd.f32 %v6788_v6, %v1803_v44 }
 0x194   : > { %v2739_v15 = vmax.f32 %v1809_v49, 0.0 }
 0x195   : > { %v2738_v16 = vmax.f32 %v1804_v13, 0.0  ;;  %v5394_v18 = vpop.f32.mrb[88].mxu0  ;;  %5765 = vmatprep.subr.bf16.mxu1 %v5764_v46 }
 0x196   : > { %v1819_v50 = vadd.f32 %v6788_v6, %v5394_v18  ;;  %v1813_v19 = vpop.f32.mrb[89].mxu0  ;;  %5767 = vmatpush3.bf16.msra.mxu1 %v6730_v2 }
 0x197   : > { %v5768_v21 = vpack.c.bf16 %v2739_v15, %v2738_v16  ;;  %v1814_v54 = vadd.f32 %v6788_v6, %v1813_v19 }
 0x198   : > { %v2741_v23 = vmax.f32 %v1819_v50, 0.0 }
 0x199   : > { %v2740_v25 = vmax.f32 %v1814_v54, 0.0  ;;  %v5397_v27 = vpop.f32.mrb[90].mxu0  ;;  %5769 = vmatprep.subr.bf16.mxu1 %v5768_v21 }
 0x19a   : > { %v1829_v56 = vadd.f32 %v6788_v6, %v5397_v27  ;;  %v1823_v28 = vpop.f32.mrb[91].mxu0  ;;  %5771 = vmatpush3.bf16.msra.mxu1 %v6738_v11 }
 0x19b   : > { %v5772_v59 = vpack.c.bf16 %v2741_v23, %v2740_v25  ;;  %v1824_v0 = vadd.f32 %v6788_v6, %v1823_v28 }
 0x19c   : > { %v2743_v63 = vmax.f32 %v1829_v56, 0.0 }
 0x19d   : > { %v2742_v30 = vmax.f32 %v1824_v0, 0.0  ;;  %v5400_v32 = vpop.f32.mrb[92].mxu0  ;;  %5773 = vmatprep.subr.bf16.mxu1 %v5772_v59 }
 0x19e   : > { %v1839_v2 = vadd.f32 %v6788_v6, %v5400_v32  ;;  %v1833_v33 = vpop.f32.mrb[93].mxu0  ;;  %5775 = vmatpush3.bf16.msra.mxu1 %v6746_v20  ;;  %v2343_v20 = vpop.f32.mrb[1].mxu1 }
 0x19f   : > { %v5776_v34 = vpack.c.bf16 %v2743_v63, %v2742_v30  ;;  %v1834_v36 = vadd.f32 %v6788_v6, %v1833_v33  ;;  %v2344_v24 = vadd.f32 %v6788_v6, %v2343_v20  ;;  %v5556_v26 = vpop.f32.mrb[2].mxu1 }
 0x1a0   : > { %v2745_v5 = vmax.f32 %v1839_v2, 0.0  ;;  %v2353_v61 = vpop.f32.mrb[3].mxu1  ;;  %v2359_v3 = vadd.f32 %v6788_v6, %v5556_v26 }
 0x1a1   : > { %v2744_v37 = vmax.f32 %v1834_v36, 0.0  ;;  %v5403_v8 = vpop.f32.mrb[94].mxu0  ;;  %5777 = vmatprep.subr.bf16.mxu1 %v5776_v34  ;;  %v2846_v57 = vmax.f32 %v2344_v24, 0.0  ;;  %v2354_v35 = vadd.f32 %v6788_v6, %v2353_v61  ;;  %v5559_v12 = vpop.f32.mrb[4].mxu1 }
 0x1a2   : > { %v1849_v11 = vadd.f32 %v6788_v6, %v5403_v8  ;;  %v1843_v39 = vpop.f32.mrb[95].mxu0  ;;  %5779 = vmatpush3.bf16.msra.mxu1 %v6754_v29  ;;  %v2363_v46 = vpop.f32.mrb[5].mxu1  ;;  %v2369_v18 = vadd.f32 %v6788_v6, %v5559_v12 }
 0x1a3   : > { %v5780_v41 = vpack.c.bf16 %v2745_v5, %v2744_v37  ;;  %v1844_v42 = vadd.f32 %v6788_v6, %v1843_v39  ;;  %v6819_v1 = vpack.c.bf16 %v2847_v55, %v2846_v57  ;;  %v2848_v10 = vmax.f32 %v2354_v35, 0.0  ;;  %v5562_v27 = vpop.f32.mrb[6].mxu1 }
 0x1a4   : > { %v2747_v43 = vmax.f32 %v1849_v11, 0.0  ;;  %v2364_v50 = vadd.f32 %v6788_v6, %v2363_v46  ;;  %v2851_v23 = vmax.f32 %v2369_v18, 0.0  ;;  %v2373_v59 = vpop.f32.mrb[7].mxu1  ;;  %v2379_v32 = vadd.f32 %v6788_v6, %v5562_v27 }
 0x1a5   : > { %v2746_v14 = vmax.f32 %v1844_v42, 0.0  ;;  %v5406_v47 = vpop.f32.mrb[96].mxu0  ;;  %5781 = vmatprep.subr.bf16.mxu1 %v5780_v41  ;;  %v2374_v2 = vadd.f32 %v6788_v6, %v2373_v59  ;;  %v5565_v8 = vpop.f32.mrb[8].mxu1 }
 0x1a6   : > { %v1859_v48 = vadd.f32 %v6788_v6, %v5406_v47  ;;  %v1853_v51 = vpop.f32.mrb[97].mxu0  ;;  %5783 = vmatpush3.bf16.msra.mxu1 %v6762_v38  ;;  %v2912_v38 = vld [vmem:[%s7518_s3 + $0x20] sm:$0xff]  ;;  %v2850_v25 = vmax.f32 %v2364_v50, 0.0  ;;  %v2853_v5 = vmax.f32 %v2379_v32, 0.0  ;;  %v2383_v41 = vpop.f32.mrb[9].mxu1 }
 0x1a7   : > { %v5784_v53 = vpack.c.bf16 %v2747_v43, %v2746_v14  ;;  %v1854_v29 = vadd.f32 %v6788_v6, %v1853_v51  ;;  %v2852_v37 = vmax.f32 %v2374_v2, 0.0  ;;  %v2389_v14 = vadd.f32 %v6788_v6, %v5565_v8 }
 0x1a8   : > { %v2749_v22 = vmax.f32 %v1859_v48, 0.0  ;;  %v6838_v30 = vpack.c.bf16 %v2851_v23, %v2850_v25  ;;  %v2384_v47 = vadd.f32 %v6788_v6, %v2383_v41 }
 0x1a9   : > { %v2748_v58 = vmax.f32 %v1854_v29, 0.0  ;;  %v5409_v60 = vpop.f32.mrb[98].mxu0  ;;  %5785 = vmatprep.subr.bf16.mxu1 %v5784_v53  ;;  %v6846_v45 = vpack.c.bf16 %v2853_v5, %v2852_v37  ;;  %v2855_v52 = vmax.f32 %v2389_v14, 0.0  ;;  %v5568_v53 = vpop.f32.mrb[10].mxu1 }
 0x1aa   : > { %v1869_v62 = vadd.f32 %v6788_v6, %v5409_v60  ;;  %v1863_v31 = vpop.f32.mrb[99].mxu0  ;;  %5787 = vmatpush3.bf16.msra.mxu1 %v6770_v17  ;;  %v2849_v17 = vmax.f32 %v2359_v3, 0.0  ;;  %v2854_v24 = vmax.f32 %v2384_v47, 0.0  ;;  %v2393_v55 = vpop.f32.mrb[11].mxu1  ;;  %v2399_v60 = vadd.f32 %v6788_v6, %v5568_v53 }
 0x1ab   : > { %v6823_v4 = vpack.c.bf16 %v2749_v22, %v2748_v58  ;;  %v1864_v7 = vadd.f32 %v6788_v6, %v1863_v31  ;;  %v2394_v61 = vadd.f32 %v6788_v6, %v2393_v55 }
 0x1ac   : > { %v2751_v40 = vmax.f32 %v1869_v62, 0.0  ;;  %v6830_v16 = vpack.c.bf16 %v2849_v17, %v2848_v10  ;;  %v6854_v58 = vpack.c.bf16 %v2855_v52, %v2854_v24  ;;  %v2857_v3 = vmax.f32 %v2399_v60, 0.0 }
 0x1ad   : > { %v2750_v49 = vmax.f32 %v1864_v7, 0.0  ;;  %v5412_v44 = vpop.f32.mrb[100].mxu0  ;;  %3129 = vmatmul.mubr.f32.vlgmr.msra.gmra.mrb[66].mxu1 %v2912_v38  ;;  %v2856_v35 = vmax.f32 %v2394_v61, 0.0  ;;  %v5571_v7 = vpop.f32.mrb[12].mxu1 }
 0x1ae   : > { %v1879_v13 = vadd.f32 %v6788_v6, %v5412_v44  ;;  %v1873_v15 = vpop.f32.mrb[101].mxu0  ;;  %3198 = vmatprep.mubr.f32.mxu1 %v2915_v9  ;;  %v2403_v17 = vpop.f32.mrb[13].mxu1  ;;  %v2409_v44 = vadd.f32 %v6788_v6, %v5571_v7 }
 0x1af   : > { %v6834_v19 = vpack.c.bf16 %v2751_v40, %v2750_v49  ;;  %v1874_v21 = vadd.f32 %v6788_v6, %v1873_v15  ;;  %v6862_v49 = vpack.c.bf16 %v2857_v3, %v2856_v35  ;;  %v2404_v46 = vadd.f32 %v6788_v6, %v2403_v17 }
 0x1b0   : > { %v2753_v54 = vmax.f32 %v1879_v13, 0.0  ;;  %v2859_v50 = vmax.f32 %v2409_v44, 0.0 }
 0x1b1   : > { %v2752_v56 = vmax.f32 %v1874_v21, 0.0  ;;  %v5415_v28 = vpop.f32.mrb[102].mxu0  ;;  %v2858_v21 = vmax.f32 %v2404_v46, 0.0 }
 0x1b2   : > { %v1889_v0 = vadd.f32 %v6788_v6, %v5415_v28  ;;  %v1883_v63 = vpop.f32.mrb[103].mxu0 }
 0x1b3   : > { %v6842_v33 = vpack.c.bf16 %v2753_v54, %v2752_v56  ;;  %v1884_v34 = vadd.f32 %v6788_v6, %v1883_v63  ;;  %v5574_v54 = vpop.f32.mrb[14].mxu1  ;;  %v6870_v59 = vpack.c.bf16 %v2859_v50, %v2858_v21 }
 0x1b4   : > { %v2755_v36 = vmax.f32 %v1889_v0, 0.0  ;;  %v2413_v27 = vpop.f32.mrb[15].mxu1  ;;  %v2419_v0 = vadd.f32 %v6788_v6, %v5574_v54 }
 0x1b5   : > { %v2754_v11 = vmax.f32 %v1884_v34, 0.0  ;;  %v5418_v39 = vpop.f32.mrb[104].mxu0  ;;  %v2414_v63 = vadd.f32 %v6788_v6, %v2413_v27  ;;  %v5577_v37 = vpop.f32.mrb[16].mxu1 }
 0x1b6   : > { %v1899_v42 = vadd.f32 %v6788_v6, %v5418_v39  ;;  %v1893_v43 = vpop.f32.mrb[105].mxu0  ;;  %v2423_v39 = vpop.f32.mrb[17].mxu1  ;;  %v2429_v14 = vadd.f32 %v6788_v6, %v5577_v37 }
 0x1b7   : > { %v6850_v20 = vpack.c.bf16 %v2755_v36, %v2754_v11  ;;  %v1894_v48 = vadd.f32 %v6788_v6, %v1893_v43  ;;  %v2861_v36 = vmax.f32 %v2419_v0, 0.0  ;;  %v2860_v5 = vmax.f32 %v2414_v63, 0.0 }
 0x1b8   : > { %v2757_v51 = vmax.f32 %v1899_v42, 0.0  ;;  %v2424_v47 = vadd.f32 %v6788_v6, %v2423_v39  ;;  %v2863_v24 = vmax.f32 %v2429_v14, 0.0 }
 0x1b9   : > { %v2756_v29 = vmax.f32 %v1894_v48, 0.0  ;;  %v5421_v22 = vpop.f32.mrb[106].mxu0  ;;  %v6878_v43 = vpack.c.bf16 %v2861_v36, %v2860_v5 }
 0x1ba   : > { %v1909_v57 = vadd.f32 %v6788_v6, %v5421_v22  ;;  %v1903_v26 = vpop.f32.mrb[107].mxu0  ;;  %v2862_v53 = vmax.f32 %v2424_v47, 0.0 }
 0x1bb   : > { %v6858_v62 = vpack.c.bf16 %v2757_v51, %v2756_v29  ;;  %v1904_v31 = vadd.f32 %v6788_v6, %v1903_v26  ;;  %v5580_v29 = vpop.f32.mrb[18].mxu1 }
 0x1bc   : > { %v2759_v38 = vmax.f32 %v1909_v57, 0.0  ;;  %v2433_v57 = vpop.f32.mrb[19].mxu1  ;;  %v6886_v61 = vpack.c.bf16 %v2863_v24, %v2862_v53 }
 0x1bd   : > { %v2758_v9 = vmax.f32 %v1904_v31, 0.0  ;;  %v5424_v40 = vpop.f32.mrb[108].mxu0  ;;  %v2439_v31 = vadd.f32 %v6788_v6, %v5580_v29  ;;  %v5583_v17 = vpop.f32.mrb[20].mxu1 }
 0x1be   : > { %v1919_v10 = vadd.f32 %v6788_v6, %v5424_v40  ;;  %v1913_v12 = vpop.f32.mrb[109].mxu0  ;;  %v2443_v44 = vpop.f32.mrb[21].mxu1  ;;  %v2449_v50 = vadd.f32 %v6788_v6, %v5583_v17 }
 0x1bf   : > { %v6866_v13 = vpack.c.bf16 %v2759_v38, %v2758_v9  ;;  %v1914_v15 = vadd.f32 %v6788_v6, %v1913_v12  ;;  %v2434_v38 = vadd.f32 %v6788_v6, %v2433_v57  ;;  %v2865_v9 = vmax.f32 %v2439_v31, 0.0 }
 0x1c0   : > { %v2761_v18 = vmax.f32 %v1919_v10, 0.0  ;;  %v2444_v21 = vadd.f32 %v6788_v6, %v2443_v44  ;;  %v2867_v27 = vmax.f32 %v2449_v50, 0.0 }
 0x1c1   : > { %v2760_v23 = vmax.f32 %v1914_v15, 0.0  ;;  %v5427_v25 = vpop.f32.mrb[110].mxu0  ;;  %v2864_v40 = vmax.f32 %v2434_v38, 0.0 }
 0x1c2   : > { %v1929_v56 = vadd.f32 %v6788_v6, %v5427_v25  ;;  %v1923_v28 = vpop.f32.mrb[111].mxu0 }
 0x1c3   : > { %v6874_v32 = vpack.c.bf16 %v2761_v18, %v2760_v23  ;;  %v1924_v2 = vadd.f32 %v6788_v6, %v1923_v28  ;;  %v6893_v18 = vpack.c.bf16 %v2865_v9, %v2864_v40  ;;  %v5586_v28 = vpop.f32.mrb[22].mxu1 }
 0x1c4   : > { %v2763_v34 = vmax.f32 %v1929_v56, 0.0  ;;  %v2866_v56 = vmax.f32 %v2444_v21, 0.0  ;;  %v2459_v5 = vadd.f32 %v6788_v6, %v5586_v28 }
 0x1c5   : > { %v2762_v8 = vmax.f32 %v1924_v2, 0.0  ;;  %v5430_v11 = vpop.f32.mrb[112].mxu0  ;;  %v2453_v2 = vpop.f32.mrb[23].mxu1 }
 0x1c6   : > { %v1939_v41 = vadd.f32 %v6788_v6, %v5430_v11  ;;  %v1933_v42 = vpop.f32.mrb[113].mxu0  ;;  %v6900_v36 = vpack.c.bf16 %v2867_v27, %v2866_v56  ;;  %v2454_v37 = vadd.f32 %v6788_v6, %v2453_v2  ;;  %v5589_v14 = vpop.f32.mrb[24].mxu1 }
 0x1c7   : > { %v6882_v48 = vpack.c.bf16 %v2763_v34, %v2762_v8  ;;  %v1934_v51 = vadd.f32 %v6788_v6, %v1933_v42  ;;  %v2469_v29 = vadd.f32 %v6788_v6, %v5589_v14 }
 0x1c8   : > { %v2765_v52 = vmax.f32 %v1939_v41, 0.0  ;;  %v2869_v41 = vmax.f32 %v2459_v5, 0.0  ;;  %v2868_v42 = vmax.f32 %v2454_v37, 0.0 }
 0x1c9   : > { %v2764_v22 = vmax.f32 %v1934_v51, 0.0  ;;  %v5433_v55 = vpop.f32.mrb[114].mxu0 }
 0x1ca   : > { %v1949_v26 = vadd.f32 %v6788_v6, %v5433_v55  ;;  %v1943_v60 = vpop.f32.mrb[115].mxu0  ;;  %v6907_v53 = vpack.c.bf16 %v2869_v41, %v2868_v42 }
 0x1cb   : > { %v5788_v3 = vpack.c.bf16 %v2765_v52, %v2764_v22  ;;  %v1944_v35 = vadd.f32 %v6788_v6, %v1943_v60  ;;  %v2463_v52 = vpop.f32.mrb[25].mxu1  ;;  %v2871_v60 = vmax.f32 %v2469_v29, 0.0 }
 0x1cc   : > { %v2767_v7 = vmax.f32 %v1949_v26, 0.0  ;;  %v2464_v22 = vadd.f32 %v6788_v6, %v2463_v52  ;;  %v5592_v38 = vpop.f32.mrb[26].mxu1 }
 0x1cd   : > { %v2766_v10 = vmax.f32 %v1944_v35, 0.0  ;;  %v5436_v12 = vpop.f32.mrb[116].mxu0  ;;  %5789 = vmatprep.subr.bf16.mxu1 %v5788_v3  ;;  %v2479_v17 = vadd.f32 %v6788_v6, %v5592_v38 }
 0x1ce   : > { %v1959_v46 = vadd.f32 %v6788_v6, %v5436_v12  ;;  %v1953_v15 = vpop.f32.mrb[117].mxu0  ;;  %5791 = vmatpush3.bf16.msra.mxu1 %v6823_v4  ;;  %v2870_v31 = vmax.f32 %v2464_v22, 0.0 }
 0x1cf   : > { %v5792_v54 = vpack.c.bf16 %v2767_v7, %v2766_v10  ;;  %v1954_v23 = vadd.f32 %v6788_v6, %v1953_v15  ;;  %v2473_v7 = vpop.f32.mrb[27].mxu1  ;;  %v2873_v15 = vmax.f32 %v2479_v17, 0.0 }
 0x1d0   : > { %v2769_v25 = vmax.f32 %v1959_v46, 0.0  ;;  %v6914_v40 = vpack.c.bf16 %v2871_v60, %v2870_v31  ;;  %v2474_v10 = vadd.f32 %v6788_v6, %v2473_v7  ;;  %v5595_v21 = vpop.f32.mrb[28].mxu1 }
 0x1d1   : > { %v2768_v0 = vmax.f32 %v1954_v23, 0.0  ;;  %v5439_v63 = vpop.f32.mrb[118].mxu0  ;;  %5793 = vmatprep.subr.bf16.mxu1 %v5792_v54  ;;  %v2489_v28 = vadd.f32 %v6788_v6, %v5595_v21 }
 0x1d2   : > { %v1969_v34 = vadd.f32 %v6788_v6, %v5439_v63  ;;  %v1963_v4 = vpop.f32.mrb[119].mxu0  ;;  %5795 = vmatpush3.bf16.msra.mxu1 %v6834_v19  ;;  %v2872_v50 = vmax.f32 %v2474_v10, 0.0 }
 0x1d3   : > { %v5796_v8 = vpack.c.bf16 %v2769_v25, %v2768_v0  ;;  %v1964_v11 = vadd.f32 %v6788_v6, %v1963_v4  ;;  %v2483_v25 = vpop.f32.mrb[29].mxu1  ;;  %v2875_v4 = vmax.f32 %v2489_v28, 0.0 }
 0x1d4   : > { %v2771_v39 = vmax.f32 %v1969_v34, 0.0  ;;  %v6921_v56 = vpack.c.bf16 %v2873_v15, %v2872_v50  ;;  %v2484_v0 = vadd.f32 %v6788_v6, %v2483_v25  ;;  %v5598_v37 = vpop.f32.mrb[30].mxu1  ;;  %v2914_v50 = vld [vmem:[%s7518_s3 + $0x30] sm:$0xff] }
 0x1d5   : > { %v2770_v47 = vmax.f32 %v1964_v11, 0.0  ;;  %v5442_v51 = vpop.f32.mrb[120].mxu0  ;;  %5797 = vmatprep.subr.bf16.mxu1 %v5796_v8  ;;  %v2499_v14 = vadd.f32 %v6788_v6, %v5598_v37 }
 0x1d6   : > { %v1979_v24 = vadd.f32 %v6788_v6, %v5442_v51  ;;  %v1973_v19 = vpop.f32.mrb[121].mxu0  ;;  %5799 = vmatpush3.bf16.msra.mxu1 %v6842_v33  ;;  %v2874_v5 = vmax.f32 %v2484_v0, 0.0 }
 0x1d7   : > { %v5800_v55 = vpack.c.bf16 %v2771_v39, %v2770_v47  ;;  %v1974_v57 = vadd.f32 %v6788_v6, %v1973_v19  ;;  %v2493_v39 = vpop.f32.mrb[31].mxu1  ;;  %v2877_v19 = vmax.f32 %v2499_v14, 0.0 }
 0x1d8   : > { %v2773_v26 = vmax.f32 %v1979_v24, 0.0  ;;  %v6928_v42 = vpack.c.bf16 %v2875_v4, %v2874_v5  ;;  %v2494_v47 = vadd.f32 %v6788_v6, %v2493_v39  ;;  %v5601_v22 = vpop.f32.mrb[32].mxu1 }
 0x1d9   : > { %v2772_v3 = vmax.f32 %v1974_v57, 0.0  ;;  %v5445_v35 = vpop.f32.mrb[122].mxu0  ;;  %5801 = vmatprep.subr.bf16.mxu1 %v5800_v55  ;;  %v2509_v38 = vadd.f32 %v6788_v6, %v5601_v22 }
 0x1da   : > { %v1989_v9 = vadd.f32 %v6788_v6, %v5445_v35  ;;  %v1983_v33 = vpop.f32.mrb[123].mxu0  ;;  %5803 = vmatpush3.bf16.msra.mxu1 %v6850_v20  ;;  %v2876_v29 = vmax.f32 %v2494_v47, 0.0 }
 0x1db   : > { %v5804_v12 = vpack.c.bf16 %v2773_v26, %v2772_v3  ;;  %v1984_v44 = vadd.f32 %v6788_v6, %v1983_v33  ;;  %v2503_v26 = vpop.f32.mrb[33].mxu1  ;;  %v2879_v33 = vmax.f32 %v2509_v38, 0.0 }
 0x1dc   : > { %v2775_v46 = vmax.f32 %v1989_v9, 0.0  ;;  %v6935_v31 = vpack.c.bf16 %v2877_v19, %v2876_v29  ;;  %v2504_v3 = vadd.f32 %v6788_v6, %v2503_v26  ;;  %v5604_v10 = vpop.f32.mrb[34].mxu1 }
 0x1dd   : > { %v2774_v54 = vmax.f32 %v1984_v44, 0.0  ;;  %v5448_v23 = vpop.f32.mrb[124].mxu0  ;;  %5805 = vmatprep.subr.bf16.mxu1 %v5804_v12 }
 0x1de   : > { %v1999_v27 = vadd.f32 %v6788_v6, %v5448_v23  ;;  %v1993_v20 = vpop.f32.mrb[125].mxu0  ;;  %5807 = vmatpush3.bf16.msra.mxu1 %v6858_v62  ;;  %v2878_v17 = vmax.f32 %v2504_v3, 0.0 }
 0x1df   : > { %v5808_v63 = vpack.c.bf16 %v2775_v46, %v2774_v54  ;;  %v1994_v2 = vadd.f32 %v6788_v6, %v1993_v20  ;;  %v2513_v46 = vpop.f32.mrb[35].mxu1  ;;  %v2519_v54 = vadd.f32 %v6788_v6, %v5604_v10  ;;  %v2917_v20 = vld [vmem:[%s7518_s3 + $0x48] sm:$0xff] }
 0x1e0   : > { %v2777_v34 = vmax.f32 %v1999_v27, 0.0  ;;  %v6945_v21 = vpack.c.bf16 %v2879_v33, %v2878_v17  ;;  %v2514_v23 = vadd.f32 %v6788_v6, %v2513_v46  ;;  %v5607_v28 = vpop.f32.mrb[36].mxu1 }
 0x1e1   : > { %v2776_v8 = vmax.f32 %v1994_v2, 0.0  ;;  %v5451_v11 = vpop.f32.mrb[126].mxu0  ;;  %5809 = vmatprep.subr.bf16.mxu1 %v5808_v63  ;;  %v2881_v0 = vmax.f32 %v2519_v54, 0.0  ;;  %v2529_v2 = vadd.f32 %v6788_v6, %v5607_v28 }
 0x1e2   : > { %v2009_v41 = vadd.f32 %v6788_v6, %v5451_v11  ;;  %v2003_v62 = vpop.f32.mrb[127].mxu0  ;;  %5811 = vmatpush3.bf16.msra.mxu1 %v6866_v13  ;;  %v2880_v63 = vmax.f32 %v2514_v23, 0.0 }
 0x1e3   : > { %v5812_v51 = vpack.c.bf16 %v2777_v34, %v2776_v8  ;;  %v2004_v52 = vadd.f32 %v6788_v6, %v2003_v62  ;;  %v2523_v34 = vpop.f32.mrb[37].mxu1 }
 0x1e4   : > { %v2779_v24 = vmax.f32 %v2009_v41, 0.0  ;;  %v2524_v37 = vadd.f32 %v6788_v6, %v2523_v34  ;;  %v6958_v39 = vpack.c.bf16 %v2881_v0, %v2880_v63  ;;  %v2883_v41 = vmax.f32 %v2529_v2, 0.0 }
 0x1e5   : > { %v2778_v55 = vmax.f32 %v2004_v52, 0.0  ;;  %v5454_v57 = vpop.f32.mrb[128].mxu0  ;;  %5813 = vmatprep.subr.bf16.mxu1 %v5812_v51  ;;  %v5610_v51 = vpop.f32.mrb[38].mxu1 }
 0x1e6   : > { %v2019_v60 = vadd.f32 %v6788_v6, %v5454_v57  ;;  %v2013_v13 = vpop.f32.mrb[129].mxu0  ;;  %5815 = vmatpush3.bf16.msra.mxu1 %v6874_v32  ;;  %v2882_v47 = vmax.f32 %v2524_v37, 0.0  ;;  %v2533_v19 = vpop.f32.mrb[39].mxu1 }
 0x1e7   : > { %v5816_v35 = vpack.c.bf16 %v2779_v24, %v2778_v55  ;;  %v2014_v7 = vadd.f32 %v6788_v6, %v2013_v13  ;;  %v2539_v24 = vadd.f32 %v6788_v6, %v5610_v51  ;;  %v2534_v57 = vadd.f32 %v6788_v6, %v2533_v19 }
 0x1e8   : > { %v2781_v9 = vmax.f32 %v2019_v60, 0.0  ;;  %v6964_v55 = vpack.c.bf16 %v2883_v41, %v2882_v47 }
 0x1e9   : > { %v2780_v12 = vmax.f32 %v2014_v7, 0.0  ;;  %v5457_v44 = vpop.f32.mrb[130].mxu0  ;;  %5817 = vmatprep.subr.bf16.mxu1 %v5816_v35  ;;  %v2885_v13 = vmax.f32 %v2539_v24, 0.0  ;;  %v2884_v35 = vmax.f32 %v2534_v57, 0.0  ;;  %v5613_v7 = vpop.f32.mrb[40].mxu1 }
 0x1ea   : > { %v2029_v15 = vadd.f32 %v6788_v6, %v5457_v44  ;;  %v2023_v32 = vpop.f32.mrb[131].mxu0  ;;  %5819 = vmatpush3.bf16.msra.mxu1 %v6882_v48  ;;  %v2549_v33 = vadd.f32 %v6788_v6, %v5613_v7  ;;  %v2543_v17 = vpop.f32.mrb[41].mxu1 }
 0x1eb   : > { %v6949_v25 = vpack.c.bf16 %v2781_v9, %v2780_v12  ;;  %v2024_v27 = vadd.f32 %v6788_v6, %v2023_v32  ;;  %v6972_v44 = vpack.c.bf16 %v2885_v13, %v2884_v35  ;;  %v2544_v46 = vadd.f32 %v6788_v6, %v2543_v17 }
 0x1ec   : > { %v2783_v48 = vmax.f32 %v2029_v15, 0.0 }
 0x1ed   : > { %v2782_v4 = vmax.f32 %v2024_v27, 0.0  ;;  %v5460_v5 = vpop.f32.mrb[132].mxu0  ;;  %3199 = vmatmul.mubr.f32.vlgmr.msra.gmra.mrb[68].mxu1 %v2914_v50  ;;  %v2887_v50 = vmax.f32 %v2549_v33, 0.0  ;;  %v2886_v27 = vmax.f32 %v2544_v46, 0.0 }
 0x1ee   : > { %v2039_v8 = vadd.f32 %v6788_v6, %v5460_v5  ;;  %v2033_v11 = vpop.f32.mrb[133].mxu0  ;;  %3268 = vmatprep.mubr.f32.mxu1 %v2917_v20  ;;  %v5616_v20 = vpop.f32.mrb[42].mxu1 }
 0x1ef   : > { %v6960_v62 = vpack.c.bf16 %v2783_v48, %v2782_v4  ;;  %v2034_v14 = vadd.f32 %v6788_v6, %v2033_v11  ;;  %v2559_v48 = vadd.f32 %v6788_v6, %v5616_v20  ;;  %v2553_v0 = vpop.f32.mrb[43].mxu1  ;;  %v6980_v34 = vpack.c.bf16 %v2887_v50, %v2886_v27 }
 0x1f0   : > { %v2785_v52 = vmax.f32 %v2039_v8, 0.0  ;;  %v2554_v4 = vadd.f32 %v6788_v6, %v2553_v0  ;;  %v5619_v47 = vpop.f32.mrb[44].mxu1 }
 0x1f1   : > { %v2784_v29 = vmax.f32 %v2034_v14, 0.0  ;;  %v5463_v22 = vpop.f32.mrb[134].mxu0  ;;  %v2889_v8 = vmax.f32 %v2559_v48, 0.0  ;;  %v2563_v24 = vpop.f32.mrb[45].mxu1 }
 0x1f2   : > { %v2049_v26 = vadd.f32 %v6788_v6, %v5463_v22  ;;  %v2043_v60 = vpop.f32.mrb[135].mxu0  ;;  %v2888_v14 = vmax.f32 %v2554_v4, 0.0  ;;  %v2564_v57 = vadd.f32 %v6788_v6, %v2563_v24 }
 0x1f3   : > { %v6968_v38 = vpack.c.bf16 %v2785_v52, %v2784_v29  ;;  %v2044_v3 = vadd.f32 %v6788_v6, %v2043_v60  ;;  %v2569_v52 = vadd.f32 %v6788_v6, %v5619_v47 }
 0x1f4   : > { %v2787_v9 = vmax.f32 %v2049_v26, 0.0  ;;  %v6988_v22 = vpack.c.bf16 %v2889_v8, %v2888_v14  ;;  %v2890_v7 = vmax.f32 %v2564_v57, 0.0 }
 0x1f5   : > { %v2786_v10 = vmax.f32 %v2044_v3, 0.0  ;;  %v5466_v12 = vpop.f32.mrb[136].mxu0  ;;  %v2891_v13 = vmax.f32 %v2569_v52, 0.0 }
 0x1f6   : > { %v2059_v15 = vadd.f32 %v6788_v6, %v5466_v12  ;;  %v2053_v32 = vpop.f32.mrb[137].mxu0 }
 0x1f7   : > { %v6976_v54 = vpack.c.bf16 %v2787_v9, %v2786_v10  ;;  %v2054_v23 = vadd.f32 %v6788_v6, %v2053_v32  ;;  %v5622_v9 = vpop.f32.mrb[46].mxu1 }
 0x1f8   : > { %v2789_v28 = vmax.f32 %v2059_v15, 0.0  ;;  %v2579_v17 = vadd.f32 %v6788_v6, %v5622_v9  ;;  %v2573_v10 = vpop.f32.mrb[47].mxu1  ;;  %v6996_v15 = vpack.c.bf16 %v2891_v13, %v2890_v7 }
 0x1f9   : > { %v2788_v63 = vmax.f32 %v2054_v23, 0.0  ;;  %v5469_v2 = vpop.f32.mrb[138].mxu0  ;;  %v2574_v32 = vadd.f32 %v6788_v6, %v2573_v10  ;;  %v5625_v0 = vpop.f32.mrb[48].mxu1 }
 0x1fa   : > { %v2069_v5 = vadd.f32 %v6788_v6, %v5469_v2  ;;  %v2063_v37 = vpop.f32.mrb[139].mxu0  ;;  %v2893_v27 = vmax.f32 %v2579_v17, 0.0  ;;  %v2589_v2 = vadd.f32 %v6788_v6, %v5625_v0  ;;  %v2583_v4 = vpop.f32.mrb[49].mxu1 }
 0x1fb   : > { %v6984_v11 = vpack.c.bf16 %v2789_v28, %v2788_v63  ;;  %v2064_v41 = vadd.f32 %v6788_v6, %v2063_v37  ;;  %v2892_v48 = vmax.f32 %v2574_v32, 0.0 }
 0x1fc   : > { %v2791_v51 = vmax.f32 %v2069_v5, 0.0 }
 0x1fd   : > { %v2790_v19 = vmax.f32 %v2064_v41, 0.0  ;;  %v5472_v29 = vpop.f32.mrb[140].mxu0  ;;  %v7004_v8 = vpack.c.bf16 %v2893_v27, %v2892_v48  ;;  %v2584_v41 = vadd.f32 %v6788_v6, %v2583_v4 }
 0x1fe   : > { %v2079_v26 = vadd.f32 %v6788_v6, %v5472_v29  ;;  %v2073_v60 = vpop.f32.mrb[141].mxu0  ;;  %v5628_v29 = vpop.f32.mrb[50].mxu1 }
 0x1ff   : > { %v6992_v3 = vpack.c.bf16 %v2791_v51, %v2790_v19  ;;  %v2074_v35 = vadd.f32 %v6788_v6, %v2073_v60  ;;  %v2895_v51 = vmax.f32 %v2589_v2, 0.0  ;;  %v2894_v19 = vmax.f32 %v2584_v41, 0.0  ;;  %v2593_v60 = vpop.f32.mrb[51].mxu1 }
 0x200   : > { %v2793_v33 = vmax.f32 %v2079_v26, 0.0  ;;  %v2599_v26 = vadd.f32 %v6788_v6, %v5628_v29  ;;  %v2594_v9 = vadd.f32 %v6788_v6, %v2593_v60 }
 0x201   : > { %v2792_v12 = vmax.f32 %v2074_v35, 0.0  ;;  %v5475_v46 = vpop.f32.mrb[142].mxu0  ;;  %v7012_v7 = vpack.c.bf16 %v2895_v51, %v2894_v19 }
 0x202   : > { %v2089_v50 = vadd.f32 %v6788_v6, %v5475_v46  ;;  %v2083_v23 = vpop.f32.mrb[143].mxu0  ;;  %v2897_v10 = vmax.f32 %v2599_v26, 0.0  ;;  %v2896_v32 = vmax.f32 %v2594_v9, 0.0 }
 0x203   : > { %v7000_v20 = vpack.c.bf16 %v2793_v33, %v2792_v12  ;;  %v2084_v28 = vadd.f32 %v6788_v6, %v2083_v23 }
 0x204   : > { %v2795_v63 = vmax.f32 %v2089_v50, 0.0  ;;  %v5631_v50 = vpop.f32.mrb[52].mxu1 }
 0x205   : > { %v2794_v5 = vmax.f32 %v2084_v28, 0.0  ;;  %v5478_v37 = vpop.f32.mrb[144].mxu0  ;;  %v2609_v27 = vadd.f32 %v6788_v6, %v5631_v50  ;;  %v2603_v28 = vpop.f32.mrb[53].mxu1 }
 0x206   : > { %v2099_v14 = vadd.f32 %v6788_v6, %v5478_v37  ;;  %v2093_v47 = vpop.f32.mrb[145].mxu0  ;;  %v2604_v2 = vadd.f32 %v6788_v6, %v2603_v28  ;;  %v5634_v51 = vpop.f32.mrb[54].mxu1 }
 0x207   : > { %v7008_v52 = vpack.c.bf16 %v2795_v63, %v2794_v5  ;;  %v2094_v24 = vadd.f32 %v6788_v6, %v2093_v47  ;;  %v7018_v63 = vpack.c.bf16 %v2897_v10, %v2896_v32  ;;  %v2899_v37 = vmax.f32 %v2609_v27, 0.0  ;;  %v2613_v29 = vpop.f32.mrb[55].mxu1 }
 0x208   : > { %v2797_v57 = vmax.f32 %v2099_v14, 0.0  ;;  %v2898_v47 = vmax.f32 %v2604_v2, 0.0  ;;  %v2619_v19 = vadd.f32 %v6788_v6, %v5634_v51 }
 0x209   : > { %v2796_v13 = vmax.f32 %v2094_v24, 0.0  ;;  %v5481_v35 = vpop.f32.mrb[146].mxu0 }
 0x20a   : > { %v2109_v33 = vadd.f32 %v6788_v6, %v5481_v35  ;;  %v2103_v17 = vpop.f32.mrb[147].mxu0  ;;  %v7025_v60 = vpack.c.bf16 %v2899_v37, %v2898_v47  ;;  %v2901_v9 = vmax.f32 %v2619_v19, 0.0 }
 0x20b   : > { %v5820_v12 = vpack.c.bf16 %v2797_v57, %v2796_v13  ;;  %v2104_v46 = vadd.f32 %v6788_v6, %v2103_v17  ;;  %v2614_v13 = vadd.f32 %v6788_v6, %v2613_v29 }
 0x20c   : > { %v2799_v23 = vmax.f32 %v2109_v33, 0.0 }
 0x20d   : > { %v2798_v48 = vmax.f32 %v2104_v46, 0.0  ;;  %v5484_v0 = vpop.f32.mrb[148].mxu0  ;;  %5821 = vmatprep.subr.bf16.mxu1 %v5820_v12  ;;  %v2900_v10 = vmax.f32 %v2614_v13, 0.0  ;;  %v5637_v12 = vpop.f32.mrb[56].mxu1 }
 0x20e   : > { %v2119_v4 = vadd.f32 %v6788_v6, %v5484_v0  ;;  %v2113_v5 = vpop.f32.mrb[149].mxu0  ;;  %5823 = vmatpush3.bf16.msra.mxu1 %v6949_v25  ;;  %v2629_v32 = vadd.f32 %v6788_v6, %v5637_v12  ;;  %v2623_v50 = vpop.f32.mrb[57].mxu1 }
 0x20f   : > { %v5824_v41 = vpack.c.bf16 %v2799_v23, %v2798_v48  ;;  %v2114_v14 = vadd.f32 %v6788_v6, %v2113_v5  ;;  %v7032_v28 = vpack.c.bf16 %v2901_v9, %v2900_v10  ;;  %v2624_v48 = vadd.f32 %v6788_v6, %v2623_v50 }
 0x210   : > { %v2801_v24 = vmax.f32 %v2119_v4, 0.0  ;;  %v2903_v2 = vmax.f32 %v2629_v32, 0.0 }
 0x211   : > { %v2800_v57 = vmax.f32 %v2114_v14, 0.0  ;;  %v5487_v26 = vpop.f32.mrb[150].mxu0  ;;  %5825 = vmatprep.subr.bf16.mxu1 %v5824_v41  ;;  %v2902_v37 = vmax.f32 %v2624_v48, 0.0  ;;  %v5640_v41 = vpop.f32.mrb[58].mxu1 }
 0x212   : > { %v2129_v35 = vadd.f32 %v6788_v6, %v5487_v26  ;;  %v2123_v25 = vpop.f32.mrb[151].mxu0  ;;  %5827 = vmatpush3.bf16.msra.mxu1 %v6960_v62  ;;  %v2639_v47 = vadd.f32 %v6788_v6, %v5640_v41  ;;  %v2633_v51 = vpop.f32.mrb[59].mxu1 }
 0x213   : > { %v5828_v33 = vpack.c.bf16 %v2801_v24, %v2800_v57  ;;  %v2124_v17 = vadd.f32 %v6788_v6, %v2123_v25  ;;  %v7039_v29 = vpack.c.bf16 %v2903_v2, %v2902_v37  ;;  %v2634_v57 = vadd.f32 %v6788_v6, %v2633_v51 }
 0x214   : > { %v2803_v46 = vmax.f32 %v2129_v35, 0.0  ;;  %v2905_v13 = vmax.f32 %v2639_v47, 0.0 }
 0x215   : > { %v2802_v23 = vmax.f32 %v2124_v17, 0.0  ;;  %v5490_v27 = vpop.f32.mrb[152].mxu0  ;;  %5829 = vmatprep.subr.bf16.mxu1 %v5828_v33  ;;  %v2904_v9 = vmax.f32 %v2634_v57, 0.0  ;;  %v5643_v33 = vpop.f32.mrb[60].mxu1 }
 0x216   : > { %v2139_v0 = vadd.f32 %v6788_v6, %v5490_v27  ;;  %v2133_v62 = vpop.f32.mrb[153].mxu0  ;;  %5831 = vmatpush3.bf16.msra.mxu1 %v6968_v38  ;;  %v2649_v10 = vadd.f32 %v6788_v6, %v5643_v33  ;;  %v2643_v12 = vpop.f32.mrb[61].mxu1 }
 0x217   : > { %v5832_v4 = vpack.c.bf16 %v2803_v46, %v2802_v23  ;;  %v2134_v5 = vadd.f32 %v6788_v6, %v2133_v62  ;;  %v7046_v50 = vpack.c.bf16 %v2905_v13, %v2904_v9  ;;  %v7051_v23 = vld [vmem:[%s7517_s2] ss:$0 sm:$0xff]  ;;  %v4983_v27 = vpop.f32.mrb[62].mxu1 }
 0x218   : > { %v2805_v14 = vmax.f32 %v2139_v0, 0.0  ;;  %v4984_v62 = vpop.f32.mrb[63].mxu1 }
 0x219   : > { %v2804_v24 = vmax.f32 %v2134_v5, 0.0  ;;  %v5493_v19 = vpop.f32.mrb[154].mxu0  ;;  %5833 = vmatprep.subr.bf16.mxu1 %v5832_v4  ;;  %v7057_v37 = vadd.f32 %v4984_v62, %v4983_v27  ;;  %v2919_v27 = vld [vmem:[%s7518_s3 + $0x58] sm:$0xff] }
 0x21a   : > { %v2149_v26 = vadd.f32 %v6788_v6, %v5493_v19  ;;  %v2143_v38 = vpop.f32.mrb[155].mxu0  ;;  %5835 = vmatpush3.bf16.msra.mxu1 %v6976_v54  ;;  %v2644_v54 = vadd.f32 %v7051_v23, %v2643_v12 }
 0x21b   : > { %v5836_v35 = vpack.c.bf16 %v2805_v14, %v2804_v24  ;;  %v2144_v25 = vadd.f32 %v6788_v6, %v2143_v38  ;;  %v2907_v6 = vmax.f32 %v2649_v10, 0.0 }
 0x21c   : > { %v2807_v17 = vmax.f32 %v2149_v26, 0.0  ;;  %v2906_v5 = vmax.f32 %v2644_v54, 0.0 }
 0x21d   : > { %v2806_v46 = vmax.f32 %v2144_v25, 0.0  ;;  %v5496_v32 = vpop.f32.mrb[156].mxu0  ;;  %5837 = vmatprep.subr.bf16.mxu1 %v5836_v35 }
 0x21e   : > { %v2159_v48 = vadd.f32 %v7051_v23, %v5496_v32  ;;  %v2153_v0 = vpop.f32.mrb[157].mxu0  ;;  %5839 = vmatpush3.bf16.msra.mxu1 %v6984_v11  ;;  %v7059_v51 = vpack.c.bf16 %v2907_v6, %v2906_v5  ;;  %v2916_v32 = vld [vmem:[%s7518_s3 + $0x40] sm:$0xff] }
 0x21f   : > { %v5840_v2 = vpack.c.bf16 %v2807_v17, %v2806_v46  ;;  %v2154_v4 = vadd.f32 %v7051_v23, %v2153_v0 }
 0x220   : > { %v2809_v41 = vmax.f32 %v2159_v48, 0.0 }
 0x221   : > { %v2808_v14 = vmax.f32 %v2154_v4, 0.0  ;;  %v5499_v47 = vpop.f32.mrb[158].mxu0  ;;  %5841 = vmatprep.subr.bf16.mxu1 %v5840_v2 }
 0x222   : > { %v2169_v24 = vadd.f32 %v7051_v23, %v5499_v47  ;;  %v2163_v19 = vpop.f32.mrb[159].mxu0  ;;  %5843 = vmatpush3.bf16.msra.mxu1 %v6992_v3 }
 0x223   : > { %v5844_v11 = vpack.c.bf16 %v2809_v41, %v2808_v14  ;;  %v2164_v57 = vadd.f32 %v7051_v23, %v2163_v19 }
 0x224   : > { %v2811_v26 = vmax.f32 %v2169_v24, 0.0 }
 0x225   : > { %v2810_v38 = vmax.f32 %v2164_v57, 0.0  ;;  %v5502_v13 = vpop.f32.mrb[160].mxu0  ;;  %5845 = vmatprep.subr.bf16.mxu1 %v5844_v11 }
 0x226   : > { %v2179_v35 = vadd.f32 %v7051_v23, %v5502_v13  ;;  %v2173_v25 = vpop.f32.mrb[161].mxu0  ;;  %5847 = vmatpush3.bf16.msra.mxu1 %v7000_v20 }
 0x227   : > { %v5848_v9 = vpack.c.bf16 %v2811_v26, %v2810_v38  ;;  %v2174_v33 = vadd.f32 %v7051_v23, %v2173_v25 }
 0x228   : > { %v2813_v17 = vmax.f32 %v2179_v35, 0.0 }
 0x229   : > { %v2812_v10 = vmax.f32 %v2174_v33, 0.0  ;;  %v5505_v12 = vpop.f32.mrb[162].mxu0  ;;  %5849 = vmatprep.subr.bf16.mxu1 %v5848_v9 }
 0x22a   : > { %v2189_v3 = vadd.f32 %v7051_v23, %v5505_v12  ;;  %v2183_v46 = vpop.f32.mrb[163].mxu0  ;;  %5851 = vmatpush3.bf16.msra.mxu1 %v7008_v52 }
 0x22b   : > { %v7072_v54 = vpack.c.bf16 %v2813_v17, %v2812_v10  ;;  %v2184_v20 = vadd.f32 %v7051_v23, %v2183_v46 }
 0x22c   : > { %v2815_v48 = vmax.f32 %v2189_v3, 0.0 }
 0x22d   : > { %v2814_v0 = vmax.f32 %v2184_v20, 0.0  ;;  %v5508_v6 = vpop.f32.mrb[164].mxu0  ;;  %3269 = vmatmul.mubr.f32.vlgmr.msra.gmra.mrb[70].mxu1 %v2916_v32 }
 0x22e   : > { %v2199_v62 = vadd.f32 %v7051_v23, %v5508_v6  ;;  %v2193_v2 = vpop.f32.mrb[165].mxu0  ;;  %3338 = vmatprep.mubr.f32.mxu1 %v2919_v27 }
 0x22f   : > { %v7079_v52 = vpack.c.bf16 %v2815_v48, %v2814_v0  ;;  %v2194_v4 = vadd.f32 %v7051_v23, %v2193_v2 }
 0x230   : > { %v2817_v5 = vmax.f32 %v2199_v62, 0.0 }
 0x231   : > { %v2816_v41 = vmax.f32 %v2194_v4, 0.0  ;;  %v5511_v14 = vpop.f32.mrb[166].mxu0 }
 0x232   : > { %v2209_v47 = vadd.f32 %v7051_v23, %v5511_v14  ;;  %v2203_v24 = vpop.f32.mrb[167].mxu0 }
 0x233   : > { %v7083_v19 = vpack.c.bf16 %v2817_v5, %v2816_v41  ;;  %v2204_v11 = vadd.f32 %v7051_v23, %v2203_v24 }
 0x234   : > { %v2819_v57 = vmax.f32 %v2209_v47, 0.0 }
 0x235   : > { %v2818_v26 = vmax.f32 %v2204_v11, 0.0  ;;  %v5514_v38 = vpop.f32.mrb[168].mxu0 }
 0x236   : > { %v2219_v13 = vadd.f32 %v7051_v23, %v5514_v38  ;;  %v2213_v35 = vpop.f32.mrb[169].mxu0 }
 0x237   : > { %v7087_v25 = vpack.c.bf16 %v2819_v57, %v2818_v26  ;;  %v2214_v9 = vadd.f32 %v7051_v23, %v2213_v35 }
 0x238   : > { %v2821_v33 = vmax.f32 %v2219_v13, 0.0 }
 0x239   : > { %v2820_v17 = vmax.f32 %v2214_v9, 0.0  ;;  %v5517_v10 = vpop.f32.mrb[170].mxu0 }
 0x23a   : > { %v2229_v12 = vadd.f32 %v7051_v23, %v5517_v10  ;;  %v2223_v3 = vpop.f32.mrb[171].mxu0 }
 0x23b   : > { %v7091_v46 = vpack.c.bf16 %v2821_v33, %v2820_v17  ;;  %v2224_v32 = vadd.f32 %v7051_v23, %v2223_v3 }
 0x23c   : > { %v2823_v20 = vmax.f32 %v2229_v12, 0.0 }
 0x23d   : > { %v2822_v27 = vmax.f32 %v2224_v32, 0.0  ;;  %v5520_v48 = vpop.f32.mrb[172].mxu0 }
 0x23e   : > { %v2239_v0 = vadd.f32 %v7051_v23, %v5520_v48  ;;  %v2233_v6 = vpop.f32.mrb[173].mxu0 }
 0x23f   : > { %v7095_v62 = vpack.c.bf16 %v2823_v20, %v2822_v27  ;;  %v2234_v2 = vadd.f32 %v7051_v23, %v2233_v6 }
 0x240   : > { %v2825_v4 = vmax.f32 %v2239_v0, 0.0  ;;  %v5018_v5 = vpop.f32.mrb[64].mxu1 }
 0x241   : > { %v2824_v41 = vmax.f32 %v2234_v2, 0.0  ;;  %v5523_v14 = vpop.f32.mrb[174].mxu0  ;;  %v5019_v47 = vpop.f32.mrb[65].mxu1 }
 0x242   : > { %v2249_v24 = vadd.f32 %v7051_v23, %v5523_v14  ;;  %v2243_v11 = vpop.f32.mrb[175].mxu0  ;;  %v5020_v57 = vadd.f32 %v5019_v47, %v5018_v5 }
 0x243   : > { %v7099_v26 = vpack.c.bf16 %v2825_v4, %v2824_v41  ;;  %v2244_v38 = vadd.f32 %v7051_v23, %v2243_v11 }
 0x244   : > { %v2827_v13 = vmax.f32 %v2249_v24, 0.0  ;;  %v7103_v35 = vadd.f32 %v5020_v57, %v7057_v37 }
 0x245   : > { %v2826_v9 = vmax.f32 %v2244_v38, 0.0  ;;  %v5526_v33 = vpop.f32.mrb[176].mxu0 }
 0x246   : > { %v2259_v17 = vadd.f32 %v7051_v23, %v5526_v33  ;;  %v2253_v10 = vpop.f32.mrb[177].mxu0 }
 0x247   : > { %v7106_v12 = vpack.c.bf16 %v2827_v13, %v2826_v9  ;;  %v2254_v3 = vadd.f32 %v7051_v23, %v2253_v10 }
 0x248   : > { %v2829_v32 = vmax.f32 %v2259_v17, 0.0 }
 0x249   : > { %v2828_v20 = vmax.f32 %v2254_v3, 0.0  ;;  %v5529_v27 = vpop.f32.mrb[178].mxu0 }
 0x24a   : > { %v2269_v48 = vadd.f32 %v7051_v23, %v5529_v27  ;;  %v2263_v0 = vpop.f32.mrb[179].mxu0 }
 0x24b   : > { %v5852_v6 = vpack.c.bf16 %v2829_v32, %v2828_v20  ;;  %v2264_v2 = vadd.f32 %v7051_v23, %v2263_v0 }
 0x24c   : > { %v2831_v37 = vmax.f32 %v2269_v48, 0.0 }
 0x24d   : > { %v2830_v4 = vmax.f32 %v2264_v2, 0.0  ;;  %v5532_v5 = vpop.f32.mrb[180].mxu0  ;;  %5853 = vmatprep.subr.bf16.mxu1 %v5852_v6 }
 0x24e   : > { %v2279_v41 = vadd.f32 %v7051_v23, %v5532_v5  ;;  %v2273_v14 = vpop.f32.mrb[181].mxu0  ;;  %5855 = vmatpush3.bf16.msra.mxu1 %v7072_v54 }
 0x24f   : > { %v5856_v47 = vpack.c.bf16 %v2831_v37, %v2830_v4  ;;  %v2274_v24 = vadd.f32 %v7051_v23, %v2273_v14 }
 0x250   : > { %v2833_v11 = vmax.f32 %v2279_v41, 0.0 }
 0x251   : > { %v2832_v57 = vmax.f32 %v2274_v24, 0.0  ;;  %v5535_v38 = vpop.f32.mrb[182].mxu0  ;;  %5857 = vmatprep.subr.bf16.mxu1 %v5856_v47 }
 0x252   : > { %v2289_v13 = vadd.f32 %v7051_v23, %v5535_v38  ;;  %v2283_v9 = vpop.f32.mrb[183].mxu0  ;;  %5859 = vmatpush3.bf16.msra.mxu1 %v7079_v52 }
 0x253   : > { %v5860_v33 = vpack.c.bf16 %v2833_v11, %v2832_v57  ;;  %v2284_v17 = vadd.f32 %v7051_v23, %v2283_v9 }
 0x254   : > { %v2835_v10 = vmax.f32 %v2289_v13, 0.0 }
 0x255   : > { %v2834_v3 = vmax.f32 %v2284_v17, 0.0  ;;  %v5538_v32 = vpop.f32.mrb[184].mxu0  ;;  %5861 = vmatprep.subr.bf16.mxu1 %v5860_v33 }
 0x256   : > { %v2299_v54 = vadd.f32 %v7051_v23, %v5538_v32  ;;  %v2293_v20 = vpop.f32.mrb[185].mxu0  ;;  %5863 = vmatpush3.bf16.msra.mxu1 %v7083_v19 }
 0x257   : > { %v5864_v27 = vpack.c.bf16 %v2835_v10, %v2834_v3  ;;  %v2294_v48 = vadd.f32 %v7051_v23, %v2293_v20 }
 0x258   : > { %v2837_v0 = vmax.f32 %v2299_v54, 0.0 }
 0x259   : > { %v2836_v6 = vmax.f32 %v2294_v48, 0.0  ;;  %v5541_v2 = vpop.f32.mrb[186].mxu0  ;;  %5865 = vmatprep.subr.bf16.mxu1 %v5864_v27 }
 0x25a   : > { %v2309_v52 = vadd.f32 %v7051_v23, %v5541_v2  ;;  %v2303_v37 = vpop.f32.mrb[187].mxu0  ;;  %5867 = vmatpush3.bf16.msra.mxu1 %v7087_v25 }
 0x25b   : > { %v5868_v4 = vpack.c.bf16 %v2837_v0, %v2836_v6  ;;  %v2304_v5 = vadd.f32 %v7051_v23, %v2303_v37  ;;  %v3499_v37 = vld [vmem:[%s7519_s4 + $0x78] sm:$0xff] }
 0x25c   : > { %v2839_v41 = vmax.f32 %v2309_v52, 0.0  ;;  %v2921_v52 = vld [vmem:[%s7518_s3 + $0x68] sm:$0xff] }
 0x25d   : > { %v2838_v14 = vmax.f32 %v2304_v5, 0.0  ;;  %v5544_v47 = vpop.f32.mrb[188].mxu0  ;;  %5869 = vmatprep.subr.bf16.mxu1 %v5868_v4 }
 0x25e   : > { %v2319_v19 = vadd.f32 %v7051_v23, %v5544_v47  ;;  %v2313_v24 = vpop.f32.mrb[189].mxu0  ;;  %5871 = vmatpush3.bf16.msra.mxu1 %v7091_v46  ;;  %v6026_v47 = vmov 0.0  }
 0x25f   : > { %v5872_v11 = vpack.c.bf16 %v2839_v41, %v2838_v14  ;;  %v2314_v57 = vadd.f32 %v7051_v23, %v2313_v24 }
 0x260   : > { %v2841_v38 = vmax.f32 %v2319_v19, 0.0 }
 0x261   : > { %v2840_v13 = vmax.f32 %v2314_v57, 0.0  ;;  %v5547_v9 = vpop.f32.mrb[190].mxu0  ;;  %5873 = vmatprep.subr.bf16.mxu1 %v5872_v11 }
 0x262   : > { %v2329_v25 = vadd.f32 %v7051_v23, %v5547_v9  ;;  %v2323_v33 = vpop.f32.mrb[191].mxu0  ;;  %5875 = vmatpush3.bf16.msra.mxu1 %v7095_v62  ;;  %v2918_v62 = vld [vmem:[%s7518_s3 + $0x50] sm:$0xff] }
 0x263   : > { %v5876_v17 = vpack.c.bf16 %v2841_v38, %v2840_v13  ;;  %v2324_v10 = vadd.f32 %v7051_v23, %v2323_v33 }
 0x264   : > { %v2843_v3 = vmax.f32 %v2329_v25, 0.0 }
 0x265   : > { %v2842_v32 = vmax.f32 %v2324_v10, 0.0  ;;  %v5550_v54 = vpop.f32.mrb[192].mxu0  ;;  %5877 = vmatprep.subr.bf16.mxu1 %v5876_v17 }
 0x266   : > { %v2339_v46 = vadd.f32 %v7051_v23, %v5550_v54  ;;  %v2333_v20 = vpop.f32.mrb[193].mxu0  ;;  %5879 = vmatpush3.bf16.msra.mxu1 %v7099_v26 }
 0x267   : > { %v5880_v27 = vpack.c.bf16 %v2843_v3, %v2842_v32  ;;  %v2334_v48 = vadd.f32 %v7051_v23, %v2333_v20  ;;  %v4682_v32 = vld [vmem:[%s7520_s5] ss:$0 sm:$0xff] }
 0x268   : > { %v2845_v0 = vmax.f32 %v2339_v46, 0.0 }
 0x269   : > { %v2844_v6 = vmax.f32 %v2334_v48, 0.0  ;;  %5881 = vmatprep.subr.bf16.mxu1 %v5880_v27  ;;  %v3586_v48 = vld [vmem:[%s7521_s6] sm:$0xf] (!%p4684_p4) }
 0x26a   : > { %5883 = vmatpush3.bf16.msra.mxu1 %v7106_v12  ;;  %v3498_v12 = vld [vmem:[%s7519_s4 + $0x70] sm:$0xff] }
 0x26b   : > { %v5886_v2 = vpack.c.bf16 %v2845_v0, %v2844_v6  ;;  %5885 = vmatprep.subr.bf16.mxu1 %v6878_v43  ;;  %v5970_v5 = vpack.c.bf16 %v3499_v37, %v3498_v12  ;;  %v6027_v0 = vmov (!%p4684_p4), 0.0   ;;  %v3666_v6 = vlaneseq (!%p4684_p4) }
 0x26c   : > { %5679 = vmatprep.subr.mxu0 (!%p4684_p4), %v6027_v0  ;;  %5681 = vmatprep.mubr.msk.f32.mxu0 (!%p4684_p4), %vm6028_vm4, %v6027_v0 }
 0x26d   : > { %3339 = vmatmul.mubr.f32.vlgmr.msra.gmra.mrb[72].mxu1 %v2918_v62  ;;  %v6029_v62 = vmov (!%p4684_p4), 1966171168  }
 0x26e   : > { %5887 = vmatpush3.bf16.msra.mxu1 %v5886_v2  ;;  %3408 = vmatprep.mubr.f32.mxu1 %v2921_v52  ;;  %v3664_v2 = vunpack.c.l.s4 (!%p4684_p4), %v6029_v62  ;;  %v7238_v52 = vshrl.u32 (!%p4684_p4), %v3666_v6, 7 }
 0x26f   : > { %5889 = vmatprep.subr.bf16.mxu1 %v6886_v61 }
 0x272   : > { %5891 = vmatpush3.bf16.msra.mxu1 %v6819_v1 }
 0x273   : > { %5893 = vmatprep.subr.bf16.mxu1 %v6893_v18 }
 0x276   : > { %5895 = vmatpush3.bf16.msra.mxu1 %v6830_v16  ;;  %v2920_v16 = vld [vmem:[%s7518_s3 + $0x60] sm:$0xff] }
 0x277   : > { %5897 = vmatprep.subr.bf16.mxu1 %v6900_v36  ;;  %v3484_v36 = vld [vmem:[%s7519_s4] sm:$0xff] }
 0x27a   : > { %5899 = vmatpush3.bf16.msra.mxu1 %v6838_v30  ;;  %v2923_v30 = vld [vmem:[%s7518_s3 + $0x78] sm:$0xff] }
 0x27b   : > { %5901 = vmatprep.subr.bf16.mxu1 %v6907_v53  ;;  %v3485_v53 = vld [vmem:[%s7519_s4 + $0x8] sm:$0xff] }
 0x27e   : > { %5903 = vmatpush3.bf16.msra.mxu1 %v6846_v45  ;;  %v2922_v45 = vld [vmem:[%s7518_s3 + $0x70] sm:$0xff] }
 0x27f   : > { %5905 = vmatprep.subr.bf16.mxu1 %v6914_v40  ;;  %v3486_v40 = vld [vmem:[%s7519_s4 + $0x10] sm:$0xff] }
 0x280   : > { %v5053_v43 = vpop.f32.mrb[66].mxu1 }
 0x281   : > { %v5054_v23 = vpop.f32.mrb[67].mxu1 }
 0x282   : > { %5907 = vmatpush3.bf16.msra.mxu1 %v6854_v58  ;;  %v5055_v61 = vadd.f32 %v5054_v23, %v5053_v43  ;;  %v3665_v43 = vunpack.c.0.s8 (!%p4684_p4), %v3664_v2 }
 0x283   : > { %5909 = vmatprep.subr.bf16.mxu1 %v6921_v56  ;;  %v6024_v56 = vmov 0.0|0.0  }
 0x284   : > { %v3131_v1 = vadd.f32 %v5055_v61, %v7103_v35  ;;  %v3668_v23 = vsub.s32 (!%p4684_p4), %v3665_v43, %v7238_v52 }
 0x286   : > { %5911 = vmatpush3.bf16.msra.mxu1 %v6862_v49 }
 0x287   : > { %5913 = vmatprep.subr.bf16.mxu1 %v6928_v42  ;;  %v5949_v42 = vpack.c.bf16 %v3485_v53, %v3484_v36  ;;  %v7242_v36 = vsub.s32 (!%p4684_p4), 0, %v7238_v52 }
 0x28a   : > { %5915 = vmatpush3.bf16.msra.mxu1 %v6870_v59 }
 0x28b   : > { %5917 = vmatprep.subr.bf16.mxu1 %v7004_v8  ;;  %v3492_v8 = vld [vmem:[%s7519_s4 + $0x40] sm:$0xff] }
 0x28d   : > { %3409 = vmatmul.mubr.f32.vlgmr.msra.gmra.mrb[74].mxu1 %v2920_v16 }
 0x28e   : > { %5919 = vmatpush3.bf16.msra.mxu1 %v6935_v31  ;;  %3478 = vmatprep.mubr.f32.mxu1 %v2923_v30  ;;  %v3487_v31 = vld [vmem:[%s7519_s4 + $0x18] sm:$0xff] }
 0x28f   : > { %5921 = vmatprep.subr.bf16.mxu1 %v7012_v7  ;;  %v3493_v7 = vld [vmem:[%s7519_s4 + $0x48] sm:$0xff] }
 0x292   : > { %5923 = vmatpush3.bf16.msra.mxu1 %v6945_v21  ;;  %v5952_v21 = vpack.c.bf16 %v3487_v31, %v3486_v40 }
 0x293   : > { %5925 = vmatprep.subr.bf16.mxu1 %v7018_v63  ;;  %v5961_v63 = vpack.c.bf16 %v3493_v7, %v3492_v8 }
 0x296   : > { %5927 = vmatpush3.bf16.msra.mxu1 %v6958_v39  ;;  %v3488_v39 = vld [vmem:[%s7519_s4 + $0x20] sm:$0xff] }
 0x297   : > { %5929 = vmatprep.subr.bf16.mxu1 %v7025_v60  ;;  %v3494_v60 = vld [vmem:[%s7519_s4 + $0x50] sm:$0xff] }
 0x29a   : > { %5931 = vmatpush3.bf16.msra.mxu1 %v6964_v55  ;;  %v3489_v55 = vld [vmem:[%s7519_s4 + $0x28] sm:$0xff] }
 0x29b   : > { %5933 = vmatprep.subr.bf16.mxu1 %v7032_v28  ;;  %v3495_v28 = vld [vmem:[%s7519_s4 + $0x58] sm:$0xff] }
 0x29e   : > { %5935 = vmatpush3.bf16.msra.mxu1 %v6972_v44  ;;  %v5955_v44 = vpack.c.bf16 %v3489_v55, %v3488_v39 }
 0x29f   : > { %5937 = vmatprep.subr.bf16.mxu1 %v7039_v29  ;;  %v5964_v29 = vpack.c.bf16 %v3495_v28, %v3494_v60 }
 0x2a2   : > { %5939 = vmatpush3.bf16.msra.mxu1 %v6980_v34  ;;  %v3490_v34 = vld [vmem:[%s7519_s4 + $0x30] sm:$0xff] }
 0x2a3   : > { %5941 = vmatprep.subr.bf16.mxu1 %v7046_v50  ;;  %v3496_v50 = vld [vmem:[%s7519_s4 + $0x60] sm:$0xff] }
 0x2a6   : > { %5943 = vmatpush3.bf16.msra.mxu1 %v6988_v22  ;;  %v3491_v22 = vld [vmem:[%s7519_s4 + $0x38] sm:$0xff] }
 0x2a7   : > { %5945 = vmatprep.subr.bf16.mxu1 %v7059_v51  ;;  %v3497_v51 = vld [vmem:[%s7519_s4 + $0x68] sm:$0xff] }
 0x2a8   : > { %v5967_v26 = vpack.c.bf16 %v3497_v51, %v3496_v50 }
 0x2aa   : > { %5947 = vmatpush3.bf16.msra.mxu1 %v6996_v15  ;;  %v5958_v15 = vpack.c.bf16 %v3491_v22, %v3490_v34 }
 0x2ab   : > { %5948 = vmatprep.subr.bf16.mxu1 %v6024_v56 }
 0x2ad   : > { %3479 = vmatmul.mubr.f32.vlgmr.msra.gmra.mrb[76].mxu1 %v2922_v45 }
 0x2ae   : > { %5950 = vmatpush3.bf16.msra.mxu1 %v5949_v42  ;;  %5676 = vmatprep.mubr.msk.f32.mxu1 %vm6025_vm2, %v6026_v47 }
 0x2af   : > { %5951 = vmatprep.subr.bf16.mxu1 %v6024_v56 }
 0x2b2   : > { %5953 = vmatpush3.bf16.msra.mxu1 %v5952_v21 }
 0x2b3   : > { %5954 = vmatprep.subr.bf16.mxu1 %v6024_v56 }
 0x2b6   : > { %5956 = vmatpush3.bf16.msra.mxu1 %v5955_v44 }
 0x2b7   : > { %5957 = vmatprep.subr.bf16.mxu1 %v6024_v56 }
 0x2ba   : > { %5959 = vmatpush3.bf16.msra.mxu1 %v5958_v15 }
 0x2bb   : > { %5960 = vmatprep.subr.bf16.mxu1 %v6024_v56 }
 0x2be   : > { %5962 = vmatpush3.bf16.msra.mxu1 %v5961_v63 }
 0x2bf   : > { %5963 = vmatprep.subr.bf16.mxu1 %v6024_v56 }
 0x2c0   : > { %v5088_v58 = vpop.f32.mrb[68].mxu1 }
 0x2c1   : > { %v5089_v49 = vpop.f32.mrb[69].mxu1 }
 0x2c2   : > { %v5090_v59 = vadd.f32 %v5089_v49, %v5088_v58  ;;  %5965 = vmatpush3.bf16.msra.mxu1 %v5964_v29 }
 0x2c3   : > { %5966 = vmatprep.subr.bf16.mxu1 %v6024_v56 }
 0x2c4   : > { %v3201_v18 = vadd.f32 %v5090_v59, %v3131_v1 }
 0x2c6   : > { %5968 = vmatpush3.bf16.msra.mxu1 %v5967_v26 }
 0x2c7   : > { %5969 = vmatprep.subr.bf16.mxu1 %v6024_v56 }
 0x2ca   : > { %5971 = vmatpush3.bf16.msra.mxu1 %v5970_v5 }
 0x300   : > { %v5123_v35 = vpop.f32.mrb[70].mxu1 }
 0x301   : > { %v5124_v4 = vpop.f32.mrb[71].mxu1 }
 0x302   : > { %v5125_v41 = vadd.f32 %v5124_v4, %v5123_v35 }
 0x304   : > { %v3271_v14 = vadd.f32 %v5125_v41, %v3201_v18 }
 0x340   : > { %v5158_v19 = vpop.f32.mrb[72].mxu1 }
 0x341   : > { %v5159_v24 = vpop.f32.mrb[73].mxu1 }
 0x342   : > { %v5160_v11 = vadd.f32 %v5159_v24, %v5158_v19 }
 0x344   : > { %v3341_v57 = vadd.f32 %v5160_v11, %v3271_v14 }
 0x360   : > { %v5193_v38 = vpop.f32.mrb[74].mxu1 }
 0x361   : > { %v5194_v13 = vpop.f32.mrb[75].mxu1 }
 0x362   : > { %v5195_v9 = vadd.f32 %v5194_v13, %v5193_v38 }
 0x364   : > { %v3411_v25 = vadd.f32 %v5195_v9, %v3341_v57 }
 0x380   : > { %v5228_v33 = vpop.f32.mrb[76].mxu1 }
 0x381   : > { %v5229_v17 = vpop.f32.mrb[77].mxu1 }
 0x382   : > { %v5230_v10 = vadd.f32 %v5229_v17, %v5228_v33 }
 0x384   : > { %v3481_v3 = vadd.f32 %v5230_v10, %v3411_v25  ;;  %v7260_v10 = vand.u32 (!%p4684_p4), 127, %v3666_v6 }
 0x386   : > { %5677 = vmatmul.mubr.f32.vlgmr.msra.gmra.mrb[78].mxu1 %v3481_v3 }
 0x456   : > { %3583 = sbr.rel (%p4684_p4) target bundleno = 2125 (0x84d), region = 52 }
 0x459   : > { %v3573_v54 = vpop.f32.mrb[78].mxu1 }
 0x45a   : > { %v3574_v46 = vadd.f32 %v4682_v32, %v3573_v54  ;;  %v5678_v20 = vpop.f32.mrb[79].mxu1  ;;  %v7269_v54 = vsub.s32 (!%p4684_p4), %v7260_v10, %v7238_v52 }
 0x45c   : > { %3579 = vst [vmem:[%s3578_s30] sm:$0xff] %v3574_v46 }
 0x463   : > { %v3584_v27 = vld [vmem:[#allocation2] sm:$0xff]  ;;  %v3585_v61 = vld [vmem:[#allocation2 + $0x8] sm:$0xff] }
 0x464   : > { %5680 = vmatpush3.msra.mxu0 %v3584_v27  ;;  %v3669_v1 = vrot.slane %v3585_v61, %v3668_v23  ;;  %v3662_v16 = vcombine.high %v3585_v61, %v3585_v61 }
 0x465   : > { %5682 = vmatmul.mubr.msk.f32.vlgmr.msra.gmra.mrb[0].mxu0 %vm3587_vm3, %v3586_v48 }
 0x466   : > { %v3677_v30 = vcombine.high %v3669_v1, %v3669_v1  ;;  %v3676_v45 = vrot.slane %v3662_v16, %v3668_v23  ;;  %v3685_v58 = vrot.slane %v3669_v1, %v3668_v23 }
 0x468   : > { %v3699_v49 = vrot.slane %v3677_v30, %v3668_v23  ;;  %v3678_v59 = vcombine.high %v3676_v45, %v3676_v45  ;;  %v3707_v18 = vcombine.high %v3685_v58, %v3685_v58  ;;  %v3692_v56 = vrot.slane %v3676_v45, %v3668_v23 }
 0x469   : > { %v3714_v31 = vrot.slane %v3685_v58, %v7242_v36 }
 0x46a   : > { %v3709_v53 = vcombine.high %v3699_v49, %v3699_v49  ;;  %v3706_v40 = vrot.slane %v3678_v59, %v3668_v23  ;;  %v3722_v42 = vrot.slane %v3707_v18, %v7242_v36  ;;  %v3718_v39 = vrot.slane %v3699_v49, %v7242_v36 }
 0x46b   : > { %v3730_v34 = vrot.slane %v3692_v56, %v7242_v36  ;;  %v3708_v15 = vcombine.high %v3692_v56, %v3692_v56 }
 0x46c   : > { %v3726_v21 = vrot.slane %v3709_v53, %v7242_v36  ;;  %v3734_v44 = vrot.slane %v3706_v40, %v7242_v36  ;;  %v3710_v22 = vcombine.high %v3706_v40, %v3706_v40 }
 0x46d   : > { %v3738_v12 = vrot.slane %v3708_v15, %v7242_v36 }
 0x46e   : > { %v3742_v35 = vrot.slane %v3710_v22, %v7242_v36 }
 0x538   : > { %v3657_v55 = vpop.f32.mrb[0].mxu0 }
 0x539   : > { %v5683_v8 = vpop.f32.mrb[1].mxu0  ;;  %v3753_v7 = vsub.f32 %v3722_v42, %v3657_v55  ;;  %v3751_v63 = vsub.f32 %v3714_v31, %v3657_v55  ;;  %v3754_v60 = vsub.f32 %v3726_v21, %v3657_v55  ;;  %v3752_v28 = vsub.f32 %v3718_v39, %v3657_v55 }
 0x53a   : > { %v3756_v51 = vsub.f32 %v3734_v44, %v3657_v55  ;;  %v3755_v26 = vsub.f32 %v3730_v34, %v3657_v55  ;;  %v3758_v14 = vsub.f32 %v3742_v35, %v3657_v55  ;;  %v3757_v47 = vsub.f32 %v3738_v12, %v3657_v55 }
 0x53b   : > { %v3761_v29 = vmul.f32 %v3753_v7, %v3753_v7  ;;  %v3759_v50 = vmul.f32 %v3751_v63, %v3751_v63  ;;  %v3762_v5 = vmul.f32 %v3754_v60, %v3754_v60  ;;  %v3760_v41 = vmul.f32 %v3752_v28, %v3752_v28 }
 0x53c   : > { %v3764_v11 = vmul.f32 %v3756_v51, %v3756_v51  ;;  %v3763_v57 = vmul.f32 %v3755_v26, %v3755_v26  ;;  %v3766_v9 = vmul.f32 %v3758_v14, %v3758_v14  ;;  %v3765_v25 = vmul.f32 %v3757_v47, %v3757_v47 }
 0x53d   : > { %v3773_v37 = vsel %vm1303_vm1, %v3761_v29, 0.0  ;;  %v3767_v4 = vsel %vm1303_vm1, %v3759_v50, 0.0  ;;  %v3776_v19 = vsel %vm1303_vm1, %v3762_v5, 0.0  ;;  %v3770_v24 = vsel %vm1303_vm1, %v3760_v41, 0.0 }
 0x53e   : > { %3774 = vadd.xlane.f32.xlu1 %v3773_v37  ;;  %3768 = vadd.xlane.f32.xlu0 %v3767_v4  ;;  %v3782_v38 = vsel %vm1303_vm1, %v3764_v11, 0.0  ;;  %v3779_v13 = vsel %vm1303_vm1, %v3763_v57, 0.0  ;;  %v3788_v33 = vsel %vm1303_vm1, %v3766_v9, 0.0  ;;  %v3785_v17 = vsel %vm1303_vm1, %v3765_v25, 0.0 }
 0x53f   : > { %v6030_v47 = vmov 0   ;;  %v3881_v9 = vsub.s32 2, %v7238_v52 }
 0x540   : > { %5996 = vset.pattern.permute.xlu1 %v6030_v47  ;;  %5995 = vset.pattern.permute.xlu0 %v6030_v47 }
 0x542   : > { %3777 = vadd.xlane.f32.xlu1 %v3776_v19  ;;  %3771 = vadd.xlane.f32.xlu0 %v3770_v24  ;;  %v3797_v19 = vadd.s32 1, %v7260_v10  ;;  %v3795_v24 = vmul.u32 2, %v7260_v10 }
 0x544   : > { %v3798_v11 = vmul.u32 2, %v3797_v19  ;;  %vm7358_vm13 = vcmp.ge.s32.totalorder %v7238_v52, %v3795_v24 }
 0x546   : > { %3783 = vadd.xlane.f32.xlu1 %v3782_v38  ;;  %3780 = vadd.xlane.f32.xlu0 %v3779_v13  ;;  %vm7363_vm14 = vcmp.lt.s32.totalorder %v7238_v52, %v3798_v11  ;;  %v7372_v13 = vsub.s32 1, %v7238_v52 }
 0x547   : > { %vm3800_vm15 = vmand %vm7358_vm13, %vm7363_vm14 }
 0x548   : > { %v7381_v25 = vsel %vm3800_vm15, 1.0, %v6027_v0 }
 0x54a   : > { %3789 = vadd.xlane.f32.xlu1 %v3788_v33  ;;  %3786 = vadd.xlane.f32.xlu0 %v3785_v17 }
 0x55b   : > { %4271 = vbcast.lane.b32.xlu1 %v7260_v10, 256 }
 0x5cb   : > { %v7263_v3 = vpop.xlane.xlu1 %3774  ;;  %v7265_v32 = vpop.xlane.xlu0 %3768 }
 0x5cc   : > { %v7272_v46 = vsub.f32 0.0, %v7265_v32  ;;  %v7275_v20 = vsub.f32 0.0, %v7263_v3  ;;  %v4181_v6 = vrot.slane %v7265_v32, %v7269_v54  ;;  %v4189_v23 = vrot.slane %v7263_v3, %v7269_v54 }
 0x5ce   : > { %v3822_v61 = vrot.slane %v7272_v46, %v7269_v54  ;;  %v3830_v45 = vrot.slane %v7275_v20, %v7269_v54 }
 0x5cf   : > { %v7277_v27 = vpop.xlane.xlu1 %3777  ;;  %v7279_v48 = vpop.xlane.xlu0 %3771 }
 0x5d0   : > { %v7284_v62 = vsub.f32 0.0, %v7277_v27  ;;  %v7287_v2 = vsub.f32 0.0, %v7279_v48  ;;  %v4185_v43 = vrot.slane %v7279_v48, %v7269_v54  ;;  %v4193_v1 = vrot.slane %v7277_v27, %v7269_v54 }
 0x5d2   : > { %v3826_v16 = vrot.slane %v7287_v2, %v7269_v54  ;;  %v4210_v30 = vsel %vm3851_vm5, %v4185_v43, %v4181_v6  ;;  %v3834_v18 = vrot.slane %v7284_v62, %v7269_v54 }
 0x5d3   : > { %v4211_v58 = vsel %vm3853_vm6, %v4189_v23, %v4210_v30  ;;  %v7303_v49 = vpop.xlane.xlu1 %3783  ;;  %v7305_v59 = vpop.xlane.xlu0 %3780 }
 0x5d4   : > { %v3852_v53 = vsel %vm3851_vm5, %v3826_v16, %v3822_v61  ;;  %v7311_v40 = vsub.f32 0.0, %v7303_v49  ;;  %v4212_v56 = vsel %vm3855_vm7, %v4193_v1, %v4211_v58  ;;  %v4201_v42 = vrot.slane %v7303_v49, %v7269_v54 }
 0x5d5   : > { %v7317_v31 = vsub.f32 0.0, %v7305_v59  ;;  %v4197_v21 = vrot.slane %v7305_v59, %v7269_v54  ;;  %v3854_v39 = vsel %vm3853_vm6, %v3830_v45, %v3852_v53  ;;  %v7386_v61 = vsub.s32 3, %v7238_v52 }
 0x5d6   : > { %v3856_v55 = vsel %vm3855_vm7, %v3834_v18, %v3854_v39  ;;  %v3842_v44 = vrot.slane %v7311_v40, %v7269_v54  ;;  %v4031_v45 = vrot.slane %v7381_v25, %v3881_v9  ;;  %v3889_v58 = vsub.s32 4, %v7238_v52 }
 0x5d7   : > { %v3838_v34 = vrot.slane %v7317_v31, %v7269_v54  ;;  %v4213_v22 = vsel %vm3857_vm8, %v4197_v21, %v4212_v56  ;;  %v7328_v15 = vpop.xlane.xlu1 %3789  ;;  %v7330_v8 = vpop.xlane.xlu0 %3786 }
 0x5d8   : > { %v7333_v7 = vsub.f32 0.0, %v7328_v15  ;;  %v4209_v63 = vrot.slane %v7328_v15, %v7269_v54  ;;  %v7338_v60 = vsub.f32 0.0, %v7330_v8  ;;  %v4205_v28 = vrot.slane %v7330_v8, %v7269_v54 }
 0x5d9   : > { %v4214_v29 = vsel %vm3859_vm9, %v4201_v42, %v4213_v22  ;;  %v3858_v50 = vsel %vm3857_vm8, %v3838_v34, %v3856_v55  ;;  %v7400_v42 = vsub.s32 5, %v7238_v52  ;;  %v3897_v55 = vsub.s32 6, %v7238_v52 }
 0x5da   : > { %v3846_v51 = vrot.slane %v7338_v60, %v7269_v54  ;;  %v4215_v26 = vsel %vm3861_vm10, %v4205_v28, %v4214_v29  ;;  %v3850_v35 = vrot.slane %v7333_v7, %v7269_v54  ;;  %v3860_v37 = vsel %vm3859_vm9, %v3842_v44, %v3858_v50 }
 0x5db   : > { %v4216_v12 = vsel %vm3863_vm11, %v4209_v63, %v4215_v26  ;;  %v4272_v17 = vpop.permute.xlu1 %4271  ;;  %v4059_v44 = vrot.slane %v7381_v25, %v3897_v55 }
 0x5dc   : > { %v4218_v4 = vsel %vm3866_vm12, %v4216_v12, inf  ;;  %v3862_v5 = vsel %vm3861_vm10, %v3846_v51, %v3860_v37  ;;  %v3901_v51 = vsub.s32 7, %v7238_v52 }
 0x5dd   : > { %4219 = vmin.xlane.f32.xlu0 %v4218_v4  ;;  %v3864_v41 = vsel %vm3863_vm11, %v3850_v35, %v3862_v5 }
 0x5de   : > { %v3867_v14 = vsel %vm3866_vm12, %v3864_v41, -inf }
 0x5e1   : > { %3868 = vmax.xlane.f32.xlu0 %v3867_v14 }
 0x66a   : > { %v4220_v33 = vpop.xlane.xlu0 %4219 }
 0x66b   : > { %v4229_v6 = vrot.slane %v4220_v33, %v7372_v13  ;;  %v4225_v43 = vrot.slane %v4220_v33, %v7242_v36  ;;  %v4233_v23 = vrot.slane %v4220_v33, %v3881_v9  ;;  %v4237_v53 = vrot.slane %v4220_v33, %v7386_v61 }
 0x66c   : > { %v4241_v56 = vrot.slane %v4220_v33, %v3889_v58  ;;  %v4245_v34 = vrot.slane %v4220_v33, %v7400_v42  ;;  %v4249_v50 = vrot.slane %v4220_v33, %v3897_v55  ;;  %v4253_v37 = vrot.slane %v4220_v33, %v3901_v51 }
 0x66d   : > { %vm4263_vm0 = vcmp.le.f32.partialorder %v7279_v48, %v4229_v6  ;;  %vm4262_vm1 = vcmp.le.f32.partialorder %v7265_v32, %v4225_v43  ;;  %vm4264_vm2 = vcmp.le.f32.partialorder %v7263_v3, %v4233_v23  ;;  %v4045_v32 = vrot.slane %v7381_v25, %v3889_v58 }
 0x66e   : > { %v7390_v1 = vpop.xlane.xlu0 %3868  ;;  %v4274_v16 = vsel %vm4263_vm0, %v4272_v17, 4  ;;  %v4273_v30 = vsel %vm4262_vm1, %v4272_v17, 4  ;;  %v4275_v48 = vsel %vm4264_vm2, %v4272_v17, 4  ;;  %vm4265_vm3 = vcmp.le.f32.partialorder %v7277_v27, %v4237_v53 }
 0x66f   : > { %v3874_v18 = vrot.slane %v7390_v1, %v7242_v36  ;;  %4285 = vperm.xlu1 %5996, %v4274_v16   ;;  %4282 = vperm.xlu0 %5995, %v4273_v30   ;;  %v3882_v21 = vrot.slane %v7390_v1, %v3881_v9  ;;  %v4276_v3 = vsel %vm4265_vm3, %v4272_v17, 4  ;;  %v3890_v63 = vrot.slane %v7390_v1, %v3889_v58 }
 0x670   : > { %vm4266_vm4 = vcmp.le.f32.partialorder %v7305_v59, %v4241_v56  ;;  %v3898_v27 = vrot.slane %v7390_v1, %v3897_v55  ;;  %vm4267_vm0 = vcmp.le.f32.partialorder %v7303_v49, %v4245_v34  ;;  %vm4268_vm1 = vcmp.le.f32.partialorder %v7330_v8, %v4249_v50 }
 0x671   : > { %v3911_v39 = vsub.f32 %v7272_v46, %v3874_v18  ;;  %v3913_v22 = vsub.f32 %v7275_v20, %v3882_v21  ;;  %v4277_v29 = vsel %vm4266_vm4, %v4272_v17, 4  ;;  %v3915_v35 = vsub.f32 %v7317_v31, %v3890_v63 }
 0x672   : > { %v4278_v12 = vsel %vm4267_vm0, %v4272_v17, 4  ;;  %v3917_v59 = vsub.f32 %v7338_v60, %v3898_v27  ;;  %v4279_v5 = vsel %vm4268_vm1, %v4272_v17, 4  ;;  %vm4269_vm2 = vcmp.le.f32.partialorder %v7328_v15, %v4253_v37 }
 0x673   : > { %4288 = vperm.xlu1 %5996, %v4275_v48   ;;  %4033 = vbcast.lane.b32.xlu0 %v4031_v45, 256  ;;  %v3919_v28 = vmul.f32 1.442695, %v3911_v39  ;;  %v3923_v26 = vmul.f32 1.442695, %v3913_v22  ;;  %v4280_v14 = vsel %vm4269_vm2, %v4272_v17, 4  ;;  %v4017_v49 = vrot.slane %v7381_v25, %v7242_v36 }
 0x674   : > { %v3927_v4 = vmul.f32 1.442695, %v3915_v35  ;;  %v3931_v52 = vmul.f32 1.442695, %v3917_v59  ;;  %v3878_v47 = vrot.slane %v7390_v1, %v7372_v13  ;;  %v4024_v8 = vrot.slane %v7381_v25, %v7372_v13 }
 0x675   : > { %5998 = vpow2.f32 %v3919_v28  ;;  %v3886_v15 = vrot.slane %v7390_v1, %v7386_v61  ;;  %v4038_v36 = vrot.slane %v7381_v25, %v7386_v61  ;;  %v3894_v17 = vrot.slane %v7390_v1, %v7400_v42 }
 0x676   : > { %6000 = vpow2.f32 %v3923_v26  ;;  %v3912_v24 = vsub.f32 %v7287_v2, %v3878_v47  ;;  %v4052_v13 = vrot.slane %v7381_v25, %v7400_v42  ;;  %v3902_v16 = vrot.slane %v7390_v1, %v3901_v51 }
 0x677   : > { %4291 = vperm.xlu1 %5996, %v4276_v3   ;;  %4047 = vbcast.lane.b32.xlu0 %v4045_v32, 256  ;;  %6002 = vpow2.f32 %v3927_v4  ;;  %v3914_v33 = vsub.f32 %v7284_v62, %v3886_v15  ;;  %v3916_v23 = vsub.f32 %v7311_v40, %v3894_v17  ;;  %v4066_v61 = vrot.slane %v7381_v25, %v3901_v51 }
 0x678   : > { %6004 = vpow2.f32 %v3931_v52  ;;  %v3921_v9 = vmul.f32 1.442695, %v3912_v24  ;;  %v3918_v45 = vsub.f32 %v7333_v7, %v3902_v16 }
 0x679   : > { %v3925_v43 = vmul.f32 1.442695, %v3914_v33  ;;  %v3929_v30 = vmul.f32 1.442695, %v3916_v23 }
 0x67a   : > { %6006 = vpow2.f32 %v3921_v9  ;;  %v3933_v58 = vmul.f32 1.442695, %v3918_v45 }
 0x67b   : > { %4294 = vperm.xlu1 %5996, %v4277_v29   ;;  %4061 = vbcast.lane.b32.xlu0 %v4059_v44, 256  ;;  %6008 = vpow2.f32 %v3925_v43 }
 0x67c   : > { %6010 = vpow2.f32 %v3929_v30 }
 0x67d   : > { %6012 = vpow2.f32 %v3933_v58 }
 0x67f   : > { %4297 = vperm.xlu1 %5996, %v4278_v12   ;;  %v5999_v41 = vpop.eup %5998 }
 0x680   : > { %3944 = vperm.xlu0 %5995, %v5999_v41   ;;  %v6001_v19 = vpop.eup %6000 }
 0x681   : > { %v6003_v11 = vpop.eup %6002 }
 0x682   : > { %v6005_v6 = vpop.eup %6004 }
 0x683   : > { %4300 = vperm.xlu1 %5996, %v4279_v5  }
 0x684   : > { %3950 = vperm.xlu0 %5995, %v6001_v19   ;;  %v6007_v18 = vpop.eup %6006 }
 0x685   : > { %v6009_v53 = vpop.eup %6008 }
 0x686   : > { %v6011_v48 = vpop.eup %6010 }
 0x687   : > { %4303 = vperm.xlu1 %5996, %v4280_v14   ;;  %v6013_v32 = vpop.eup %6012 }
 0x688   : > { %3956 = vperm.xlu0 %5995, %v6003_v11  }
 0x68b   : > { %4019 = vbcast.lane.b32.xlu1 %v4017_v49, 256 }
 0x68c   : > { %3962 = vperm.xlu0 %5995, %v6005_v6  }
 0x68f   : > { %4026 = vbcast.lane.b32.xlu1 %v4024_v8, 256 }
 0x693   : > { %4040 = vbcast.lane.b32.xlu1 %v4038_v36, 256 }
 0x697   : > { %4054 = vbcast.lane.b32.xlu1 %v4052_v13, 256 }
 0x69b   : > { %4068 = vbcast.lane.b32.xlu1 %v4066_v61, 256 }
 0x69f   : > { %3947 = vperm.xlu1 %5996, %v6007_v18  }
 0x6a3   : > { %3953 = vperm.xlu1 %5996, %v6009_v53  }
 0x6a7   : > { %3959 = vperm.xlu1 %5996, %v6011_v48  }
 0x6ab   : > { %3965 = vperm.xlu1 %5996, %v6013_v32  }
 0x6ee   : > { %v4286_v56 = vpop.permute.xlu1 %4285  ;;  %v4283_v39 = vpop.permute.xlu0 %4282 }
 0x6ef   : > { %v4312_v3 = vrot.slane %v4286_v56, %v7269_v54  ;;  %v4308_v44 = vrot.slane %v4283_v39, %v7269_v54 }
 0x6f1   : > { %v4337_v29 = vsel %vm3851_vm5, %v4312_v3, %v4308_v44 }
 0x6f2   : > { %v4289_v42 = vpop.permute.xlu1 %4288  ;;  %v4034_v27 = vpop.permute.xlu0 %4033 }
 0x6f3   : > { %v4316_v34 = vrot.slane %v4289_v42, %v7269_v54  ;;  %v4080_v9 = vmul.f32 %v4034_v27, %v7275_v20 }
 0x6f5   : > { %v4338_v51 = vsel %vm3853_vm6, %v4316_v34, %v4337_v29 }
 0x6f6   : > { %v4292_v21 = vpop.permute.xlu1 %4291  ;;  %v4048_v52 = vpop.permute.xlu0 %4047 }
 0x6f7   : > { %v4320_v22 = vrot.slane %v4292_v21, %v7269_v54  ;;  %v4082_v13 = vmul.f32 %v4048_v52, %v7317_v31 }
 0x6f9   : > { %v4339_v35 = vsel %vm3855_vm7, %v4320_v22, %v4338_v51 }
 0x6fa   : > { %v4295_v25 = vpop.permute.xlu1 %4294  ;;  %v4062_v15 = vpop.permute.xlu0 %4061 }
 0x6fb   : > { %v4324_v63 = vrot.slane %v4295_v25, %v7269_v54  ;;  %v4084_v58 = vmul.f32 %v4062_v15, %v7338_v60 }
 0x6fd   : > { %v4340_v12 = vsel %vm3857_vm8, %v4324_v63, %v4339_v35 }
 0x6fe   : > { %v4298_v55 = vpop.permute.xlu1 %4297 }
 0x6ff   : > { %v4328_v50 = vrot.slane %v4298_v55, %v7269_v54  ;;  %v3945_v33 = vpop.permute.xlu0 %3944 }
 0x700   : > { %v3970_v16 = vrot.slane %v3945_v33, %v7269_v54 }
 0x701   : > { %v4341_v4 = vsel %vm3859_vm9, %v4328_v50, %v4340_v12 }
 0x702   : > { %v4301_v28 = vpop.permute.xlu1 %4300 }
 0x703   : > { %v4332_v26 = vrot.slane %v4301_v28, %v7269_v54  ;;  %v3951_v43 = vpop.permute.xlu0 %3950 }
 0x704   : > { %v3978_v45 = vrot.slane %v3951_v43, %v7269_v54 }
 0x705   : > { %v4342_v5 = vsel %vm3861_vm10, %v4332_v26, %v4341_v4 }
 0x706   : > { %v4304_v37 = vpop.permute.xlu1 %4303 }
 0x707   : > { %v4336_v59 = vrot.slane %v4304_v37, %v7269_v54  ;;  %v3957_v30 = vpop.permute.xlu0 %3956 }
 0x709   : > { %v4343_v41 = vsel %vm3863_vm11, %v4336_v59, %v4342_v5 }
 0x70a   : > { %v4020_v14 = vpop.permute.xlu1 %4019  ;;  %v7454_v49 = vsel %vm3866_vm12, %v4343_v41, 2147483647 }
 0x70b   : > { %v4078_v47 = vmul.f32 %v4020_v14, %v7272_v46  ;;  %v4346_v19 = vshra.s32 %v7454_v49, 16  ;;  %v3963_v32 = vpop.permute.xlu0 %3962  ;;  %v4345_v26 = vand.u32 65535, %v7454_v49 }
 0x70c   : > { %v3994_v60 = vrot.slane %v3963_v32, %v7269_v54 }
 0x70d   : > { %4095 = vperm.xlu1 %5996, %v4078_v47   ;;  %v4348_v8 = vcvt.s32.f32 %v4346_v19  ;;  %v4347_v4 = vcvt.s32.f32 %v4345_v26 }
 0x70e   : > { %v4027_v24 = vpop.permute.xlu1 %4026 }
 0x70f   : > { %v4079_v11 = vmul.f32 %v4027_v24, %v7287_v2  ;;  %4349 = vmin.xlane.f32.xlu0 %v4348_v8 }
 0x711   : > { %4098 = vperm.xlu1 %5996, %v4079_v11  }
 0x712   : > { %v4041_v36 = vpop.permute.xlu1 %4040 }
 0x713   : > { %v4081_v6 = vmul.f32 %v4041_v36, %v7284_v62 }
 0x715   : > { %4101 = vperm.xlu1 %5996, %v4080_v9  }
 0x716   : > { %v4055_v17 = vpop.permute.xlu1 %4054 }
 0x717   : > { %v4083_v2 = vmul.f32 %v4055_v17, %v7311_v40  ;;  %v3986_v40 = vrot.slane %v3957_v30, %v7269_v54 }
 0x719   : > { %4104 = vperm.xlu1 %5996, %v4081_v6  }
 0x71a   : > { %v4069_v46 = vpop.permute.xlu1 %4068 }
 0x71b   : > { %v4085_v56 = vmul.f32 %v4069_v46, %v7333_v7  ;;  %v4359_v7 = vsel %vm3800_vm15, %v7260_v10, 0 }
 0x71c   : > { %v4360_v22 = vsel %vm3866_vm12, %v4359_v7, 0 }
 0x71d   : > { %4107 = vperm.xlu1 %5996, %v4082_v13   ;;  %v4362_v63 = vshrl.u32 %v4360_v22, 16  ;;  %v4361_v35 = vand.u32 65535, %v4360_v22 }
 0x71e   : > { %v3948_v23 = vpop.permute.xlu1 %3947 }
 0x71f   : > { %v3974_v61 = vrot.slane %v3948_v23, %v7269_v54  ;;  %v4364_v28 = vcvt.s32.f32 %v4362_v63  ;;  %v4363_v38 = vcvt.s32.f32 %v4361_v35 }
 0x721   : > { %v3999_v20 = vsel %vm3851_vm5, %v3974_v61, %v3970_v16  ;;  %4110 = vperm.xlu1 %5996, %v4083_v2  }
 0x722   : > { %v3954_v62 = vpop.permute.xlu1 %3953  ;;  %v4000_v18 = vsel %vm3853_vm6, %v3978_v45, %v3999_v20 }
 0x723   : > { %v3982_v31 = vrot.slane %v3954_v62, %v7269_v54 }
 0x725   : > { %v4001_v53 = vsel %vm3855_vm7, %v3982_v31, %v4000_v18  ;;  %4113 = vperm.xlu1 %5996, %v4084_v58  }
 0x726   : > { %v3960_v48 = vpop.permute.xlu1 %3959  ;;  %v4002_v21 = vsel %vm3857_vm8, %v3986_v40, %v4001_v53 }
 0x727   : > { %v3990_v42 = vrot.slane %v3960_v48, %v7269_v54 }
 0x729   : > { %v4003_v25 = vsel %vm3859_vm9, %v3990_v42, %v4002_v21  ;;  %4116 = vperm.xlu1 %5996, %v4085_v56  }
 0x72a   : > { %v3966_v39 = vpop.permute.xlu1 %3965  ;;  %v4004_v3 = vsel %vm3861_vm10, %v3994_v60, %v4003_v25 }
 0x72b   : > { %v3998_v55 = vrot.slane %v3966_v39, %v7269_v54 }
 0x72d   : > { %v4005_v44 = vsel %vm3863_vm11, %v3998_v55, %v4004_v3 }
 0x72e   : > { %v4007_v34 = vsel %vm3866_vm12, %v4005_v44, 0.0 }
 0x72f   : > { %4008 = vadd.xlane.f32.xlu0 %v4007_v34 }
 0x74d   : > { %4367 = vadd.xlane.f32.xlu1 %v4364_v28 }
 0x78c   : > { %v4096_v29 = vpop.permute.xlu1 %4095 }
 0x78d   : > { %v4121_v41 = vrot.slane %v4096_v29, %v7269_v54 }
 0x790   : > { %v4099_v27 = vpop.permute.xlu1 %4098 }
 0x791   : > { %v4125_v5 = vrot.slane %v4099_v27, %v7269_v54 }
 0x793   : > { %v4150_v19 = vsel %vm3851_vm5, %v4125_v5, %v4121_v41 }
 0x794   : > { %v4102_v50 = vpop.permute.xlu1 %4101 }
 0x795   : > { %v4129_v52 = vrot.slane %v4102_v50, %v7269_v54 }
 0x797   : > { %v4151_v24 = vsel %vm3853_vm6, %v4129_v52, %v4150_v19  ;;  %vm4384_vm6 = vcmp.eq.s32.totalorder %v7260_v10, 1 }
 0x798   : > { %v4105_v51 = vpop.permute.xlu1 %4104 }
 0x799   : > { %v4133_v14 = vrot.slane %v4105_v51, %v7269_v54 }
 0x79b   : > { %v4152_v11 = vsel %vm3855_vm7, %v4133_v14, %v4151_v24  ;;  %vm4383_vm7 = vcmp.eq.s32.totalorder %v7260_v10, 0 }
 0x79c   : > { %v4108_v12 = vpop.permute.xlu1 %4107  ;;  %v4350_v37 = vpop.xlane.xlu0 %4349 }
 0x79d   : > { %vm4351_vm3 = vcmp.eq.f32.partialorder %v4348_v8, %v4350_v37  ;;  %v4137_v49 = vrot.slane %v4108_v12, %v7269_v54  ;;  %v4356_v61 = vcvt.f32.s32 %v4350_v37 }
 0x79e   : > { %v4352_v57 = vsel %vm4351_vm3, %v4347_v4, inf }
 0x79f   : > { %4353 = vmin.xlane.f32.xlu0 %v4352_v57  ;;  %v4153_v36 = vsel %vm3857_vm8, %v4137_v49, %v4152_v11  ;;  %v4357_v62 = vshll.u32 %v4356_v61, 16 }
 0x7a0   : > { %v4111_v59 = vpop.permute.xlu1 %4110 }
 0x7a1   : > { %v4141_v8 = vrot.slane %v4111_v59, %v7269_v54 }
 0x7a3   : > { %4365 = vadd.xlane.f32.xlu0 %v4363_v38  ;;  %v4154_v33 = vsel %vm3859_vm9, %v4141_v8, %v4153_v36 }
 0x7a4   : > { %v4114_v47 = vpop.permute.xlu1 %4113 }
 0x7a5   : > { %v4145_v15 = vrot.slane %v4114_v47, %v7269_v54 }
 0x7a7   : > { %v4155_v6 = vsel %vm3861_vm10, %v4145_v15, %v4154_v33 }
 0x7a8   : > { %v4117_v9 = vpop.permute.xlu1 %4116 }
 0x7a9   : > { %v4149_v17 = vrot.slane %v4117_v9, %v7269_v54 }
 0x7ab   : > { %v4156_v46 = vsel %vm3863_vm11, %v4149_v17, %v4155_v6 }
 0x7ac   : > { %v4158_v13 = vsel %vm3866_vm12, %v4156_v46, 0.0 }
 0x7ad   : > { %4159 = vadd.xlane.f32.xlu0 %v4158_v13 }
 0x7bc   : > { %v4009_v43 = vpop.xlane.xlu0 %4008 }
 0x7bd   : > { %6014 = vlog2.f32 %v4009_v43 }
 0x7c7   : > { %v6015_v31 = vpop.eup %6014 }
 0x7c8   : > { %v4011_v53 = vmul.f32 0.6931472, %v6015_v31 }
 0x7ca   : > { %v4012_v56 = vadd.f32 %v4011_v53, %v7390_v1 }
 0x7da   : > { %v4368_v23 = vpop.xlane.xlu1 %4367 }
 0x7db   : > { %v4370_v16 = vcvt.f32.s32 %v4368_v23 }
 0x7dd   : > { %v4371_v20 = vshll.u32 %v4370_v16, 16 }
 0x82c   : > { %v4354_v2 = vpop.xlane.xlu0 %4353 }
 0x82d   : > { %v4355_v30 = vcvt.f32.s32 %v4354_v2 }
 0x82f   : > { %v4358_v54 = vadd.s32 %v4357_v62, %v4355_v30 }
 0x830   : > { %v4366_v45 = vpop.xlane.xlu0 %4365 }
 0x831   : > { %v4369_v58 = vcvt.f32.s32 %v4366_v45 }
 0x833   : > { %v4372_v18 = vadd.s32 %v4371_v20, %v4369_v58 }
 0x835   : > { %vm4373_vm5 = vcmp.eq.s32.totalorder %v4358_v54, %v4372_v18 }
 0x836   : > { %v4687_v40 = vsel %vm4373_vm5, 1.0, %v6027_v0 }
 0x837   : > { %v4376_v48 = vrot.slane %v4687_v40, 4 }
 0x839   : > { %v4377_v32 = vadd.f32 %v4687_v40, %v4376_v48 }
 0x83a   : > { %v4160_v42 = vpop.xlane.xlu0 %4159 }
 0x83b   : > { %v4378_v21 = vrot.slane %v4377_v32, 2  ;;  %v4161_v25 = vsub.f32 %v4012_v56, %v4160_v42 }
 0x83d   : > { %v4379_v60 = vadd.f32 %v4378_v21, %v4377_v32  ;;  %v4162_v39 = vrot.slane %v4161_v25, 4 }
 0x83f   : > { %v4380_v55 = vrot.slane %v4379_v60, 1  ;;  %v4163_v3 = vadd.f32 %v4162_v39, %v4161_v25 }
 0x841   : > { %v4164_v44 = vrot.slane %v4163_v3, 2  ;;  %v4381_v34 = vadd.f32 %v4380_v55, %v4379_v60 }
 0x843   : > { %v4165_v7 = vadd.f32 %v4164_v44, %v4163_v3  ;;  %v4382_v63 = vmul.f32 0.125, %v4381_v34 }
 0x845   : > { %v4166_v22 = vrot.slane %v4165_v7, 1  ;;  %v4385_v29 = vsel %vm4384_vm6, %v4382_v63, 0.0 }
 0x847   : > { %v4167_v28 = vadd.f32 %v4166_v22, %v4165_v7 }
 0x849   : > { %v4169_v0 = vmul.f32 0.125, %v4167_v28 }
 0x84b   : > { %v4386_v1 = vsel %vm4383_vm7, %v4169_v0, %v4385_v29 }
 0x84c   : > { %4387 = vst [vmem:[%s7522_s7] sm:$0x1] %v4386_v1 }
 0x84d PF: > { %s17_s24 = sadd.s32 1, %s6022_s24  }
 0x84e   : > { %p14_p5 = scmp.ge.s32.totalorder %s17_s24, 4  }
 0x850   :  { %16 = sbr.rel (!%p14_p5) target bundleno = 1 (0x1), region = 79 }

</bundles_post_ra>
